<compile_context>
chip_gen: v6e
topology: v6e:2x2x1
jax: 0.10.0
libtpu: 0.0.40
codegen_flags: <defaults>
</compile_context>

<pallas_src>
import numpy as np
import jax
import jax.numpy as jnp
from jax.experimental import pallas as pl
from jax.experimental.pallas import tpu as pltpu


# ------------------------------ fused kernel --------------------------------

def simple_cnn_kernel(x_ref, w1_ref, b1_ref, w2_ref, b2_ref, wf_ref, bf_ref,
                      o_ref):
    """Whole simpleCNN forward for one tile of B images.

    x_ref : (28, B, 28)   bf16 input pixels, layout [h, b, w]
    w1_ref: (5, 28, 256)  bf16 conv1 banded weights; lanes [0:128]=phase 0,
                          [128:256]=phase 1 (120 real + 8 pad lanes per phase)
    b1_ref: (1, 128)      f32 conv1 bias tiled over 12 pooled columns (pad 0)
    w2_ref: (5, 128, 256) bf16 conv2 banded weights, K padded 120->128,
                          lanes [0:128]/[128:256] = pool phases (80 real + pad)
    b2_ref: (1, 128)      f32 conv2 bias tiled over 4 pooled columns (pad 0)
    wf_ref: (4, 128, 10)  bf16 fc weights per pooled row (CHW flatten folded in)
    bf_ref: (1, 10)       f32 fc bias
    o_ref : (B, 10)       f32 log-probabilities
    """
    B = o_ref.shape[0]
    f32 = jnp.float32
    bf16 = jnp.bfloat16

    # ---- stage 1: conv1 + bias + 2x2 maxpool + relu -> (12, B, 128) --------
    X = x_ref[...].reshape(28 * B, 28)            # rows = (h, b); aligned merge
    acc = jnp.dot(X[0:24 * B, :], w1_ref[0], preferred_element_type=f32)
    for ki in range(1, 5):                        # rows (i, b) = x[b, i+ki, :]
        acc = acc + jnp.dot(X[ki * B:(ki + 24) * B, :], w1_ref[ki],
                            preferred_element_type=f32)      # (24B, 256)
    m = jnp.maximum(acc[:, 0:128], acc[:, 128:256]) + b1_ref[...]  # width pool
    m = m.reshape(12, 2, B, 128)                  # split rows i -> (i//2, i%2)
    h1 = jnp.maximum(jnp.maximum(m[:, 0], m[:, 1]), 0.0)      # height pool+relu
    h1 = h1.astype(bf16).reshape(12 * B, 128)     # (12B, 128), pad lanes are 0

    # ---- stage 2: conv2 + bias + 2x2 maxpool + relu -> (4, B, 128) ----------
    acc = jnp.dot(h1[0:8 * B, :], w2_ref[0], preferred_element_type=f32)
    for ki in range(1, 5):
        acc = acc + jnp.dot(h1[ki * B:(ki + 8) * B, :], w2_ref[ki],
                            preferred_element_type=f32)      # (8B, 256)
    n = jnp.maximum(acc[:, 0:128], acc[:, 128:256]) + b2_ref[...]
    n = n.reshape(4, 2, B, 128)
    h2 = jnp.maximum(jnp.maximum(n[:, 0], n[:, 1]), 0.0)      # (4, B, 128)
    h2 = h2.astype(bf16)                          # pad lanes stay 0

    # ---- stage 3: fc (CHW flatten folded into wf_ref) + log_softmax --------
    logits = jnp.dot(h2[0], wf_ref[0], preferred_element_type=f32)
    for i in range(1, 4):
        logits = logits + jnp.dot(h2[i], wf_ref[i], preferred_element_type=f32)
    logits = logits + bf_ref[...]                 # (B, 10) f32
    mx = jnp.max(logits, axis=-1, keepdims=True)
    lse = mx + jnp.log(jnp.sum(jnp.exp(logits - mx), axis=-1, keepdims=True))
    o_ref[...] = logits - lse


# ------------------------- trace-time weight relayout ------------------------

def _relayout_weights(params):
    """Fold conv taps, pool phases, lane padding and the CHW flatten into
    bf16 matmul weights (biases stay f32, padded to 128 lanes)."""
    w1, b1, w2, b2, wf, bf = params
    f32, bf16 = jnp.float32, jnp.bfloat16

    # conv1: banded width matrices; phases concatenated along N.
    # w1b[ki, w, 128*phase + u*10 + c] = w1[c, 0, ki, w - (2u+phase)], 0<=kj<=4.
    w_in = np.arange(28)[:, None]                           # (28, 1) input col
    lane1 = np.arange(120)[None, :]                         # (1, 120)
    u1, c1 = lane1 // 10, lane1 % 10
    w1_taps = []
    for ki in range(5):
        halves = []
        for phase in (0, 1):
            kj = w_in - (2 * u1 + phase)                    # (28, 120)
            valid = (kj >= 0) & (kj <= 4)
            kjc = np.clip(kj, 0, 4)
            h = jnp.where(valid, w1[c1, 0, ki, kjc], 0.0)   # (28, 120)
            halves.append(jnp.pad(h, ((0, 0), (0, 8))))     # (28, 128)
        w1_taps.append(jnp.concatenate(halves, axis=1))     # (28, 256)
    w1b = jnp.stack(w1_taps, axis=0).astype(bf16)           # (5, 28, 256)

    # conv2: banded matrices over pooled stage-1 columns; K padded 120->128,
    # phases concatenated along N (each 80-wide half padded to 128).
    lane_in = np.arange(120)[:, None]                       # (120, 1)
    u_in, c_in = lane_in // 10, lane_in % 10
    lane2 = np.arange(80)[None, :]                          # (1, 80)
    u2, c2 = lane2 // 20, lane2 % 20
    w2_taps = []
    for ki in range(5):
        halves = []
        for phase in (0, 1):
            kj = u_in - (2 * u2 + phase)                    # (120, 80)
            valid = (kj >= 0) & (kj <= 4)
            kjc = np.clip(kj, 0, 4)
            h = jnp.where(valid, w2[c2, c_in, ki, kjc], 0.0)  # (120, 80)
            halves.append(jnp.pad(h, ((0, 8), (0, 48))))    # (128, 128)
        w2_taps.append(jnp.concatenate(halves, axis=1))     # (128, 256)
    w2b = jnp.stack(w2_taps, axis=0).astype(bf16)           # (5, 128, 256)

    # fc: fold PyTorch's x.view(N,-1) CHW flatten (index = c2*16 + i*4 + j),
    # one (128, 10) slab per pooled row i (K padded 80 -> 128 with zeros).
    lane2r = np.arange(80)[:, None]                         # (80, 1)
    u2r, c2r = lane2r // 20, lane2r % 20
    o_idx = np.arange(10)[None, :]                          # (1, 10)
    wf_rows = []
    for i in range(4):
        h = wf[o_idx, c2r * 16 + i * 4 + u2r]               # (80, 10)
        wf_rows.append(jnp.pad(h, ((0, 48), (0, 0))))       # (128, 10)
    wfb = jnp.stack(wf_rows, axis=0).astype(bf16)           # (4, 128, 10)

    # Biases tiled over pooled columns, zero-padded to 128 lanes, f32.
    b1t = jnp.pad(jnp.tile(b1, 12), (0, 8)).reshape(1, 128).astype(f32)
    b2t = jnp.pad(jnp.tile(b2, 4), (0, 48)).reshape(1, 128).astype(f32)
    bft = bf.reshape(1, 10).astype(f32)
    return w1b, b1t, w2b, b2t, wfb, bft


# --------------------------------- wrapper -----------------------------------

def simple_cnn_forward(x, params, *, batch_tile=256):
    """x: (N, 1, 28, 28).  Returns log-probabilities (N, 10) in f32.

    batch_tile is the per-grid-step image count (rounded up to a multiple of
    16 for bf16 sublane alignment).  Suggested per-generation tuning:
    v6e ~256-512, v7x ~256 (64 MiB VMEM/TC, keep >=2 steps), v5e <=192.
    """
    N = x.shape[0]
    assert x.shape[1:] == (1, 28, 28), x.shape

    w1b, b1t, w2b, b2t, wfb, bft = _relayout_weights(params)

    # Batch tile must be a multiple of 16: the in-kernel (28*B, 28) merge and
    # the ki*B row slices assume bf16-sublane-aligned B.
    bt = max(16, ((int(batch_tile) + 15) // 16) * 16)
    B = min(bt, ((N + 15) // 16) * 16)
    Np = ((N + B - 1) // B) * B

    # Layout glue on the raw input only: [n,1,h,w] -> [h, n, w], fused bf16 cast.
    xt = jnp.transpose(x.reshape(N, 28, 28), (1, 0, 2)).astype(jnp.bfloat16)
    if Np != N:
        xt = jnp.pad(xt, ((0, 0), (0, Np - N), (0, 0)))

    out = pl.pallas_call(
        simple_cnn_kernel,
        out_shape=jax.ShapeDtypeStruct((Np, 10), jnp.float32),
        grid=(Np // B,),
        in_specs=[
            pl.BlockSpec((28, B, 28), lambda n: (0, n, 0)),
            pl.BlockSpec((5, 28, 256), lambda n: (0, 0, 0)),
            pl.BlockSpec((1, 128), lambda n: (0, 0)),
            pl.BlockSpec((5, 128, 256), lambda n: (0, 0, 0)),
            pl.BlockSpec((1, 128), lambda n: (0, 0)),
            pl.BlockSpec((4, 128, 10), lambda n: (0, 0, 0)),
            pl.BlockSpec((1, 10), lambda n: (0, 0)),
        ],
        out_specs=pl.BlockSpec((B, 10), lambda n: (n, 0)),
        compiler_params=pltpu.CompilerParams(
            dimension_semantics=("parallel",),
            # ~20-30 MiB actually used at B=256; 48 MiB cap fits every gen
            # (v7x has 64 MiB physical VMEM per TensorCore).
            vmem_limit_bytes=48 * 1024 * 1024,
        ),
    )(xt, w1b, b1t, w2b, b2t, wfb, bft)
    return out[:N]


# ------------------------------ reference & init ------------------------------

def init_params(key):
    """Deterministic init matching the nn.Module parameter shapes."""
    ks = jax.random.split(key, 6)

    def uni(k, shape, fan_in):
        bound = 1.0 / np.sqrt(fan_in)
        return jax.random.uniform(k, shape, jnp.float32, -bound, bound)

    w1 = uni(ks[0], (10, 1, 5, 5), 1 * 5 * 5)
    b1 = uni(ks[1], (10,), 1 * 5 * 5)
    w2 = uni(ks[2], (20, 10, 5, 5), 10 * 5 * 5)
    b2 = uni(ks[3], (20,), 10 * 5 * 5)
    wf = uni(ks[4], (10, 320), 320)
    bf = uni(ks[5], (10,), 320)
    return (w1, b1, w2, b2, wf, bf)


def reference_forward(x, params):
    """Pure-XLA f32 reference with the exact PyTorch module semantics."""
    w1, b1, w2, b2, wf, bf = params
    dn = ("NCHW", "OIHW", "NCHW")
    hi = jax.lax.Precision.HIGHEST
    y = jax.lax.conv_general_dilated(x, w1, (1, 1), "VALID",
                                     dimension_numbers=dn, precision=hi)
    y = y + b1[None, :, None, None]
    y = jax.lax.reduce_window(y, -jnp.inf, jax.lax.max,
                              (1, 1, 2, 2), (1, 1, 2, 2), "VALID")
    y = jnp.maximum(y, 0.0)
    y = jax.lax.conv_general_dilated(y, w2, (1, 1), "VALID",
                                     dimension_numbers=dn, precision=hi)
    y = y + b2[None, :, None, None]
    y = jax.lax.reduce_window(y, -jnp.inf, jax.lax.max,
                              (1, 1, 2, 2), (1, 1, 2, 2), "VALID")
    y = jnp.maximum(y, 0.0)
    y = y.reshape(x.shape[0], -1)
    logits = jnp.dot(y, wf.T, precision=hi) + bf
    return jax.nn.log_softmax(logits, axis=-1)


if __name__ == "__main__":
    key = jax.random.PRNGKey(0)
    k_x, k_p = jax.random.split(key)

    N = 8
    x = jax.random.normal(k_x, (N, 1, 28, 28), jnp.float32)
    params = init_params(k_p)

    fwd = jax.jit(simple_cnn_forward)
    out = jax.block_until_ready(fwd(x, params))
    assert out.shape == (N, 10), out.shape

    # log_softmax rows must exponentiate to probability distributions.
    row_sums = np.asarray(jnp.sum(jnp.exp(out), axis=-1))
    assert np.allclose(row_sums, 1.0, atol=1e-3), row_sums

    # Cross-check against a pure-XLA f32 reference (kernel matmuls are bf16).
    ref = jax.block_until_ready(jax.jit(reference_forward)(x, params))
    max_err = float(jnp.max(jnp.abs(out - ref)))
    assert max_err < 5e-2, max_err

    print("KERNEL_OK")
</pallas_src>

<mosaic_0001>
module attributes {stable_mosaic.version = 11 : i64} {
  func.func @simple_cnn_kernel(%arg0: i32, %arg1: memref<28x16x28xbf16, #tpu.memory_space<vmem>>, %arg2: memref<5x28x256xbf16, #tpu.memory_space<vmem>>, %arg3: memref<1x128xf32, #tpu.memory_space<vmem>>, %arg4: memref<5x128x256xbf16, #tpu.memory_space<vmem>>, %arg5: memref<1x128xf32, #tpu.memory_space<vmem>>, %arg6: memref<4x128x10xbf16, #tpu.memory_space<vmem>>, %arg7: memref<1x10xf32, #tpu.memory_space<vmem>>, %arg8: memref<16x10xf32, #tpu.memory_space<vmem>>) attributes {dimension_semantics = [#tpu.dimension_semantics<parallel>], iteration_bounds = array<i64: 1>, scalar_prefetch = 0 : i64, scratch_operands = 0 : i64, tpu.core_type = #tpu.core_type<tc>, window_params = [{transform_indices = @transform_0, window_bounds = array<i64: 28, 16, 28>}, {pipeline_mode = #tpu.pipeline_mode<synchronous>, transform_indices = @transform_1, window_bounds = array<i64: 5, 28, 256>}, {pipeline_mode = #tpu.pipeline_mode<synchronous>, transform_indices = @transform_2, window_bounds = array<i64: 1, 128>}, {pipeline_mode = #tpu.pipeline_mode<synchronous>, transform_indices = @transform_3, window_bounds = array<i64: 5, 128, 256>}, {pipeline_mode = #tpu.pipeline_mode<synchronous>, transform_indices = @transform_4, window_bounds = array<i64: 1, 128>}, {pipeline_mode = #tpu.pipeline_mode<synchronous>, transform_indices = @transform_5, window_bounds = array<i64: 4, 128, 10>}, {pipeline_mode = #tpu.pipeline_mode<synchronous>, transform_indices = @transform_6, window_bounds = array<i64: 1, 10>}, {transform_indices = @transform_7, window_bounds = array<i64: 16, 10>}]} {
    %c0 = arith.constant 0 : index
    %c0_0 = arith.constant 0 : index
    %c0_1 = arith.constant 0 : index
    %0 = vector.load %arg1[%c0, %c0_0, %c0_1] : memref<28x16x28xbf16, #tpu.memory_space<vmem>>, vector<28x16x28xbf16>
    %1 = vector.shape_cast %0 : vector<28x16x28xbf16> to vector<448x28xbf16>
    %2 = vector.extract_strided_slice %1 {offsets = [0, 0], sizes = [384, 28], strides = [1, 1]} : vector<448x28xbf16> to vector<384x28xbf16>
    %c0_2 = arith.constant 0 : index
    %c0_3 = arith.constant 0 : index
    %c0_4 = arith.constant 0 : index
    %3 = vector.load %arg2[%c0_2, %c0_3, %c0_4] : memref<5x28x256xbf16, #tpu.memory_space<vmem>>, vector<1x28x256xbf16>
    %4 = vector.shape_cast %3 : vector<1x28x256xbf16> to vector<28x256xbf16>
    %cst = arith.constant dense<0.000000e+00> : vector<384x256xf32>
    %5 = tpu.matmul %2, %4, %cst {dimension_numbers = #tpu.dot_dimension_numbers<[1], [0], [0], [1], [0, 0, 1, 1], [], []>} : vector<384x28xbf16>, vector<28x256xbf16>, vector<384x256xf32> -> vector<384x256xf32>
    %6 = vector.extract_strided_slice %1 {offsets = [16, 0], sizes = [384, 28], strides = [1, 1]} : vector<448x28xbf16> to vector<384x28xbf16>
    %c1 = arith.constant 1 : index
    %c0_5 = arith.constant 0 : index
    %c0_6 = arith.constant 0 : index
    %7 = vector.load %arg2[%c1, %c0_5, %c0_6] : memref<5x28x256xbf16, #tpu.memory_space<vmem>>, vector<1x28x256xbf16>
    %8 = vector.shape_cast %7 : vector<1x28x256xbf16> to vector<28x256xbf16>
    %cst_7 = arith.constant dense<0.000000e+00> : vector<384x256xf32>
    %9 = tpu.matmul %6, %8, %cst_7 {dimension_numbers = #tpu.dot_dimension_numbers<[1], [0], [0], [1], [0, 0, 1, 1], [], []>} : vector<384x28xbf16>, vector<28x256xbf16>, vector<384x256xf32> -> vector<384x256xf32>
    %10 = arith.addf %5, %9 : vector<384x256xf32>
    %11 = vector.extract_strided_slice %1 {offsets = [32, 0], sizes = [384, 28], strides = [1, 1]} : vector<448x28xbf16> to vector<384x28xbf16>
    %c2 = arith.constant 2 : index
    %c0_8 = arith.constant 0 : index
    %c0_9 = arith.constant 0 : index
    %12 = vector.load %arg2[%c2, %c0_8, %c0_9] : memref<5x28x256xbf16, #tpu.memory_space<vmem>>, vector<1x28x256xbf16>
    %13 = vector.shape_cast %12 : vector<1x28x256xbf16> to vector<28x256xbf16>
    %cst_10 = arith.constant dense<0.000000e+00> : vector<384x256xf32>
    %14 = tpu.matmul %11, %13, %cst_10 {dimension_numbers = #tpu.dot_dimension_numbers<[1], [0], [0], [1], [0, 0, 1, 1], [], []>} : vector<384x28xbf16>, vector<28x256xbf16>, vector<384x256xf32> -> vector<384x256xf32>
    %15 = arith.addf %10, %14 : vector<384x256xf32>
    %16 = vector.extract_strided_slice %1 {offsets = [48, 0], sizes = [384, 28], strides = [1, 1]} : vector<448x28xbf16> to vector<384x28xbf16>
    %c3 = arith.constant 3 : index
    %c0_11 = arith.constant 0 : index
    %c0_12 = arith.constant 0 : index
    %17 = vector.load %arg2[%c3, %c0_11, %c0_12] : memref<5x28x256xbf16, #tpu.memory_space<vmem>>, vector<1x28x256xbf16>
    %18 = vector.shape_cast %17 : vector<1x28x256xbf16> to vector<28x256xbf16>
    %cst_13 = arith.constant dense<0.000000e+00> : vector<384x256xf32>
    %19 = tpu.matmul %16, %18, %cst_13 {dimension_numbers = #tpu.dot_dimension_numbers<[1], [0], [0], [1], [0, 0, 1, 1], [], []>} : vector<384x28xbf16>, vector<28x256xbf16>, vector<384x256xf32> -> vector<384x256xf32>
    %20 = arith.addf %15, %19 : vector<384x256xf32>
    %21 = vector.extract_strided_slice %1 {offsets = [64, 0], sizes = [384, 28], strides = [1, 1]} : vector<448x28xbf16> to vector<384x28xbf16>
    %c4 = arith.constant 4 : index
    %c0_14 = arith.constant 0 : index
    %c0_15 = arith.constant 0 : index
    %22 = vector.load %arg2[%c4, %c0_14, %c0_15] : memref<5x28x256xbf16, #tpu.memory_space<vmem>>, vector<1x28x256xbf16>
    %23 = vector.shape_cast %22 : vector<1x28x256xbf16> to vector<28x256xbf16>
    %cst_16 = arith.constant dense<0.000000e+00> : vector<384x256xf32>
    %24 = tpu.matmul %21, %23, %cst_16 {dimension_numbers = #tpu.dot_dimension_numbers<[1], [0], [0], [1], [0, 0, 1, 1], [], []>} : vector<384x28xbf16>, vector<28x256xbf16>, vector<384x256xf32> -> vector<384x256xf32>
    %25 = arith.addf %20, %24 : vector<384x256xf32>
    %26 = vector.extract_strided_slice %25 {offsets = [0, 0], sizes = [384, 128], strides = [1, 1]} : vector<384x256xf32> to vector<384x128xf32>
    %27 = vector.extract_strided_slice %25 {offsets = [0, 128], sizes = [384, 128], strides = [1, 1]} : vector<384x256xf32> to vector<384x128xf32>
    %28 = arith.maximumf %26, %27 : vector<384x128xf32>
    %c0_17 = arith.constant 0 : index
    %c0_18 = arith.constant 0 : index
    %29 = vector.load %arg3[%c0_17, %c0_18] : memref<1x128xf32, #tpu.memory_space<vmem>>, vector<1x128xf32>
    %30 = vector.broadcast %29 : vector<1x128xf32> to vector<384x128xf32>
    %31 = arith.addf %28, %30 : vector<384x128xf32>
    %32 = vector.shape_cast %31 : vector<384x128xf32> to vector<12x2x16x128xf32>
    %33 = vector.extract_strided_slice %32 {offsets = [0, 0, 0, 0], sizes = [12, 1, 16, 128], strides = [1, 1, 1, 1]} : vector<12x2x16x128xf32> to vector<12x1x16x128xf32>
    %34 = vector.shape_cast %33 : vector<12x1x16x128xf32> to vector<12x16x128xf32>
    %35 = vector.extract_strided_slice %32 {offsets = [0, 1, 0, 0], sizes = [12, 1, 16, 128], strides = [1, 1, 1, 1]} : vector<12x2x16x128xf32> to vector<12x1x16x128xf32>
    %36 = vector.shape_cast %35 : vector<12x1x16x128xf32> to vector<12x16x128xf32>
    %37 = arith.maximumf %34, %36 : vector<12x16x128xf32>
    %cst_19 = arith.constant 0.000000e+00 : f32
    %38 = vector.broadcast %cst_19 : f32 to vector<12x16x128xf32>
    %39 = arith.maximumf %37, %38 : vector<12x16x128xf32>
    %40 = arith.truncf %39 : vector<12x16x128xf32> to vector<12x16x128xbf16>
    %41 = vector.shape_cast %40 : vector<12x16x128xbf16> to vector<192x128xbf16>
    %42 = vector.extract_strided_slice %41 {offsets = [0, 0], sizes = [128, 128], strides = [1, 1]} : vector<192x128xbf16> to vector<128x128xbf16>
    %c0_20 = arith.constant 0 : index
    %c0_21 = arith.constant 0 : index
    %c0_22 = arith.constant 0 : index
    %43 = vector.load %arg4[%c0_20, %c0_21, %c0_22] : memref<5x128x256xbf16, #tpu.memory_space<vmem>>, vector<1x128x256xbf16>
    %44 = vector.shape_cast %43 : vector<1x128x256xbf16> to vector<128x256xbf16>
    %cst_23 = arith.constant dense<0.000000e+00> : vector<128x256xf32>
    %45 = tpu.matmul %42, %44, %cst_23 {dimension_numbers = #tpu.dot_dimension_numbers<[1], [0], [0], [1], [0, 0, 1, 1], [], []>} : vector<128x128xbf16>, vector<128x256xbf16>, vector<128x256xf32> -> vector<128x256xf32>
    %46 = vector.extract_strided_slice %41 {offsets = [16, 0], sizes = [128, 128], strides = [1, 1]} : vector<192x128xbf16> to vector<128x128xbf16>
    %c1_24 = arith.constant 1 : index
    %c0_25 = arith.constant 0 : index
    %c0_26 = arith.constant 0 : index
    %47 = vector.load %arg4[%c1_24, %c0_25, %c0_26] : memref<5x128x256xbf16, #tpu.memory_space<vmem>>, vector<1x128x256xbf16>
    %48 = vector.shape_cast %47 : vector<1x128x256xbf16> to vector<128x256xbf16>
    %cst_27 = arith.constant dense<0.000000e+00> : vector<128x256xf32>
    %49 = tpu.matmul %46, %48, %cst_27 {dimension_numbers = #tpu.dot_dimension_numbers<[1], [0], [0], [1], [0, 0, 1, 1], [], []>} : vector<128x128xbf16>, vector<128x256xbf16>, vector<128x256xf32> -> vector<128x256xf32>
    %50 = arith.addf %45, %49 : vector<128x256xf32>
    %51 = vector.extract_strided_slice %41 {offsets = [32, 0], sizes = [128, 128], strides = [1, 1]} : vector<192x128xbf16> to vector<128x128xbf16>
    %c2_28 = arith.constant 2 : index
    %c0_29 = arith.constant 0 : index
    %c0_30 = arith.constant 0 : index
    %52 = vector.load %arg4[%c2_28, %c0_29, %c0_30] : memref<5x128x256xbf16, #tpu.memory_space<vmem>>, vector<1x128x256xbf16>
    %53 = vector.shape_cast %52 : vector<1x128x256xbf16> to vector<128x256xbf16>
    %cst_31 = arith.constant dense<0.000000e+00> : vector<128x256xf32>
    %54 = tpu.matmul %51, %53, %cst_31 {dimension_numbers = #tpu.dot_dimension_numbers<[1], [0], [0], [1], [0, 0, 1, 1], [], []>} : vector<128x128xbf16>, vector<128x256xbf16>, vector<128x256xf32> -> vector<128x256xf32>
    %55 = arith.addf %50, %54 : vector<128x256xf32>
    %56 = vector.extract_strided_slice %41 {offsets = [48, 0], sizes = [128, 128], strides = [1, 1]} : vector<192x128xbf16> to vector<128x128xbf16>
    %c3_32 = arith.constant 3 : index
    %c0_33 = arith.constant 0 : index
    %c0_34 = arith.constant 0 : index
    %57 = vector.load %arg4[%c3_32, %c0_33, %c0_34] : memref<5x128x256xbf16, #tpu.memory_space<vmem>>, vector<1x128x256xbf16>
    %58 = vector.shape_cast %57 : vector<1x128x256xbf16> to vector<128x256xbf16>
    %cst_35 = arith.constant dense<0.000000e+00> : vector<128x256xf32>
    %59 = tpu.matmul %56, %58, %cst_35 {dimension_numbers = #tpu.dot_dimension_numbers<[1], [0], [0], [1], [0, 0, 1, 1], [], []>} : vector<128x128xbf16>, vector<128x256xbf16>, vector<128x256xf32> -> vector<128x256xf32>
    %60 = arith.addf %55, %59 : vector<128x256xf32>
    %61 = vector.extract_strided_slice %41 {offsets = [64, 0], sizes = [128, 128], strides = [1, 1]} : vector<192x128xbf16> to vector<128x128xbf16>
    %c4_36 = arith.constant 4 : index
    %c0_37 = arith.constant 0 : index
    %c0_38 = arith.constant 0 : index
    %62 = vector.load %arg4[%c4_36, %c0_37, %c0_38] : memref<5x128x256xbf16, #tpu.memory_space<vmem>>, vector<1x128x256xbf16>
    %63 = vector.shape_cast %62 : vector<1x128x256xbf16> to vector<128x256xbf16>
    %cst_39 = arith.constant dense<0.000000e+00> : vector<128x256xf32>
    %64 = tpu.matmul %61, %63, %cst_39 {dimension_numbers = #tpu.dot_dimension_numbers<[1], [0], [0], [1], [0, 0, 1, 1], [], []>} : vector<128x128xbf16>, vector<128x256xbf16>, vector<128x256xf32> -> vector<128x256xf32>
    %65 = arith.addf %60, %64 : vector<128x256xf32>
    %66 = vector.extract_strided_slice %65 {offsets = [0, 0], sizes = [128, 128], strides = [1, 1]} : vector<128x256xf32> to vector<128x128xf32>
    %67 = vector.extract_strided_slice %65 {offsets = [0, 128], sizes = [128, 128], strides = [1, 1]} : vector<128x256xf32> to vector<128x128xf32>
    %68 = arith.maximumf %66, %67 : vector<128x128xf32>
    %c0_40 = arith.constant 0 : index
    %c0_41 = arith.constant 0 : index
    %69 = vector.load %arg5[%c0_40, %c0_41] : memref<1x128xf32, #tpu.memory_space<vmem>>, vector<1x128xf32>
    %70 = vector.broadcast %69 : vector<1x128xf32> to vector<128x128xf32>
    %71 = arith.addf %68, %70 : vector<128x128xf32>
    %72 = vector.shape_cast %71 : vector<128x128xf32> to vector<4x2x16x128xf32>
    %73 = vector.extract_strided_slice %72 {offsets = [0, 0, 0, 0], sizes = [4, 1, 16, 128], strides = [1, 1, 1, 1]} : vector<4x2x16x128xf32> to vector<4x1x16x128xf32>
    %74 = vector.shape_cast %73 : vector<4x1x16x128xf32> to vector<4x16x128xf32>
    %75 = vector.extract_strided_slice %72 {offsets = [0, 1, 0, 0], sizes = [4, 1, 16, 128], strides = [1, 1, 1, 1]} : vector<4x2x16x128xf32> to vector<4x1x16x128xf32>
    %76 = vector.shape_cast %75 : vector<4x1x16x128xf32> to vector<4x16x128xf32>
    %77 = arith.maximumf %74, %76 : vector<4x16x128xf32>
    %cst_42 = arith.constant 0.000000e+00 : f32
    %78 = vector.broadcast %cst_42 : f32 to vector<4x16x128xf32>
    %79 = arith.maximumf %77, %78 : vector<4x16x128xf32>
    %80 = arith.truncf %79 : vector<4x16x128xf32> to vector<4x16x128xbf16>
    %81 = vector.extract_strided_slice %80 {offsets = [0, 0, 0], sizes = [1, 16, 128], strides = [1, 1, 1]} : vector<4x16x128xbf16> to vector<1x16x128xbf16>
    %82 = vector.shape_cast %81 : vector<1x16x128xbf16> to vector<16x128xbf16>
    %c0_43 = arith.constant 0 : index
    %c0_44 = arith.constant 0 : index
    %c0_45 = arith.constant 0 : index
    %83 = vector.load %arg6[%c0_43, %c0_44, %c0_45] : memref<4x128x10xbf16, #tpu.memory_space<vmem>>, vector<1x128x10xbf16>
    %84 = vector.shape_cast %83 : vector<1x128x10xbf16> to vector<128x10xbf16>
    %cst_46 = arith.constant dense<0.000000e+00> : vector<16x10xf32>
    %85 = tpu.matmul %82, %84, %cst_46 {dimension_numbers = #tpu.dot_dimension_numbers<[1], [0], [0], [1], [0, 0, 1, 1], [], []>} : vector<16x128xbf16>, vector<128x10xbf16>, vector<16x10xf32> -> vector<16x10xf32>
    %86 = vector.extract_strided_slice %80 {offsets = [1, 0, 0], sizes = [1, 16, 128], strides = [1, 1, 1]} : vector<4x16x128xbf16> to vector<1x16x128xbf16>
    %87 = vector.shape_cast %86 : vector<1x16x128xbf16> to vector<16x128xbf16>
    %c1_47 = arith.constant 1 : index
    %c0_48 = arith.constant 0 : index
    %c0_49 = arith.constant 0 : index
    %88 = vector.load %arg6[%c1_47, %c0_48, %c0_49] : memref<4x128x10xbf16, #tpu.memory_space<vmem>>, vector<1x128x10xbf16>
    %89 = vector.shape_cast %88 : vector<1x128x10xbf16> to vector<128x10xbf16>
    %cst_50 = arith.constant dense<0.000000e+00> : vector<16x10xf32>
    %90 = tpu.matmul %87, %89, %cst_50 {dimension_numbers = #tpu.dot_dimension_numbers<[1], [0], [0], [1], [0, 0, 1, 1], [], []>} : vector<16x128xbf16>, vector<128x10xbf16>, vector<16x10xf32> -> vector<16x10xf32>
    %91 = arith.addf %85, %90 : vector<16x10xf32>
    %92 = vector.extract_strided_slice %80 {offsets = [2, 0, 0], sizes = [1, 16, 128], strides = [1, 1, 1]} : vector<4x16x128xbf16> to vector<1x16x128xbf16>
    %93 = vector.shape_cast %92 : vector<1x16x128xbf16> to vector<16x128xbf16>
    %c2_51 = arith.constant 2 : index
    %c0_52 = arith.constant 0 : index
    %c0_53 = arith.constant 0 : index
    %94 = vector.load %arg6[%c2_51, %c0_52, %c0_53] : memref<4x128x10xbf16, #tpu.memory_space<vmem>>, vector<1x128x10xbf16>
    %95 = vector.shape_cast %94 : vector<1x128x10xbf16> to vector<128x10xbf16>
    %cst_54 = arith.constant dense<0.000000e+00> : vector<16x10xf32>
    %96 = tpu.matmul %93, %95, %cst_54 {dimension_numbers = #tpu.dot_dimension_numbers<[1], [0], [0], [1], [0, 0, 1, 1], [], []>} : vector<16x128xbf16>, vector<128x10xbf16>, vector<16x10xf32> -> vector<16x10xf32>
    %97 = arith.addf %91, %96 : vector<16x10xf32>
    %98 = vector.extract_strided_slice %80 {offsets = [3, 0, 0], sizes = [1, 16, 128], strides = [1, 1, 1]} : vector<4x16x128xbf16> to vector<1x16x128xbf16>
    %99 = vector.shape_cast %98 : vector<1x16x128xbf16> to vector<16x128xbf16>
    %c3_55 = arith.constant 3 : index
    %c0_56 = arith.constant 0 : index
    %c0_57 = arith.constant 0 : index
    %100 = vector.load %arg6[%c3_55, %c0_56, %c0_57] : memref<4x128x10xbf16, #tpu.memory_space<vmem>>, vector<1x128x10xbf16>
    %101 = vector.shape_cast %100 : vector<1x128x10xbf16> to vector<128x10xbf16>
    %cst_58 = arith.constant dense<0.000000e+00> : vector<16x10xf32>
    %102 = tpu.matmul %99, %101, %cst_58 {dimension_numbers = #tpu.dot_dimension_numbers<[1], [0], [0], [1], [0, 0, 1, 1], [], []>} : vector<16x128xbf16>, vector<128x10xbf16>, vector<16x10xf32> -> vector<16x10xf32>
    %103 = arith.addf %97, %102 : vector<16x10xf32>
    %c0_59 = arith.constant 0 : index
    %c0_60 = arith.constant 0 : index
    %104 = vector.load %arg7[%c0_59, %c0_60] : memref<1x10xf32, #tpu.memory_space<vmem>>, vector<1x10xf32>
    %105 = vector.broadcast %104 : vector<1x10xf32> to vector<16x10xf32>
    %106 = arith.addf %103, %105 : vector<16x10xf32>
    %cst_61 = arith.constant dense<0xFF800000> : vector<16xf32>
    %107 = vector.multi_reduction <maximumf>, %106, %cst_61 [1] : vector<16x10xf32> to vector<16xf32>
    %108 = vector.shape_cast %107 : vector<16xf32> to vector<16x1xf32>
    %109 = vector.broadcast %108 : vector<16x1xf32> to vector<16x10xf32>
    %110 = arith.subf %106, %109 : vector<16x10xf32>
    %111 = math.exp %110 : vector<16x10xf32>
    %cst_62 = arith.constant dense<0.000000e+00> : vector<16xf32>
    %112 = vector.multi_reduction <add>, %111, %cst_62 [1] : vector<16x10xf32> to vector<16xf32>
    %113 = vector.shape_cast %112 : vector<16xf32> to vector<16x1xf32>
    %114 = math.log %113 : vector<16x1xf32>
    %115 = arith.addf %108, %114 : vector<16x1xf32>
    %116 = vector.broadcast %115 : vector<16x1xf32> to vector<16x10xf32>
    %117 = arith.subf %106, %116 : vector<16x10xf32>
    %c0_63 = arith.constant 0 : index
    %c0_64 = arith.constant 0 : index
    %118 = vector.load %arg8[%c0_63, %c0_64] : memref<16x10xf32, #tpu.memory_space<vmem>>, vector<16x10xf32>
    tpu.vector_store %arg8[%c0_63, %c0_64], %117 {strides = array<i32>} : memref<16x10xf32, #tpu.memory_space<vmem>>, vector<16x10xf32>,
    return
  }
  func.func @transform_0(%arg0: i32) -> (i32, i32, i32) {
    %c0_i32 = arith.constant 0 : i32
    %c0_i32_0 = arith.constant 0 : i32
    %c0_i32_1 = arith.constant 0 : i32
    return %c0_i32, %arg0, %c0_i32_0 : i32, i32, i32
  }
  func.func @transform_1(%arg0: i32) -> (i32, i32, i32) {
    %c0_i32 = arith.constant 0 : i32
    %c0_i32_0 = arith.constant 0 : i32
    %c0_i32_1 = arith.constant 0 : i32
    %c0_i32_2 = arith.constant 0 : i32
    return %c0_i32, %c0_i32_0, %c0_i32_1 : i32, i32, i32
  }
  func.func @transform_2(%arg0: i32) -> (i32, i32) {
    %c0_i32 = arith.constant 0 : i32
    %c0_i32_0 = arith.constant 0 : i32
    %c0_i32_1 = arith.constant 0 : i32
    return %c0_i32, %c0_i32_0 : i32, i32
  }
  func.func @transform_3(%arg0: i32) -> (i32, i32, i32) {
    %c0_i32 = arith.constant 0 : i32
    %c0_i32_0 = arith.constant 0 : i32
    %c0_i32_1 = arith.constant 0 : i32
    %c0_i32_2 = arith.constant 0 : i32
    return %c0_i32, %c0_i32_0, %c0_i32_1 : i32, i32, i32
  }
  func.func @transform_4(%arg0: i32) -> (i32, i32) {
    %c0_i32 = arith.constant 0 : i32
    %c0_i32_0 = arith.constant 0 : i32
    %c0_i32_1 = arith.constant 0 : i32
    return %c0_i32, %c0_i32_0 : i32, i32
  }
  func.func @transform_5(%arg0: i32) -> (i32, i32, i32) {
    %c0_i32 = arith.constant 0 : i32
    %c0_i32_0 = arith.constant 0 : i32
    %c0_i32_1 = arith.constant 0 : i32
    %c0_i32_2 = arith.constant 0 : i32
    return %c0_i32, %c0_i32_0, %c0_i32_1 : i32, i32, i32
  }
  func.func @transform_6(%arg0: i32) -> (i32, i32) {
    %c0_i32 = arith.constant 0 : i32
    %c0_i32_0 = arith.constant 0 : i32
    %c0_i32_1 = arith.constant 0 : i32
    return %c0_i32, %c0_i32_0 : i32, i32
  }
  func.func @transform_7(%arg0: i32) -> (i32, i32) {
    %c0_i32 = arith.constant 0 : i32
    %c0_i32_0 = arith.constant 0 : i32
    return %arg0, %c0_i32 : i32, i32
  }
}

</mosaic_0001>

<bundles_post_ra>
// kernel: tile.13
= control target key start
LH: loop header
LB: loop body
LE: loop exit
PB: predicated region body
PF: predicated region fallthrough
CT: control target
= control target key end

     0   :  { %s28_s0 = inlined_call_operand.vmem [shape: f32[10], index: 0, kind: input, shape index: {}]   ;;  %s29_s1 = inlined_call_operand.vmem [shape: f32[12,10], index: 1, kind: output, shape index: {}]  }
   0x1   :  { %v4_v0 = vld [vmem:[%s28_s0] ss:$0 sm:$0xff] }
   0x2   :  { %5 = vst [vmem:[%s29_s1] sm:$0xff] %v4_v0  ;;  %8 = vst [vmem:[%s29_s1 + $0x8] sm:$0xff] %v4_v0 }

// kernel: tile.14
= control target key start
LH: loop header
LB: loop body
LE: loop exit
PB: predicated region body
PF: predicated region fallthrough
CT: control target
= control target key end

     0   :  { %s101_s10 = smov 110   ;;  %s102_s11 = smov 90   ;;  %vm3_vm0 = vcmask 80896   ;;  %vm9_vm1 = vcmask 982896   ;;  %vm15_vm2 = vcmask 900896   ;;  %vm21_vm3 = vcmask 818896   ;;  %s161_s0 = inlined_call_operand.vmem [shape: f32[12,10], index: 0, kind: input, shape index: {}]   ;;  %s162_s1 = inlined_call_operand.vmem [shape: f32[120], index: 1, kind: output, shape index: {}]  }
   0x1   :  { %v79_v0 = vld [vmem:[%s161_s0 + $0xb] sm:$0x1]   ;;  %v81_v1 = vld [vmem:[%s161_s0 + $0x9] sm:$0x1]   ;;  %v80_v2 = vld [vmem:[%s161_s0 + $0xa] sm:$0x1]  }
   0x2   :  { %7 = vrot.lane.b32.xlu0 %v79_v0, %s101_s10  ;;  %19 = vrot.lane.b32.xlu1 %v81_v1, %s102_s11  ;;  %v82_v3 = vld [vmem:[%s161_s0 + $0x8] sm:$0x1]   ;;  %s103_s16 = smov 100   ;;  %s104_s17 = smov 80   ;;  %v83_v4 = vld [vmem:[%s161_s0 + $0x7] sm:$0x1]  }
   0x3   :  { %v2_v5 = vld [vmem:[%s161_s0] sm:$0x1]   ;;  %v84_v6 = vld [vmem:[%s161_s0 + $0x6] sm:$0x1]   ;;  %s105_s24 = smov 70   ;;  %s106_s25 = smov 60  }
   0x4   :  { %4 = vst.msk [vmem:[#allocation0] sm:$0x1] %vm3_vm0, %v2_v5   ;;  %v85_v7 = vld [vmem:[%s161_s0 + $0x5] sm:$0x1]   ;;  %v86_v8 = vld [vmem:[%s161_s0 + $0x4] sm:$0x1]  }
   0x5   :  { %s107_s30 = smov 50   ;;  %s108_s2 = smov 40   ;;  %v87_v9 = vld [vmem:[%s161_s0 + $0x3] sm:$0x1]   ;;  %v88_v10 = vld [vmem:[%s161_s0 + $0x2] sm:$0x1]  }
   0x6   :  { %13 = vrot.lane.b32.xlu0 %v80_v2, %s103_s16  ;;  %25 = vrot.lane.b32.xlu1 %v82_v3, %s104_s17  ;;  %s109_s7 = smov 30   ;;  %s110_s8 = smov 20   ;;  %v89_v11 = vld [vmem:[%s161_s0 + $0x1] sm:$0x1]   ;;  %vm27_vm4 = vcmask 736896   ;;  %vm33_vm5 = vcmask 654896  }
   0x7   :  { %s111_s0 = smov 10   ;;  %vm39_vm6 = vcmask 572896   ;;  %vm45_vm7 = vcmask 490896   ;;  %vm51_vm8 = vcmask 408896   ;;  %vm57_vm9 = vcmask 326896  }
   0x8   :  { %vm63_vm10 = vcmask 244896   ;;  %vm69_vm11 = vcmask 162896  }
   0xa   :  { %31 = vrot.lane.b32.xlu0 %v83_v4, %s105_s24  ;;  %37 = vrot.lane.b32.xlu1 %v84_v6, %s106_s25 }
   0xe   :  { %43 = vrot.lane.b32.xlu0 %v85_v7, %s107_s30  ;;  %49 = vrot.lane.b32.xlu1 %v86_v8, %s108_s2 }
  0x12   :  { %55 = vrot.lane.b32.xlu0 %v87_v9, %s109_s7  ;;  %61 = vrot.lane.b32.xlu1 %v88_v10, %s110_s8 }
  0x16   :  { %67 = vrot.lane.b32.xlu0 %v89_v11, %s111_s0 }
  0x74   :  { %v8_v12 = vpop.permute.xlu0 %7   ;;  %v20_v13 = vpop.permute.xlu1 %19  }
  0x75   :  { %10 = vst.msk [vmem:[#allocation0] sm:$0x1] %vm9_vm1, %v8_v12  }
  0x78   :  { %v14_v14 = vpop.permute.xlu0 %13   ;;  %v26_v15 = vpop.permute.xlu1 %25  }
  0x79   :  { %16 = vst.msk [vmem:[#allocation0] sm:$0x1] %vm15_vm2, %v14_v14  }
  0x7a   :  { %22 = vst.msk [vmem:[#allocation0] sm:$0x1] %vm21_vm3, %v20_v13  }
  0x7b   :  { %28 = vst.msk [vmem:[#allocation0] sm:$0x1] %vm27_vm4, %v26_v15  }
  0x7c   :  { %v32_v16 = vpop.permute.xlu0 %31   ;;  %v38_v17 = vpop.permute.xlu1 %37  }
  0x7d   :  { %34 = vst.msk [vmem:[#allocation0] sm:$0x1] %vm33_vm5, %v32_v16  }
  0x7e   :  { %40 = vst.msk [vmem:[#allocation0] sm:$0x1] %vm39_vm6, %v38_v17  }
  0x80   :  { %v44_v18 = vpop.permute.xlu0 %43   ;;  %v50_v19 = vpop.permute.xlu1 %49  }
  0x81   :  { %46 = vst.msk [vmem:[#allocation0] sm:$0x1] %vm45_vm7, %v44_v18  }
  0x82   :  { %52 = vst.msk [vmem:[#allocation0] sm:$0x1] %vm51_vm8, %v50_v19  }
  0x84   :  { %v56_v20 = vpop.permute.xlu0 %55   ;;  %v62_v21 = vpop.permute.xlu1 %61  }
  0x85   :  { %58 = vst.msk [vmem:[#allocation0] sm:$0x1] %vm57_vm9, %v56_v20  }
  0x86   :  { %64 = vst.msk [vmem:[#allocation0] sm:$0x1] %vm63_vm10, %v62_v21  }
  0x88   :  { %v68_v22 = vpop.permute.xlu0 %67  }
  0x89   :  { %70 = vst.msk [vmem:[#allocation0] sm:$0x1] %vm69_vm11, %v68_v22  }
  0x90   :  { %v75_v23 = vld [vmem:[#allocation0] sm:$0x1] }
  0x91   :  { %78 = vst [vmem:[%s162_s1] sm:$0x1] %v75_v23 }

// kernel: tile.18
= control target key start
LH: loop header
LB: loop body
LE: loop exit
PB: predicated region body
PF: predicated region fallthrough
CT: control target
= control target key end

     0   :  { %s22_s0 = inlined_call_operand.vmem [shape: f32[20], index: 0, kind: input, shape index: {}]   ;;  %s23_s1 = inlined_call_operand.vmem [shape: f32[4,20], index: 1, kind: output, shape index: {}]  }
   0x1   :  { %v4_v0 = vld [vmem:[%s22_s0] ss:$0 sm:$0xff] }
   0x2   :  { %5 = vst [vmem:[%s23_s1] sm:$0xf] %v4_v0 }

// kernel: tile.19
= control target key start
LH: loop header
LB: loop body
LE: loop exit
PB: predicated region body
PF: predicated region fallthrough
CT: control target
= control target key end

     0   :  { %vm8_vm0 = vcmask 162816   ;;  %s40_s8 = smov 20   ;;  %s41_s9 = smov 40   ;;  %vm14_vm1 = vcmask 654816   ;;  %vm20_vm2 = vcmask 490816   ;;  %vm26_vm3 = vcmask 326816   ;;  %s58_s0 = inlined_call_operand.vmem [shape: f32[4,20], index: 0, kind: input, shape index: {}]   ;;  %s59_s1 = inlined_call_operand.vmem [shape: f32[80], index: 1, kind: output, shape index: {}]  }
   0x1   :  { %v5_v0 = vld [vmem:[%s58_s0] sm:$0xf]  ;;  %s39_s0 = smov 60  }
   0x2   :  { %6 = vst [vmem:[#allocation1] sm:$0xf] %v5_v0 }
   0x9   :  { %v11_v1 = vld [vmem:[#allocation1 + $0x3] sm:$0x1]   ;;  %v23_v2 = vld [vmem:[#allocation1 + $0x1] sm:$0x1]   ;;  %v7_v3 = vld [vmem:[#allocation1] sm:$0x1]  }
   0xa   :  { %12 = vrot.lane.b32.xlu0 %v11_v1, %s39_s0  ;;  %24 = vrot.lane.b32.xlu1 %v23_v2, %s40_s8  ;;  %v17_v4 = vld [vmem:[#allocation1 + $0x2] sm:$0x1]   ;;  %9 = vst.msk [vmem:[#allocation0] sm:$0x1] %vm8_vm0, %v7_v3  }
   0xe   :  { %18 = vrot.lane.b32.xlu0 %v17_v4, %s41_s9 }
  0x7c   :  { %v13_v5 = vpop.permute.xlu0 %12   ;;  %v25_v6 = vpop.permute.xlu1 %24  }
  0x7d   :  { %15 = vst.msk [vmem:[#allocation0] sm:$0x1] %vm14_vm1, %v13_v5  }
  0x80   :  { %v19_v7 = vpop.permute.xlu0 %18  }
  0x81   :  { %21 = vst.msk [vmem:[#allocation0] sm:$0x1] %vm20_vm2, %v19_v7  }
  0x82   :  { %27 = vst.msk [vmem:[#allocation0] sm:$0x1] %vm26_vm3, %v25_v6  }
  0x89   :  { %v32_v8 = vld [vmem:[#allocation0] sm:$0x1] }
  0x8a   :  { %35 = vst [vmem:[%s59_s1] sm:$0x1] %v32_v8 }

// kernel: simple_cnn_forward.1
= control target key start
LH: loop header
LB: loop body
LE: loop exit
PB: predicated region body
PF: predicated region fallthrough
CT: control target
= control target key end

     0   :  { %vm303_vm0 = vcmask 1045504   ;;  %v7142_v1 = vmov 0   ;;  %vm230_vm1 = vcmask 228352   ;;  %vm4719_vm2 = vmmov 0   ;;  %s7134_s1 = inlined_call_operand.vmem [shape: bf16[5,28,256], index: 1, kind: input, shape index: {}]   ;;  %s7135_s0 = inlined_call_operand.vmem [shape: bf16[28,16,28], index: 0, kind: input, shape index: {}]   ;;  %s7136_s3 = inlined_call_operand.vmem [shape: bf16[5,128,256], index: 3, kind: input, shape index: {}]   ;;  %s7137_s2 = inlined_call_operand.vmem [shape: f32[1,128], index: 2, kind: input, shape index: {}]   ;;  %s7138_s5 = inlined_call_operand.vmem [shape: bf16[4,128,10], index: 5, kind: input, shape index: {}]   ;;  %s7139_s4 = inlined_call_operand.vmem [shape: f32[1,128], index: 4, kind: input, shape index: {}]   ;;  %s7140_s6 = inlined_call_operand.vmem [shape: f32[1,10], index: 6, kind: input, shape index: {}]   ;;  %s7141_s7 = inlined_call_operand.vmem [shape: f32[16,10], index: 7, kind: output, shape index: {}]  }
   0x1   :  { %v4477_v0 = vld [vmem:[%s7134_s1 + $0x34] ss:$8 sps:$4 sm:$0x3f]   ;;  %342 = vmatprep.mubr.bf16.mxu0 %v7142_v1  ;;  %647 = vmatprep.mubr.bf16.mxu1 %v7142_v1  ;;  %v4481_v3 = vld [vmem:[%s7134_s1 + $0x30] ss:$8 sps:$4 sm:$0x3f]  }
   0x2   :  { %v4479_v2 = vld [vmem:[%s7134_s1 + $0x14] ss:$8 sps:$4 sm:$0x3f]   ;;  %3974 = vmatprep.subr.msk.bf16.mxu0 %vm303_vm0, %v4477_v0  ;;  %v4482_v4 = vld [vmem:[%s7134_s1 + $0x10] ss:$8 sps:$4 sm:$0x3f]  }
   0x3   :  { %4004 = vmatprep.subr.msk.bf16.mxu1 %vm303_vm0, %v4479_v2  ;;  %v4483_v5 = vld [vmem:[%s7134_s1 + $0x24] ss:$8 sps:$4 sm:$0xff]   ;;  %v305_v6 = vsel %vm303_vm0, %v4481_v3, 0  ;;  %v610_v7 = vsel %vm303_vm0, %v4482_v4, 0  ;;  %v4487_v9 = vld [vmem:[%s7134_s1 + $0x20] ss:$8 sps:$4 sm:$0xff]  }
   0x4   :  { %v4485_v8 = vld [vmem:[%s7134_s1 + $0x4] ss:$8 sps:$4 sm:$0xff]   ;;  %323 = vmatpush1.bf16.msra.mxu0 %v305_v6  ;;  %628 = vmatpush1.bf16.msra.mxu1 %v610_v7  ;;  %v4488_v10 = vld [vmem:[%s7134_s1] ss:$8 sps:$4 sm:$0xff]   ;;  %v4811_v16 = vld [vmem:[%s7135_s0 + $0x10] sm:$0xff]   ;;  %vm3909_vm3 = vcmask 80896  }
   0x5   :  { %324 = vmatprep.subr.bf16.mxu0 %v4483_v5  ;;  %629 = vmatprep.subr.bf16.mxu1 %v4485_v8  ;;  %v4489_v11 = vld [vmem:[%s7135_s0 + $0x8] sm:$0xff]   ;;  %v4490_v12 = vld [vmem:[%s7135_s0] sm:$0xff]   ;;  %v4491_v13 = vld [vmem:[%s7134_s1 + $0x54] ss:$8 sps:$4 sm:$0x3f]  }
   0x6   :  { %v4493_v14 = vld [vmem:[%s7134_s1 + $0x50] ss:$8 sps:$4 sm:$0x3f]   ;;  %v4506_v17 = vld [vmem:[%s7134_s1 + $0x40] ss:$8 sps:$4 sm:$0xff]  }
   0x7   :  { %v920_v15 = vsel %vm303_vm0, %v4493_v14, 0  ;;  %v4508_v18 = vld [vmem:[%s7134_s1 + $0x44] ss:$8 sps:$4 sm:$0xff]   ;;  %v4827_v19 = vld [vmem:[%s7135_s0 + $0x18] sm:$0xff]   ;;  %v4860_v22 = vld [vmem:[%s7135_s0 + $0x30] sm:$0xff]  }
   0x8   :  { %325 = vmatpush1.bf16.msra.mxu0 %v4487_v9  ;;  %630 = vmatpush1.bf16.msra.mxu1 %v4488_v10  ;;  %v4838_v20 = vld [vmem:[%s7135_s0 + $0x20] sm:$0xff]   ;;  %v4849_v21 = vld [vmem:[%s7135_s0 + $0x28] sm:$0xff]   ;;  %v4871_v23 = vld [vmem:[%s7135_s0 + $0x38] sm:$0xff]  }
   0x9   :  { %4038 = vmatprep.subr.msk.bf16.mxu0 %vm303_vm0, %v4491_v13  ;;  %v4882_v24 = vld [vmem:[%s7135_s0 + $0x40] sm:$0xff]   ;;  %v4520_v25 = vld [vmem:[%s7134_s1 + $0x74] ss:$8 sps:$4 sm:$0x3f]   ;;  %v4907_v30 = vld [vmem:[%s7135_s0 + $0x48] sm:$0xff]  }
   0xa   :  { %v4522_v26 = vld [vmem:[%s7134_s1 + $0x70] ss:$8 sps:$4 sm:$0x3f]   ;;  %v4525_v27 = vld [vmem:[%s7134_s1 + $0x64] ss:$8 sps:$4 sm:$0xff]   ;;  %4072 = vmatprep.subr.msk.bf16.mxu1 %vm303_vm0, %v4520_v25 }
   0xb   :  { %3975 = vmatmul.mubr.msk.bf16.vlgmr.msra.gmra.mxu0 %vm230_vm1, %v4489_v11  ;;  %4005 = vmatmul.mubr.msk.bf16.vlgmr.msra.gmra.mxu1 %vm230_vm1, %v4490_v12  ;;  %v1326_v28 = vsel %vm303_vm0, %v4522_v26, 0  ;;  %v4523_v29 = vld [vmem:[%s7134_s1 + $0x60] ss:$8 sps:$4 sm:$0xff]   ;;  %v4526_v31 = vld [vmem:[%s7134_s1 + $0x94] ss:$8 sps:$4 sm:$0x3f]  }
   0xc   :  { %938 = vmatpush1.bf16.msra.mxu0 %v920_v15  ;;  %352 = vmatprep.mubr.bf16.mxu0 %v7142_v1  ;;  %v4922_v32 = vld [vmem:[%s7135_s0 + $0x50] sm:$0xff]   ;;  %v4933_v33 = vld [vmem:[%s7135_s0 + $0x58] sm:$0xff]   ;;  %v4944_v34 = vld [vmem:[%s7135_s0 + $0x60] sm:$0xff]  }
   0xd   :  { %657 = vmatprep.mubr.bf16.mxu1 %v7142_v1  ;;  %939 = vmatprep.subr.bf16.mxu0 %v4508_v18  ;;  %v4955_v35 = vld [vmem:[%s7135_s0 + $0x68] sm:$0xff]   ;;  %v4966_v36 = vld [vmem:[%s7135_s0 + $0x70] sm:$0xff]   ;;  %v4977_v37 = vld [vmem:[%s7135_s0 + $0x78] sm:$0xff]  }
   0xe   :  { %1344 = vmatpush1.bf16.msra.mxu1 %v1326_v28  ;;  %v4988_v38 = vld [vmem:[%s7135_s0 + $0x80] sm:$0xff]   ;;  %v4999_v39 = vld [vmem:[%s7135_s0 + $0x88] sm:$0xff]   ;;  %v5010_v40 = vld [vmem:[%s7135_s0 + $0x90] sm:$0xff]  }
   0xf   :  { %1345 = vmatprep.subr.bf16.mxu1 %v4525_v27  ;;  %v5021_v41 = vld [vmem:[%s7135_s0 + $0x98] sm:$0xff]   ;;  %v5032_v42 = vld [vmem:[%s7135_s0 + $0xa0] sm:$0xff]   ;;  %v5043_v43 = vld [vmem:[%s7135_s0 + $0xa8] sm:$0xff]  }
  0x10   :  { %940 = vmatpush1.bf16.msra.mxu0 %v4506_v17  ;;  %v5054_v44 = vld [vmem:[%s7135_s0 + $0xb0] sm:$0xff]   ;;  %v5065_v45 = vld [vmem:[%s7135_s0 + $0xb8] sm:$0xff]   ;;  %v5076_v46 = vld [vmem:[%s7135_s0 + $0xc0] sm:$0xff]  }
  0x11   :  { %4106 = vmatprep.subr.msk.bf16.mxu0 %vm303_vm0, %v4526_v31  ;;  %v4528_v47 = vld [vmem:[%s7134_s1 + $0x90] ss:$8 sps:$4 sm:$0x3f]   ;;  %v4531_v49 = vld [vmem:[%s7134_s1 + $0x84] ss:$8 sps:$4 sm:$0xff]  }
  0x12   :  { %1346 = vmatpush1.bf16.msra.mxu1 %v4523_v29  ;;  %v1732_v48 = vsel %vm303_vm0, %v4528_v47, 0  ;;  %v4529_v53 = vld [vmem:[%s7134_s1 + $0x80] ss:$8 sps:$4 sm:$0xff]  }
  0x13   :  { %3976 = vmatmul.mubr.msk.bf16.gmra.mxu0 %vm230_vm1, %v4811_v16  ;;  %4006 = vmatmul.mubr.msk.bf16.gmra.mxu1 %vm230_vm1, %v4489_v11 }
  0x14   :  { %362 = vmatprep.mubr.bf16.mxu0 %v7142_v1  ;;  %667 = vmatprep.mubr.bf16.mxu1 %v7142_v1 }
  0x1b   :  { %3977 = vmatmul.mubr.msk.bf16.gmra.mxu0 %vm230_vm1, %v4827_v19  ;;  %4007 = vmatmul.mubr.msk.bf16.gmra.mxu1 %vm230_vm1, %v4811_v16 }
  0x1c   :  { %372 = vmatprep.mubr.bf16.mxu0 %v7142_v1  ;;  %677 = vmatprep.mubr.bf16.mxu1 %v7142_v1 }
  0x23   :  { %3978 = vmatmul.mubr.msk.bf16.gmra.mxu0 %vm230_vm1, %v4838_v20  ;;  %4008 = vmatmul.mubr.msk.bf16.gmra.mxu1 %vm230_vm1, %v4827_v19 }
  0x24   :  { %382 = vmatprep.mubr.bf16.mxu0 %v7142_v1  ;;  %687 = vmatprep.mubr.bf16.mxu1 %v7142_v1 }
  0x2b   :  { %3979 = vmatmul.mubr.msk.bf16.gmra.mxu0 %vm230_vm1, %v4849_v21  ;;  %4009 = vmatmul.mubr.msk.bf16.gmra.mxu1 %vm230_vm1, %v4838_v20 }
  0x2c   :  { %392 = vmatprep.mubr.bf16.mxu0 %v7142_v1  ;;  %697 = vmatprep.mubr.bf16.mxu1 %v7142_v1 }
  0x33   :  { %3980 = vmatmul.mubr.msk.bf16.gmra.mxu0 %vm230_vm1, %v4860_v22  ;;  %4010 = vmatmul.mubr.msk.bf16.gmra.mxu1 %vm230_vm1, %v4849_v21 }
  0x34   :  { %402 = vmatprep.mubr.bf16.mxu0 %v7142_v1  ;;  %707 = vmatprep.mubr.bf16.mxu1 %v7142_v1 }
  0x3b   :  { %3981 = vmatmul.mubr.msk.bf16.gmra.mxu0 %vm230_vm1, %v4871_v23  ;;  %4011 = vmatmul.mubr.msk.bf16.gmra.mxu1 %vm230_vm1, %v4860_v22 }
  0x3c   :  { %412 = vmatprep.mubr.bf16.mxu0 %v7142_v1  ;;  %717 = vmatprep.mubr.bf16.mxu1 %v7142_v1 }
  0x43   :  { %3982 = vmatmul.mubr.msk.bf16.gmra.mxu0 %vm230_vm1, %v4882_v24  ;;  %4012 = vmatmul.mubr.msk.bf16.gmra.mxu1 %vm230_vm1, %v4871_v23 }
  0x44   :  { %422 = vmatprep.mubr.bf16.mxu0 %v7142_v1  ;;  %727 = vmatprep.mubr.bf16.mxu1 %v7142_v1 }
  0x4b   :  { %3983 = vmatmul.mubr.msk.bf16.gmra.mxu0 %vm230_vm1, %v4907_v30  ;;  %4013 = vmatmul.mubr.msk.bf16.gmra.mxu1 %vm230_vm1, %v4882_v24 }
  0x4c   :  { %432 = vmatprep.mubr.bf16.mxu0 %v7142_v1  ;;  %737 = vmatprep.mubr.bf16.mxu1 %v7142_v1 }
  0x53   :  { %3984 = vmatmul.mubr.msk.bf16.gmra.mxu0 %vm230_vm1, %v4922_v32  ;;  %4014 = vmatmul.mubr.msk.bf16.gmra.mxu1 %vm230_vm1, %v4907_v30 }
  0x54   :  { %442 = vmatprep.mubr.bf16.mxu0 %v7142_v1  ;;  %747 = vmatprep.mubr.bf16.mxu1 %v7142_v1 }
  0x5b   :  { %3985 = vmatmul.mubr.msk.bf16.gmra.mxu0 %vm230_vm1, %v4933_v33  ;;  %4015 = vmatmul.mubr.msk.bf16.gmra.mxu1 %vm230_vm1, %v4922_v32 }
  0x5c   :  { %452 = vmatprep.mubr.bf16.mxu0 %v7142_v1  ;;  %757 = vmatprep.mubr.bf16.mxu1 %v7142_v1 }
  0x63   :  { %3986 = vmatmul.mubr.msk.bf16.gmra.mxu0 %vm230_vm1, %v4944_v34  ;;  %4016 = vmatmul.mubr.msk.bf16.gmra.mxu1 %vm230_vm1, %v4933_v33 }
  0x64   :  { %462 = vmatprep.mubr.bf16.mxu0 %v7142_v1  ;;  %767 = vmatprep.mubr.bf16.mxu1 %v7142_v1 }
  0x6b   :  { %3987 = vmatmul.mubr.msk.bf16.gmra.mxu0 %vm230_vm1, %v4955_v35  ;;  %4017 = vmatmul.mubr.msk.bf16.gmra.mxu1 %vm230_vm1, %v4944_v34 }
  0x6c   :  { %472 = vmatprep.mubr.bf16.mxu0 %v7142_v1  ;;  %777 = vmatprep.mubr.bf16.mxu1 %v7142_v1 }
  0x73   :  { %3988 = vmatmul.mubr.msk.bf16.gmra.mxu0 %vm230_vm1, %v4966_v36  ;;  %4018 = vmatmul.mubr.msk.bf16.gmra.mxu1 %vm230_vm1, %v4955_v35 }
  0x74   :  { %482 = vmatprep.mubr.bf16.mxu0 %v7142_v1  ;;  %787 = vmatprep.mubr.bf16.mxu1 %v7142_v1 }
  0x7b   :  { %3989 = vmatmul.mubr.msk.bf16.gmra.mxu0 %vm230_vm1, %v4977_v37  ;;  %4019 = vmatmul.mubr.msk.bf16.gmra.mxu1 %vm230_vm1, %v4966_v36 }
  0x7c   :  { %492 = vmatprep.mubr.bf16.mxu0 %v7142_v1  ;;  %797 = vmatprep.mubr.bf16.mxu1 %v7142_v1 }
  0x83   :  { %3990 = vmatmul.mubr.msk.bf16.gmra.mxu0 %vm230_vm1, %v4988_v38  ;;  %4020 = vmatmul.mubr.msk.bf16.gmra.mxu1 %vm230_vm1, %v4977_v37 }
  0x84   :  { %502 = vmatprep.mubr.bf16.mxu0 %v7142_v1  ;;  %807 = vmatprep.mubr.bf16.mxu1 %v7142_v1 }
  0x8b   :  { %3991 = vmatmul.mubr.msk.bf16.gmra.mxu0 %vm230_vm1, %v4999_v39  ;;  %4021 = vmatmul.mubr.msk.bf16.gmra.mxu1 %vm230_vm1, %v4988_v38 }
  0x8c   :  { %512 = vmatprep.mubr.bf16.mxu0 %v7142_v1  ;;  %817 = vmatprep.mubr.bf16.mxu1 %v7142_v1 }
  0x93   :  { %3992 = vmatmul.mubr.msk.bf16.gmra.mxu0 %vm230_vm1, %v5010_v40  ;;  %4022 = vmatmul.mubr.msk.bf16.gmra.mxu1 %vm230_vm1, %v4999_v39 }
  0x94   :  { %522 = vmatprep.mubr.bf16.mxu0 %v7142_v1  ;;  %827 = vmatprep.mubr.bf16.mxu1 %v7142_v1 }
  0x9b   :  { %3993 = vmatmul.mubr.msk.bf16.gmra.mxu0 %vm230_vm1, %v5021_v41  ;;  %4023 = vmatmul.mubr.msk.bf16.gmra.mxu1 %vm230_vm1, %v5010_v40 }
  0x9c   :  { %532 = vmatprep.mubr.bf16.mxu0 %v7142_v1  ;;  %837 = vmatprep.mubr.bf16.mxu1 %v7142_v1 }
  0xa3   :  { %3994 = vmatmul.mubr.msk.bf16.gmra.mxu0 %vm230_vm1, %v5032_v42  ;;  %4024 = vmatmul.mubr.msk.bf16.gmra.mxu1 %vm230_vm1, %v5021_v41 }
  0xa4   :  { %542 = vmatprep.mubr.bf16.mxu0 %v7142_v1  ;;  %847 = vmatprep.mubr.bf16.mxu1 %v7142_v1 }
  0xab   :  { %3995 = vmatmul.mubr.msk.bf16.gmra.mxu0 %vm230_vm1, %v5043_v43  ;;  %4025 = vmatmul.mubr.msk.bf16.gmra.mxu1 %vm230_vm1, %v5032_v42 }
  0xac   :  { %552 = vmatprep.mubr.bf16.mxu0 %v7142_v1  ;;  %857 = vmatprep.mubr.bf16.mxu1 %v7142_v1 }
  0xb3   :  { %3996 = vmatmul.mubr.msk.bf16.gmra.mxu0 %vm230_vm1, %v5054_v44  ;;  %4026 = vmatmul.mubr.msk.bf16.gmra.mxu1 %vm230_vm1, %v5043_v43 }
  0xb4   :  { %562 = vmatprep.mubr.bf16.mxu0 %v7142_v1  ;;  %867 = vmatprep.mubr.bf16.mxu1 %v7142_v1 }
  0xbb   :  { %3997 = vmatmul.mubr.msk.bf16.gmra.mxu0 %vm230_vm1, %v5065_v45  ;;  %4027 = vmatmul.mubr.msk.bf16.gmra.mxu1 %vm230_vm1, %v5054_v44 }
  0xbc   :  { %572 = vmatprep.mubr.bf16.mxu0 %v7142_v1  ;;  %877 = vmatprep.mubr.bf16.mxu1 %v7142_v1 }
  0xc3   :  { %3998 = vmatmul.mubr.msk.bf16.gmra.mxu0 %vm230_vm1, %v5076_v46  ;;  %4028 = vmatmul.mubr.msk.bf16.gmra.mxu1 %vm230_vm1, %v5065_v45 }
  0xc4   :  { %957 = vmatprep.mubr.bf16.mxu0 %v7142_v1  ;;  %1363 = vmatprep.mubr.bf16.mxu1 %v7142_v1 }
  0xcb   :  { %v344_v50 = vpop.f32.mrf.mxu0  ;;  %v649_v51 = vpop.f32.mrf.mxu1  ;;  %4039 = vmatmul.mubr.msk.bf16.vlgmr.msra.gmra.mxu0 %vm230_vm1, %v4811_v16  ;;  %4073 = vmatmul.mubr.msk.bf16.vlgmr.msra.gmra.mxu1 %vm230_vm1, %v4827_v19 }
  0xcc   :  { %v5095_v52 = vadd.f32 %v649_v51, %v344_v50  ;;  %1750 = vmatpush1.bf16.msra.mxu0 %v1732_v48  ;;  %967 = vmatprep.mubr.bf16.mxu0 %v7142_v1 }
  0xcd   :  { %v346_v54 = vpop.f32.mrf.mxu0  ;;  %v651_v55 = vpop.f32.mrf.mxu1  ;;  %1373 = vmatprep.mubr.bf16.mxu1 %v7142_v1  ;;  %1751 = vmatprep.subr.bf16.mxu0 %v4531_v49 }
  0xce   :  { %v5102_v56 = vadd.f32 %v651_v55, %v346_v54 }
  0xcf   :  { %v348_v57 = vpop.f32.mrf.mxu0  ;;  %v653_v58 = vpop.f32.mrf.mxu1 }
  0xd0   :  { %v5104_v59 = vadd.f32 %v653_v58, %v348_v57  ;;  %1752 = vmatpush1.bf16.msra.mxu0 %v4529_v53 }
  0xd1   :  { %v350_v60 = vpop.f32.mrf.mxu0  ;;  %v655_v61 = vpop.f32.mrf.mxu1 }
  0xd2   :  { %v5106_v62 = vadd.f32 %v655_v61, %v350_v60 }
  0xd3   :  { %v354_v63 = vpop.f32.mrf.mxu0  ;;  %v659_v0 = vpop.f32.mrf.mxu1  ;;  %4040 = vmatmul.mubr.msk.bf16.gmra.mxu0 %vm230_vm1, %v4827_v19  ;;  %4074 = vmatmul.mubr.msk.bf16.gmra.mxu1 %vm230_vm1, %v4838_v20 }
  0xd4   :  { %v5112_v2 = vadd.f32 %v659_v0, %v354_v63  ;;  %977 = vmatprep.mubr.bf16.mxu0 %v7142_v1  ;;  %1383 = vmatprep.mubr.bf16.mxu1 %v7142_v1 }
  0xd5   :  { %v356_v3 = vpop.f32.mrf.mxu0  ;;  %v661_v4 = vpop.f32.mrf.mxu1 }
  0xd6   :  { %v5116_v5 = vadd.f32 %v661_v4, %v356_v3 }
  0xd7   :  { %v358_v6 = vpop.f32.mrf.mxu0  ;;  %v663_v7 = vpop.f32.mrf.mxu1 }
  0xd8   :  { %v5118_v8 = vadd.f32 %v663_v7, %v358_v6 }
  0xd9   :  { %v360_v9 = vpop.f32.mrf.mxu0  ;;  %v665_v10 = vpop.f32.mrf.mxu1 }
  0xda   :  { %v5120_v11 = vadd.f32 %v665_v10, %v360_v9 }
  0xdb   :  { %v364_v12 = vpop.f32.mrf.mxu0  ;;  %v669_v13 = vpop.f32.mrf.mxu1  ;;  %4041 = vmatmul.mubr.msk.bf16.gmra.mxu0 %vm230_vm1, %v4838_v20  ;;  %4075 = vmatmul.mubr.msk.bf16.gmra.mxu1 %vm230_vm1, %v4849_v21 }
  0xdc   :  { %v5126_v14 = vadd.f32 %v669_v13, %v364_v12  ;;  %987 = vmatprep.mubr.bf16.mxu0 %v7142_v1  ;;  %1393 = vmatprep.mubr.bf16.mxu1 %v7142_v1 }
  0xdd   :  { %v366_v15 = vpop.f32.mrf.mxu0  ;;  %v671_v16 = vpop.f32.mrf.mxu1 }
  0xde   :  { %v5130_v17 = vadd.f32 %v671_v16, %v366_v15 }
  0xdf   :  { %v368_v18 = vpop.f32.mrf.mxu0  ;;  %v673_v19 = vpop.f32.mrf.mxu1 }
  0xe0   :  { %v5132_v25 = vadd.f32 %v673_v19, %v368_v18 }
  0xe1   :  { %v370_v26 = vpop.f32.mrf.mxu0  ;;  %v675_v27 = vpop.f32.mrf.mxu1 }
  0xe2   :  { %v5134_v20 = vadd.f32 %v675_v27, %v370_v26 }
  0xe3   :  { %v374_v28 = vpop.f32.mrf.mxu0  ;;  %v679_v29 = vpop.f32.mrf.mxu1  ;;  %4042 = vmatmul.mubr.msk.bf16.gmra.mxu0 %vm230_vm1, %v4849_v21  ;;  %4076 = vmatmul.mubr.msk.bf16.gmra.mxu1 %vm230_vm1, %v4860_v22 }
  0xe4   :  { %v5140_v31 = vadd.f32 %v679_v29, %v374_v28  ;;  %997 = vmatprep.mubr.bf16.mxu0 %v7142_v1  ;;  %1403 = vmatprep.mubr.bf16.mxu1 %v7142_v1 }
  0xe5   :  { %v376_v47 = vpop.f32.mrf.mxu0  ;;  %v681_v48 = vpop.f32.mrf.mxu1 }
  0xe6   :  { %v5144_v49 = vadd.f32 %v681_v48, %v376_v47 }
  0xe7   :  { %v378_v50 = vpop.f32.mrf.mxu0  ;;  %v683_v51 = vpop.f32.mrf.mxu1 }
  0xe8   :  { %v5146_v53 = vadd.f32 %v683_v51, %v378_v50 }
  0xe9   :  { %v380_v54 = vpop.f32.mrf.mxu0  ;;  %v685_v55 = vpop.f32.mrf.mxu1 }
  0xea   :  { %v5148_v21 = vadd.f32 %v685_v55, %v380_v54 }
  0xeb   :  { %v384_v57 = vpop.f32.mrf.mxu0  ;;  %v689_v58 = vpop.f32.mrf.mxu1  ;;  %4043 = vmatmul.mubr.msk.bf16.gmra.mxu0 %vm230_vm1, %v4860_v22  ;;  %4077 = vmatmul.mubr.msk.bf16.gmra.mxu1 %vm230_vm1, %v4871_v23 }
  0xec   :  { %v5154_v60 = vadd.f32 %v689_v58, %v384_v57  ;;  %1007 = vmatprep.mubr.bf16.mxu0 %v7142_v1  ;;  %1413 = vmatprep.mubr.bf16.mxu1 %v7142_v1 }
  0xed   :  { %v386_v61 = vpop.f32.mrf.mxu0  ;;  %v691_v63 = vpop.f32.mrf.mxu1 }
  0xee   :  { %v5158_v0 = vadd.f32 %v691_v63, %v386_v61 }
  0xef   :  { %v388_v3 = vpop.f32.mrf.mxu0  ;;  %v693_v4 = vpop.f32.mrf.mxu1 }
  0xf0   :  { %v5160_v6 = vadd.f32 %v693_v4, %v388_v3 }
  0xf1   :  { %v390_v7 = vpop.f32.mrf.mxu0  ;;  %v695_v9 = vpop.f32.mrf.mxu1 }
  0xf2   :  { %v5162_v22 = vadd.f32 %v695_v9, %v390_v7 }
  0xf3   :  { %v394_v10 = vpop.f32.mrf.mxu0  ;;  %v699_v12 = vpop.f32.mrf.mxu1  ;;  %4044 = vmatmul.mubr.msk.bf16.gmra.mxu0 %vm230_vm1, %v4871_v23  ;;  %4078 = vmatmul.mubr.msk.bf16.gmra.mxu1 %vm230_vm1, %v4882_v24 }
  0xf4   :  { %v5168_v13 = vadd.f32 %v699_v12, %v394_v10  ;;  %1017 = vmatprep.mubr.bf16.mxu0 %v7142_v1  ;;  %1423 = vmatprep.mubr.bf16.mxu1 %v7142_v1 }
  0xf5   :  { %v396_v15 = vpop.f32.mrf.mxu0  ;;  %v701_v16 = vpop.f32.mrf.mxu1 }
  0xf6   :  { %v5172_v18 = vadd.f32 %v701_v16, %v396_v15 }
  0xf7   :  { %v398_v19 = vpop.f32.mrf.mxu0  ;;  %v703_v26 = vpop.f32.mrf.mxu1 }
  0xf8   :  { %v5174_v27 = vadd.f32 %v703_v26, %v398_v19 }
  0xf9   :  { %v400_v28 = vpop.f32.mrf.mxu0  ;;  %v705_v29 = vpop.f32.mrf.mxu1 }
  0xfa   :  { %v5176_v23 = vadd.f32 %v705_v29, %v400_v28 }
  0xfb   :  { %v404_v47 = vpop.f32.mrf.mxu0  ;;  %v709_v48 = vpop.f32.mrf.mxu1  ;;  %4045 = vmatmul.mubr.msk.bf16.gmra.mxu0 %vm230_vm1, %v4882_v24  ;;  %4079 = vmatmul.mubr.msk.bf16.gmra.mxu1 %vm230_vm1, %v4907_v30 }
  0xfc   :  { %v5182_v50 = vadd.f32 %v709_v48, %v404_v47  ;;  %1027 = vmatprep.mubr.bf16.mxu0 %v7142_v1  ;;  %1433 = vmatprep.mubr.bf16.mxu1 %v7142_v1 }
  0xfd   :  { %v406_v51 = vpop.f32.mrf.mxu0  ;;  %v711_v54 = vpop.f32.mrf.mxu1 }
  0xfe   :  { %v5186_v55 = vadd.f32 %v711_v54, %v406_v51 }
  0xff   :  { %v408_v57 = vpop.f32.mrf.mxu0  ;;  %v713_v58 = vpop.f32.mrf.mxu1 }
 0x100   :  { %v5188_v61 = vadd.f32 %v713_v58, %v408_v57 }
 0x101   :  { %v410_v63 = vpop.f32.mrf.mxu0  ;;  %v715_v3 = vpop.f32.mrf.mxu1 }
 0x102   :  { %v5190_v24 = vadd.f32 %v715_v3, %v410_v63 }
 0x103   :  { %v414_v4 = vpop.f32.mrf.mxu0  ;;  %v719_v7 = vpop.f32.mrf.mxu1  ;;  %4046 = vmatmul.mubr.msk.bf16.gmra.mxu0 %vm230_vm1, %v4907_v30  ;;  %4080 = vmatmul.mubr.msk.bf16.gmra.mxu1 %vm230_vm1, %v4922_v32 }
 0x104   :  { %v5196_v9 = vadd.f32 %v719_v7, %v414_v4  ;;  %1037 = vmatprep.mubr.bf16.mxu0 %v7142_v1  ;;  %1443 = vmatprep.mubr.bf16.mxu1 %v7142_v1 }
 0x105   :  { %v416_v10 = vpop.f32.mrf.mxu0  ;;  %v721_v12 = vpop.f32.mrf.mxu1 }
 0x106   :  { %v5200_v15 = vadd.f32 %v721_v12, %v416_v10 }
 0x107   :  { %v418_v16 = vpop.f32.mrf.mxu0  ;;  %v723_v19 = vpop.f32.mrf.mxu1 }
 0x108   :  { %v5202_v26 = vadd.f32 %v723_v19, %v418_v16 }
 0x109   :  { %v420_v28 = vpop.f32.mrf.mxu0  ;;  %v725_v29 = vpop.f32.mrf.mxu1 }
 0x10a   :  { %v5204_v30 = vadd.f32 %v725_v29, %v420_v28 }
 0x10b   :  { %v424_v47 = vpop.f32.mrf.mxu0  ;;  %v729_v48 = vpop.f32.mrf.mxu1  ;;  %4047 = vmatmul.mubr.msk.bf16.gmra.mxu0 %vm230_vm1, %v4922_v32  ;;  %4081 = vmatmul.mubr.msk.bf16.gmra.mxu1 %vm230_vm1, %v4933_v33 }
 0x10c   :  { %v5210_v51 = vadd.f32 %v729_v48, %v424_v47  ;;  %1047 = vmatprep.mubr.bf16.mxu0 %v7142_v1  ;;  %1453 = vmatprep.mubr.bf16.mxu1 %v7142_v1 }
 0x10d   :  { %v426_v54 = vpop.f32.mrf.mxu0  ;;  %v731_v57 = vpop.f32.mrf.mxu1 }
 0x10e   :  { %v5214_v58 = vadd.f32 %v731_v57, %v426_v54 }
 0x10f   :  { %v428_v63 = vpop.f32.mrf.mxu0  ;;  %v733_v3 = vpop.f32.mrf.mxu1 }
 0x110   :  { %v5216_v4 = vadd.f32 %v733_v3, %v428_v63 }
 0x111   :  { %v430_v7 = vpop.f32.mrf.mxu0  ;;  %v735_v10 = vpop.f32.mrf.mxu1 }
 0x112   :  { %v5218_v32 = vadd.f32 %v735_v10, %v430_v7 }
 0x113   :  { %v434_v12 = vpop.f32.mrf.mxu0  ;;  %v739_v16 = vpop.f32.mrf.mxu1  ;;  %4048 = vmatmul.mubr.msk.bf16.gmra.mxu0 %vm230_vm1, %v4933_v33  ;;  %4082 = vmatmul.mubr.msk.bf16.gmra.mxu1 %vm230_vm1, %v4944_v34 }
 0x114   :  { %v5224_v19 = vadd.f32 %v739_v16, %v434_v12  ;;  %1057 = vmatprep.mubr.bf16.mxu0 %v7142_v1  ;;  %1463 = vmatprep.mubr.bf16.mxu1 %v7142_v1 }
 0x115   :  { %v436_v28 = vpop.f32.mrf.mxu0  ;;  %v741_v29 = vpop.f32.mrf.mxu1 }
 0x116   :  { %v5228_v47 = vadd.f32 %v741_v29, %v436_v28 }
 0x117   :  { %v438_v48 = vpop.f32.mrf.mxu0  ;;  %v743_v54 = vpop.f32.mrf.mxu1 }
 0x118   :  { %7148 = vst [vmem:[#allocation2_spill] sm:$0xff] %v5228_v47  ;;  %v5230_v57 = vadd.f32 %v743_v54, %v438_v48 }
 0x119   :  { %v440_v63 = vpop.f32.mrf.mxu0  ;;  %v745_v3 = vpop.f32.mrf.mxu1 }
 0x11a   :  { %7149 = vst [vmem:[#allocation3_spill] sm:$0xff] %v5230_v57  ;;  %v5232_v33 = vadd.f32 %v745_v3, %v440_v63 }
 0x11b   :  { %v444_v7 = vpop.f32.mrf.mxu0  ;;  %v749_v10 = vpop.f32.mrf.mxu1  ;;  %4049 = vmatmul.mubr.msk.bf16.gmra.mxu0 %vm230_vm1, %v4944_v34  ;;  %4083 = vmatmul.mubr.msk.bf16.gmra.mxu1 %vm230_vm1, %v4955_v35 }
 0x11c   :  { %7150 = vst [vmem:[#allocation4_spill] sm:$0xff] %v5232_v33  ;;  %v5238_v12 = vadd.f32 %v749_v10, %v444_v7  ;;  %1067 = vmatprep.mubr.bf16.mxu0 %v7142_v1  ;;  %1473 = vmatprep.mubr.bf16.mxu1 %v7142_v1 }
 0x11d   :  { %v446_v16 = vpop.f32.mrf.mxu0  ;;  %v751_v28 = vpop.f32.mrf.mxu1 }
 0x11e   :  { %v5242_v29 = vadd.f32 %v751_v28, %v446_v16 }
 0x11f   :  { %v448_v48 = vpop.f32.mrf.mxu0  ;;  %v753_v54 = vpop.f32.mrf.mxu1 }
 0x120   :  { %7151 = vst [vmem:[#allocation5_spill] sm:$0xff] %v5242_v29  ;;  %v5244_v63 = vadd.f32 %v753_v54, %v448_v48 }
 0x121   :  { %v450_v3 = vpop.f32.mrf.mxu0  ;;  %v755_v33 = vpop.f32.mrf.mxu1 }
 0x122   :  { %7152 = vst [vmem:[#allocation6_spill] sm:$0xff] %v5244_v63  ;;  %v5246_v34 = vadd.f32 %v755_v33, %v450_v3 }
 0x123   :  { %v454_v57 = vpop.f32.mrf.mxu0  ;;  %v759_v47 = vpop.f32.mrf.mxu1  ;;  %4050 = vmatmul.mubr.msk.bf16.gmra.mxu0 %vm230_vm1, %v4955_v35  ;;  %4084 = vmatmul.mubr.msk.bf16.gmra.mxu1 %vm230_vm1, %v4966_v36 }
 0x124   :  { %7153 = vst [vmem:[#allocation7_spill] sm:$0xff] %v5246_v34  ;;  %v5252_v7 = vadd.f32 %v759_v47, %v454_v57  ;;  %1077 = vmatprep.mubr.bf16.mxu0 %v7142_v1  ;;  %1483 = vmatprep.mubr.bf16.mxu1 %v7142_v1 }
 0x125   :  { %v456_v10 = vpop.f32.mrf.mxu0  ;;  %v761_v16 = vpop.f32.mrf.mxu1 }
 0x126   :  { %v5256_v28 = vadd.f32 %v761_v16, %v456_v10 }
 0x127   :  { %v458_v33 = vpop.f32.mrf.mxu0  ;;  %v763_v48 = vpop.f32.mrf.mxu1 }
 0x128   :  { %7154 = vst [vmem:[#allocation8_spill] sm:$0xff] %v5256_v28  ;;  %v5258_v54 = vadd.f32 %v763_v48, %v458_v33 }
 0x129   :  { %v460_v3 = vpop.f32.mrf.mxu0  ;;  %v765_v34 = vpop.f32.mrf.mxu1 }
 0x12a   :  { %7155 = vst [vmem:[#allocation9_spill] sm:$0xff] %v5258_v54  ;;  %v5260_v35 = vadd.f32 %v765_v34, %v460_v3 }
 0x12b   :  { %v464_v63 = vpop.f32.mrf.mxu0  ;;  %v769_v29 = vpop.f32.mrf.mxu1  ;;  %4051 = vmatmul.mubr.msk.bf16.gmra.mxu0 %vm230_vm1, %v4966_v36  ;;  %4085 = vmatmul.mubr.msk.bf16.gmra.mxu1 %vm230_vm1, %v4977_v37 }
 0x12c   :  { %7156 = vst [vmem:[#allocation10_spill] sm:$0xff] %v5260_v35  ;;  %v5266_v47 = vadd.f32 %v769_v29, %v464_v63  ;;  %1087 = vmatprep.mubr.bf16.mxu0 %v7142_v1  ;;  %1493 = vmatprep.mubr.bf16.mxu1 %v7142_v1 }
 0x12d   :  { %v466_v57 = vpop.f32.mrf.mxu0  ;;  %v771_v10 = vpop.f32.mrf.mxu1 }
 0x12e   :  { %v5270_v16 = vadd.f32 %v771_v10, %v466_v57 }
 0x12f   :  { %v468_v34 = vpop.f32.mrf.mxu0  ;;  %v773_v33 = vpop.f32.mrf.mxu1 }
 0x130   :  { %7157 = vst [vmem:[#allocation11_spill] sm:$0xff] %v5270_v16  ;;  %v5272_v48 = vadd.f32 %v773_v33, %v468_v34 }
 0x131   :  { %v470_v3 = vpop.f32.mrf.mxu0  ;;  %v775_v35 = vpop.f32.mrf.mxu1 }
 0x132   :  { %7158 = vst [vmem:[#allocation12_spill] sm:$0xff] %v5272_v48  ;;  %v5274_v36 = vadd.f32 %v775_v35, %v470_v3 }
 0x133   :  { %v474_v54 = vpop.f32.mrf.mxu0  ;;  %v779_v28 = vpop.f32.mrf.mxu1  ;;  %4052 = vmatmul.mubr.msk.bf16.gmra.mxu0 %vm230_vm1, %v4977_v37  ;;  %4086 = vmatmul.mubr.msk.bf16.gmra.mxu1 %vm230_vm1, %v4988_v38 }
 0x134   :  { %7159 = vst [vmem:[#allocation13_spill] sm:$0xff] %v5274_v36  ;;  %v5280_v29 = vadd.f32 %v779_v28, %v474_v54  ;;  %1097 = vmatprep.mubr.bf16.mxu0 %v7142_v1  ;;  %1503 = vmatprep.mubr.bf16.mxu1 %v7142_v1 }
 0x135   :  { %v476_v63 = vpop.f32.mrf.mxu0  ;;  %v781_v57 = vpop.f32.mrf.mxu1 }
 0x136   :  { %v5284_v10 = vadd.f32 %v781_v57, %v476_v63 }
 0x137   :  { %v478_v35 = vpop.f32.mrf.mxu0  ;;  %v783_v34 = vpop.f32.mrf.mxu1 }
 0x138   :  { %7160 = vst [vmem:[#allocation14_spill] sm:$0xff] %v5284_v10  ;;  %v5286_v33 = vadd.f32 %v783_v34, %v478_v35 }
 0x139   :  { %v480_v3 = vpop.f32.mrf.mxu0  ;;  %v785_v36 = vpop.f32.mrf.mxu1 }
 0x13a   :  { %7161 = vst [vmem:[#allocation15_spill] sm:$0xff] %v5286_v33  ;;  %v5288_v37 = vadd.f32 %v785_v36, %v480_v3 }
 0x13b   :  { %v484_v48 = vpop.f32.mrf.mxu0  ;;  %v789_v16 = vpop.f32.mrf.mxu1  ;;  %4053 = vmatmul.mubr.msk.bf16.gmra.mxu0 %vm230_vm1, %v4988_v38  ;;  %4087 = vmatmul.mubr.msk.bf16.gmra.mxu1 %vm230_vm1, %v4999_v39 }
 0x13c   :  { %7162 = vst [vmem:[#allocation16_spill] sm:$0xff] %v5288_v37  ;;  %v5294_v28 = vadd.f32 %v789_v16, %v484_v48  ;;  %1107 = vmatprep.mubr.bf16.mxu0 %v7142_v1  ;;  %1513 = vmatprep.mubr.bf16.mxu1 %v7142_v1 }
 0x13d   :  { %v486_v54 = vpop.f32.mrf.mxu0  ;;  %v791_v63 = vpop.f32.mrf.mxu1 }
 0x13e   :  { %v5298_v57 = vadd.f32 %v791_v63, %v486_v54 }
 0x13f   :  { %v488_v36 = vpop.f32.mrf.mxu0  ;;  %v793_v35 = vpop.f32.mrf.mxu1 }
 0x140   :  { %7163 = vst [vmem:[#allocation17_spill] sm:$0xff] %v5298_v57  ;;  %v5300_v34 = vadd.f32 %v793_v35, %v488_v36 }
 0x141   :  { %v490_v3 = vpop.f32.mrf.mxu0  ;;  %v795_v37 = vpop.f32.mrf.mxu1 }
 0x142   :  { %7164 = vst [vmem:[#allocation18_spill] sm:$0xff] %v5300_v34  ;;  %v5302_v38 = vadd.f32 %v795_v37, %v490_v3 }
 0x143   :  { %v494_v33 = vpop.f32.mrf.mxu0  ;;  %v799_v10 = vpop.f32.mrf.mxu1  ;;  %4054 = vmatmul.mubr.msk.bf16.gmra.mxu0 %vm230_vm1, %v4999_v39  ;;  %4088 = vmatmul.mubr.msk.bf16.gmra.mxu1 %vm230_vm1, %v5010_v40 }
 0x144   :  { %7165 = vst [vmem:[#allocation19_spill] sm:$0xff] %v5302_v38  ;;  %v5308_v16 = vadd.f32 %v799_v10, %v494_v33  ;;  %1117 = vmatprep.mubr.bf16.mxu0 %v7142_v1  ;;  %1523 = vmatprep.mubr.bf16.mxu1 %v7142_v1 }
 0x145   :  { %v496_v48 = vpop.f32.mrf.mxu0  ;;  %v801_v54 = vpop.f32.mrf.mxu1 }
 0x146   :  { %v5312_v63 = vadd.f32 %v801_v54, %v496_v48 }
 0x147   :  { %v498_v37 = vpop.f32.mrf.mxu0  ;;  %v803_v36 = vpop.f32.mrf.mxu1 }
 0x148   :  { %7166 = vst [vmem:[#allocation20_spill] sm:$0xff] %v5312_v63  ;;  %v5314_v35 = vadd.f32 %v803_v36, %v498_v37 }
 0x149   :  { %v500_v3 = vpop.f32.mrf.mxu0  ;;  %v805_v38 = vpop.f32.mrf.mxu1 }
 0x14a   :  { %7167 = vst [vmem:[#allocation21_spill] sm:$0xff] %v5314_v35  ;;  %v5316_v39 = vadd.f32 %v805_v38, %v500_v3 }
 0x14b   :  { %v504_v34 = vpop.f32.mrf.mxu0  ;;  %v809_v57 = vpop.f32.mrf.mxu1  ;;  %4055 = vmatmul.mubr.msk.bf16.gmra.mxu0 %vm230_vm1, %v5010_v40  ;;  %4089 = vmatmul.mubr.msk.bf16.gmra.mxu1 %vm230_vm1, %v5021_v41 }
 0x14c   :  { %7168 = vst [vmem:[#allocation22_spill] sm:$0xff] %v5316_v39  ;;  %v5322_v10 = vadd.f32 %v809_v57, %v504_v34  ;;  %1127 = vmatprep.mubr.bf16.mxu0 %v7142_v1  ;;  %1533 = vmatprep.mubr.bf16.mxu1 %v7142_v1 }
 0x14d   :  { %v506_v33 = vpop.f32.mrf.mxu0  ;;  %v811_v48 = vpop.f32.mrf.mxu1 }
 0x14e   :  { %v5326_v54 = vadd.f32 %v811_v48, %v506_v33 }
 0x14f   :  { %v508_v38 = vpop.f32.mrf.mxu0  ;;  %v813_v37 = vpop.f32.mrf.mxu1 }
 0x150   :  { %7169 = vst [vmem:[#allocation23_spill] sm:$0xff] %v5326_v54  ;;  %v5328_v36 = vadd.f32 %v813_v37, %v508_v38 }
 0x151   :  { %v510_v3 = vpop.f32.mrf.mxu0  ;;  %v815_v39 = vpop.f32.mrf.mxu1 }
 0x152   :  { %7170 = vst [vmem:[#allocation24_spill] sm:$0xff] %v5328_v36  ;;  %v5330_v40 = vadd.f32 %v815_v39, %v510_v3 }
 0x153   :  { %v514_v35 = vpop.f32.mrf.mxu0  ;;  %v819_v63 = vpop.f32.mrf.mxu1  ;;  %4056 = vmatmul.mubr.msk.bf16.gmra.mxu0 %vm230_vm1, %v5021_v41  ;;  %4090 = vmatmul.mubr.msk.bf16.gmra.mxu1 %vm230_vm1, %v5032_v42 }
 0x154   :  { %7171 = vst [vmem:[#allocation25_spill] sm:$0xff] %v5330_v40  ;;  %v5336_v57 = vadd.f32 %v819_v63, %v514_v35  ;;  %1137 = vmatprep.mubr.bf16.mxu0 %v7142_v1  ;;  %1543 = vmatprep.mubr.bf16.mxu1 %v7142_v1 }
 0x155   :  { %v516_v34 = vpop.f32.mrf.mxu0  ;;  %v821_v33 = vpop.f32.mrf.mxu1 }
 0x156   :  { %v5340_v48 = vadd.f32 %v821_v33, %v516_v34 }
 0x157   :  { %v518_v39 = vpop.f32.mrf.mxu0  ;;  %v823_v38 = vpop.f32.mrf.mxu1 }
 0x158   :  { %7172 = vst [vmem:[#allocation26_spill] sm:$0xff] %v5340_v48  ;;  %v5342_v37 = vadd.f32 %v823_v38, %v518_v39 }
 0x159   :  { %v520_v3 = vpop.f32.mrf.mxu0  ;;  %v825_v40 = vpop.f32.mrf.mxu1 }
 0x15a   :  { %7173 = vst [vmem:[#allocation27_spill] sm:$0xff] %v5342_v37  ;;  %v5344_v41 = vadd.f32 %v825_v40, %v520_v3 }
 0x15b   :  { %v524_v36 = vpop.f32.mrf.mxu0  ;;  %v829_v54 = vpop.f32.mrf.mxu1  ;;  %4057 = vmatmul.mubr.msk.bf16.gmra.mxu0 %vm230_vm1, %v5032_v42  ;;  %4091 = vmatmul.mubr.msk.bf16.gmra.mxu1 %vm230_vm1, %v5043_v43 }
 0x15c   :  { %7174 = vst [vmem:[#allocation28_spill] sm:$0xff] %v5344_v41  ;;  %v5350_v63 = vadd.f32 %v829_v54, %v524_v36  ;;  %1147 = vmatprep.mubr.bf16.mxu0 %v7142_v1  ;;  %1553 = vmatprep.mubr.bf16.mxu1 %v7142_v1 }
 0x15d   :  { %v526_v35 = vpop.f32.mrf.mxu0  ;;  %v831_v34 = vpop.f32.mrf.mxu1 }
 0x15e   :  { %v5354_v33 = vadd.f32 %v831_v34, %v526_v35 }
 0x15f   :  { %v528_v40 = vpop.f32.mrf.mxu0  ;;  %v833_v39 = vpop.f32.mrf.mxu1 }
 0x160   :  { %7175 = vst [vmem:[#allocation29_spill] sm:$0xff] %v5354_v33  ;;  %v5356_v38 = vadd.f32 %v833_v39, %v528_v40 }
 0x161   :  { %v530_v3 = vpop.f32.mrf.mxu0  ;;  %v835_v41 = vpop.f32.mrf.mxu1 }
 0x162   :  { %7176 = vst [vmem:[#allocation30_spill] sm:$0xff] %v5356_v38  ;;  %v5358_v42 = vadd.f32 %v835_v41, %v530_v3 }
 0x163   :  { %v534_v37 = vpop.f32.mrf.mxu0  ;;  %v839_v48 = vpop.f32.mrf.mxu1  ;;  %4058 = vmatmul.mubr.msk.bf16.gmra.mxu0 %vm230_vm1, %v5043_v43  ;;  %4092 = vmatmul.mubr.msk.bf16.gmra.mxu1 %vm230_vm1, %v5054_v44 }
 0x164   :  { %7177 = vst [vmem:[#allocation31_spill] sm:$0xff] %v5358_v42  ;;  %v5364_v54 = vadd.f32 %v839_v48, %v534_v37  ;;  %1157 = vmatprep.mubr.bf16.mxu0 %v7142_v1  ;;  %1563 = vmatprep.mubr.bf16.mxu1 %v7142_v1 }
 0x165   :  { %v536_v36 = vpop.f32.mrf.mxu0  ;;  %v841_v35 = vpop.f32.mrf.mxu1 }
 0x166   :  { %v5368_v34 = vadd.f32 %v841_v35, %v536_v36 }
 0x167   :  { %v538_v41 = vpop.f32.mrf.mxu0  ;;  %v843_v40 = vpop.f32.mrf.mxu1 }
 0x168   :  { %v5370_v39 = vadd.f32 %v843_v40, %v538_v41  ;;  %v4534_v40 = vld [vmem:[%s7136_s3 + $0xf0] ss:$8 sps:$4 sm:$0xff]  }
 0x169   :  { %v540_v3 = vpop.f32.mrf.mxu0  ;;  %v845_v42 = vpop.f32.mrf.mxu1 }
 0x16a   :  { %v5372_v43 = vadd.f32 %v845_v42, %v540_v3 }
 0x16b   :  { %v544_v38 = vpop.f32.mrf.mxu0  ;;  %v849_v33 = vpop.f32.mrf.mxu1  ;;  %4059 = vmatmul.mubr.msk.bf16.gmra.mxu0 %vm230_vm1, %v5054_v44  ;;  %4093 = vmatmul.mubr.msk.bf16.gmra.mxu1 %vm230_vm1, %v5065_v45 }
 0x16c   :  { %7178 = vst [vmem:[#allocation32_spill] sm:$0xff] %v5372_v43  ;;  %v5378_v48 = vadd.f32 %v849_v33, %v544_v38  ;;  %1167 = vmatprep.mubr.bf16.mxu0 %v7142_v1  ;;  %1573 = vmatprep.mubr.bf16.mxu1 %v7142_v1  ;;  %v4536_v33 = vld [vmem:[%s7136_s3 + $0xf4] ss:$8 sps:$4 sm:$0xff]  }
 0x16d   :  { %v546_v37 = vpop.f32.mrf.mxu0  ;;  %v851_v36 = vpop.f32.mrf.mxu1  ;;  %2382 = vmatprep.subr.bf16.mxu1 %v4536_v33  ;;  %v5407_v33 = vld [vmem:[%s7135_s0 + $0xc8] sm:$0xff]  }
 0x16e   :  { %7179 = vst [vmem:[#allocation33_spill] sm:$0xff] %v5378_v48  ;;  %v5382_v35 = vadd.f32 %v851_v36, %v546_v37  ;;  %7186 = vst [vmem:[#allocation39_spill] sm:$0xff] %v5407_v33  ;;  %2383 = vmatpush1.bf16.msra.mxu1 %v4534_v40 }
 0x16f   :  { %v548_v42 = vpop.f32.mrf.mxu0  ;;  %v853_v41 = vpop.f32.mrf.mxu1 }
 0x170   :  { %7180 = vst [vmem:[#allocation34_spill] sm:$0xff] %v5382_v35  ;;  %v5387_v44 = vadd.f32 %v853_v41, %v548_v42  ;;  %v7185_v42 = vmov 0  }
 0x171   :  { %v5392_v38 = vpop.f32.mrf.mxu0  ;;  %v5394_v3 = vpop.f32.mrf.mxu1 }
 0x172   :  { %7181 = vst [vmem:[#allocation35_spill] sm:$0xff] %v5387_v44  ;;  %7182 = vst [vmem:[#allocation36_spill] sm:$0xff] %v5392_v38 }
 0x173   :  { %7183 = vst [vmem:[#allocation37_spill] sm:$0xff] %v5394_v3  ;;  %v554_v1 = vpop.f32.mrf.mxu0  ;;  %v859_v37 = vpop.f32.mrf.mxu1  ;;  %4060 = vmatmul.mubr.msk.bf16.gmra.mxu0 %vm230_vm1, %v5065_v45  ;;  %4094 = vmatmul.mubr.msk.bf16.gmra.mxu1 %vm230_vm1, %v5076_v46 }
 0x174   :  { %v5400_v36 = vadd.f32 %v859_v37, %v554_v1  ;;  %1177 = vmatprep.mubr.bf16.mxu0 %v7185_v42  ;;  %1583 = vmatprep.mubr.bf16.mxu1 %v7185_v42 }
 0x175   :  { %v556_v41 = vpop.f32.mrf.mxu0  ;;  %v861_v44 = vpop.f32.mrf.mxu1 }
 0x176   :  { %7184 = vst [vmem:[#allocation38_spill] sm:$0xff] %v5400_v36  ;;  %v5409_v3 = vadd.f32 %v861_v44, %v556_v41 }
 0x177   :  { %v558_v45 = vpop.f32.mrf.mxu0  ;;  %v863_v38 = vpop.f32.mrf.mxu1 }
 0x178   :  { %7187 = vst [vmem:[#allocation40_spill] sm:$0xff] %v5409_v3  ;;  %v5411_v35 = vadd.f32 %v863_v38, %v558_v45  ;;  %v5428_v38 = vld [vmem:[%s7135_s0 + $0xd0] sm:$0xff]  }
 0x179   :  { %v5413_v1 = vpop.f32.mrf.mxu0  ;;  %v5415_v37 = vpop.f32.mrf.mxu1  ;;  %7192 = vst [vmem:[#allocation45_spill] sm:$0xff] %v5428_v38 }
 0x17a   :  { %7188 = vst [vmem:[#allocation41_spill] sm:$0xff] %v5411_v35  ;;  %7189 = vst [vmem:[#allocation42_spill] sm:$0xff] %v5413_v1 }
 0x17b   :  { %7190 = vst [vmem:[#allocation43_spill] sm:$0xff] %v5415_v37  ;;  %v564_v36 = vpop.f32.mrf.mxu0  ;;  %v869_v48 = vpop.f32.mrf.mxu1  ;;  %4061 = vmatmul.mubr.msk.bf16.gmra.mxu0 %vm230_vm1, %v5076_v46  ;;  %4095 = vmatmul.mubr.msk.bf16.gmra.mxu1 %vm230_vm1, %v5407_v33 }
 0x17c   :  { %v5421_v43 = vadd.f32 %v869_v48, %v564_v36  ;;  %1187 = vmatprep.mubr.bf16.mxu0 %v7185_v42  ;;  %1593 = vmatprep.mubr.bf16.mxu1 %v7185_v42 }
 0x17d   :  { %v566_v40 = vpop.f32.mrf.mxu0  ;;  %v871_v44 = vpop.f32.mrf.mxu1 }
 0x17e   :  { %7191 = vst [vmem:[#allocation44_spill] sm:$0xff] %v5421_v43  ;;  %v5430_v41 = vadd.f32 %v871_v44, %v566_v40 }
 0x17f   :  { %v568_v45 = vpop.f32.mrf.mxu0  ;;  %v873_v46 = vpop.f32.mrf.mxu1 }
 0x180   :  { %7193 = vst [vmem:[#allocation46_spill] sm:$0xff] %v5430_v41  ;;  %v5432_v37 = vadd.f32 %v873_v46, %v568_v45  ;;  %v4537_v46 = vld [vmem:[%s7136_s3 + $0xe0] ss:$8 sps:$4 sm:$0xff]  }
 0x181   :  { %v5434_v1 = vpop.f32.mrf.mxu0  ;;  %v5436_v48 = vpop.f32.mrf.mxu1 }
 0x182   :  { %7194 = vst [vmem:[#allocation47_spill] sm:$0xff] %v5432_v37  ;;  %7195 = vst [vmem:[#allocation48_spill] sm:$0xff] %v5434_v1 }
 0x183   :  { %7196 = vst [vmem:[#allocation49_spill] sm:$0xff] %v5436_v48  ;;  %v574_v36 = vpop.f32.mrf.mxu0  ;;  %v879_v43 = vpop.f32.mrf.mxu1  ;;  %4062 = vmatmul.mubr.msk.bf16.gmra.mxu0 %vm230_vm1, %v5407_v33  ;;  %4096 = vmatmul.mubr.msk.bf16.gmra.mxu1 %vm230_vm1, %v5428_v38  ;;  %v4539_v48 = vld [vmem:[%s7136_s3 + $0xe4] ss:$8 sps:$4 sm:$0xff]  }
 0x184   :  { %v5442_v35 = vadd.f32 %v879_v43, %v574_v36  ;;  %1769 = vmatprep.mubr.bf16.mxu0 %v7185_v42  ;;  %2414 = vmatprep.mubr.bf16.mxu1 %v7185_v42 }
 0x185   :  { %v576_v40 = vpop.f32.mrf.mxu0  ;;  %v881_v44 = vpop.f32.mrf.mxu1  ;;  %2384 = vmatprep.subr.bf16.mxu1 %v4539_v48 }
 0x186   :  { %7197 = vst [vmem:[#allocation50_spill] sm:$0xff] %v5442_v35  ;;  %v5446_v45 = vadd.f32 %v881_v44, %v576_v40  ;;  %2385 = vmatpush1.bf16.msra.mxu1 %v4537_v46  ;;  %v4695_v44 = vld [vmem:[%s7135_s0 + $0x20] sm:$0xff]  }
 0x187   :  { %v578_v1 = vpop.f32.mrf.mxu0  ;;  %v883_v37 = vpop.f32.mrf.mxu1 }
 0x188   :  { %7198 = vst [vmem:[#allocation51_spill] sm:$0xff] %v5446_v45  ;;  %v5454_v43 = vadd.f32 %v883_v37, %v578_v1 }
 0x189   :  { %v5456_v36 = vpop.f32.mrf.mxu0  ;;  %v5458_v35 = vpop.f32.mrf.mxu1 }
 0x18a   :  { %7199 = vst [vmem:[#allocation52_spill] sm:$0xff] %v5454_v43  ;;  %7200 = vst [vmem:[#allocation53_spill] sm:$0xff] %v5456_v36 }
 0x18b   :  { %7201 = vst [vmem:[#allocation54_spill] sm:$0xff] %v5458_v35  ;;  %v959_v40 = vpop.f32.mrf.mxu0  ;;  %4107 = vmatmul.mubr.msk.bf16.vlgmr.msra.gmra.mxu0 %vm230_vm1, %v4695_v44  ;;  %v1365_v45 = vpop.f32.mrf.mxu1 }
 0x18c   :  { %v1198_v41 = vadd.f32 %v959_v40, %v5095_v52  ;;  %1779 = vmatprep.mubr.bf16.mxu0 %v7185_v42 }
 0x18d   :  { %v961_v1 = vpop.f32.mrf.mxu0  ;;  %v1367_v37 = vpop.f32.mrf.mxu1 }
 0x18e   :  { %v1199_v48 = vadd.f32 %v961_v1, %v5102_v56  ;;  %v5467_v36 = vadd.f32 %v1365_v45, %v1198_v41  ;;  %v4696_v56 = vld [vmem:[%s7135_s0 + $0x28] sm:$0xff]  }
 0x18f   :  { %v963_v35 = vpop.f32.mrf.mxu0  ;;  %v1369_v46 = vpop.f32.mrf.mxu1 }
 0x190   :  { %v1200_v43 = vadd.f32 %v963_v35, %v5104_v59  ;;  %v5470_v38 = vadd.f32 %v1367_v37, %v1199_v48 }
 0x191   :  { %v965_v3 = vpop.f32.mrf.mxu0  ;;  %v5472_v33 = vpop.f32.mrf.mxu1 }
 0x192   :  { %v5475_v44 = vadd.f32 %v965_v3, %v5106_v62  ;;  %v5477_v52 = vadd.f32 %v1369_v46, %v1200_v43 }
 0x193   :  { %v969_v40 = vpop.f32.mrf.mxu0  ;;  %4108 = vmatmul.mubr.msk.bf16.gmra.mxu0 %vm230_vm1, %v4696_v56  ;;  %v1375_v41 = vpop.f32.mrf.mxu1 }
 0x194   :  { %7202 = vst [vmem:[#allocation55_spill] sm:$0xff] %v5477_v52  ;;  %v1202_v59 = vadd.f32 %v969_v40, %v5112_v2  ;;  %1789 = vmatprep.mubr.bf16.mxu0 %v7185_v42  ;;  %v4697_v40 = vld [vmem:[%s7135_s0 + $0x30] sm:$0xff]  }
 0x195   :  { %v971_v35 = vpop.f32.mrf.mxu0  ;;  %v1377_v45 = vpop.f32.mrf.mxu1 }
 0x196   :  { %v1203_v1 = vadd.f32 %v971_v35, %v5116_v5  ;;  %v5486_v62 = vadd.f32 %v1375_v41, %v1202_v59  ;;  %v4542_v59 = vld [vmem:[%s7136_s3 + $0xd4] ss:$8 sps:$4 sm:$0xff]  }
 0x197   :  { %v973_v3 = vpop.f32.mrf.mxu0  ;;  %v1379_v43 = vpop.f32.mrf.mxu1  ;;  %2386 = vmatprep.subr.bf16.mxu1 %v4542_v59  ;;  %v4699_v59 = vld [vmem:[%s7135_s0 + $0x40] sm:$0xff]  }
 0x198   :  { %v1204_v37 = vadd.f32 %v973_v3, %v5118_v8  ;;  %v5489_v48 = vadd.f32 %v1377_v45, %v1203_v1  ;;  %v4698_v3 = vld [vmem:[%s7135_s0 + $0x38] sm:$0xff]  }
 0x199   :  { %v975_v46 = vpop.f32.mrf.mxu0 }
 0x19a   :  { %v5492_v56 = vadd.f32 %v975_v46, %v5120_v11  ;;  %v5494_v52 = vadd.f32 %v1379_v43, %v1204_v37  ;;  %v4540_v11 = vld [vmem:[%s7136_s3 + $0xd0] ss:$8 sps:$4 sm:$0xff]  }
 0x19b   :  { %v979_v2 = vpop.f32.mrf.mxu0  ;;  %4109 = vmatmul.mubr.msk.bf16.gmra.mxu0 %vm230_vm1, %v4697_v40  ;;  %2387 = vmatpush1.bf16.msra.mxu1 %v4540_v11 }
 0x19c   :  { %v5501_v5 = vadd.f32 %v979_v2, %v5126_v14  ;;  %1799 = vmatprep.mubr.bf16.mxu0 %v7185_v42 }
 0x19d   :  { %v981_v8 = vpop.f32.mrf.mxu0 }
 0x19e   :  { %v5505_v41 = vadd.f32 %v981_v8, %v5130_v17 }
 0x19f   :  { %v983_v35 = vpop.f32.mrf.mxu0 }
 0x1a0   :  { %v5514_v45 = vadd.f32 %v983_v35, %v5132_v25  ;;  %v5527_v25 = vpop.f32.mrf.mxu1 }
 0x1a1   :  { %v985_v14 = vpop.f32.mrf.mxu0 }
 0x1a2   :  { %v5517_v1 = vadd.f32 %v985_v14, %v5134_v20  ;;  %v5535_v40 = vpop.f32.mrf.mxu1 }
 0x1a3   :  { %v989_v17 = vpop.f32.mrf.mxu0  ;;  %4110 = vmatmul.mubr.msk.bf16.gmra.mxu0 %vm230_vm1, %v4698_v3 }
 0x1a4   :  { %v5524_v43 = vadd.f32 %v989_v17, %v5140_v31  ;;  %1809 = vmatprep.mubr.bf16.mxu0 %v7185_v42 }
 0x1a5   :  { %v991_v37 = vpop.f32.mrf.mxu0 }
 0x1a6   :  { %v5530_v46 = vadd.f32 %v991_v37, %v5144_v49 }
 0x1a7   :  { %v993_v20 = vpop.f32.mrf.mxu0 }
 0x1a8   :  { %v5533_v2 = vadd.f32 %v993_v20, %v5146_v53  ;;  %v5548_v53 = vpop.f32.mrf.mxu1 }
 0x1a9   :  { %v995_v8 = vpop.f32.mrf.mxu0 }
 0x1aa   :  { %v5538_v11 = vadd.f32 %v995_v8, %v5148_v21  ;;  %v5556_v3 = vpop.f32.mrf.mxu1  ;;  %v4700_v8 = vld [vmem:[%s7135_s0 + $0x48] sm:$0xff]  }
 0x1ab   :  { %v999_v31 = vpop.f32.mrf.mxu0  ;;  %4111 = vmatmul.mubr.msk.bf16.gmra.mxu0 %vm230_vm1, %v4699_v59 }
 0x1ac   :  { %v5545_v49 = vadd.f32 %v999_v31, %v5154_v60  ;;  %1819 = vmatprep.mubr.bf16.mxu0 %v7185_v42 }
 0x1ad   :  { %v1001_v35 = vpop.f32.mrf.mxu0 }
 0x1ae   :  { %v5551_v14 = vadd.f32 %v1001_v35, %v5158_v0  ;;  %v4545_v35 = vld [vmem:[%s7136_s3 + $0xc4] ss:$8 sps:$4 sm:$0xff]  }
 0x1af   :  { %v1003_v21 = vpop.f32.mrf.mxu0  ;;  %2388 = vmatprep.subr.bf16.mxu1 %v4545_v35 }
 0x1b0   :  { %v5554_v17 = vadd.f32 %v1003_v21, %v5160_v6  ;;  %v5569_v6 = vpop.f32.mrf.mxu1 }
 0x1b1   :  { %v1005_v37 = vpop.f32.mrf.mxu0 }
 0x1b2   :  { %v5559_v20 = vadd.f32 %v1005_v37, %v5162_v22  ;;  %v4543_v22 = vld [vmem:[%s7136_s3 + $0xc0] ss:$8 sps:$4 sm:$0xff]   ;;  %v5583_v37 = vpop.f32.mrf.mxu1 }
 0x1b3   :  { %v1009_v60 = vpop.f32.mrf.mxu0  ;;  %4112 = vmatmul.mubr.msk.bf16.gmra.mxu0 %vm230_vm1, %v4700_v8  ;;  %2389 = vmatpush1.bf16.msra.mxu1 %v4543_v22 }
 0x1b4   :  { %v5566_v0 = vadd.f32 %v1009_v60, %v5168_v13  ;;  %1829 = vmatprep.mubr.bf16.mxu0 %v7185_v42 }
 0x1b5   :  { %v1011_v31 = vpop.f32.mrf.mxu0 }
 0x1b6   :  { %v5572_v59 = vadd.f32 %v1011_v31, %v5172_v18  ;;  %v4701_v31 = vld [vmem:[%s7135_s0 + $0x50] sm:$0xff]  }
 0x1b7   :  { %v1013_v21 = vpop.f32.mrf.mxu0 }
 0x1b8   :  { %7203 = vst [vmem:[#allocation56_spill] sm:$0xff] %v5572_v59  ;;  %v5581_v13 = vadd.f32 %v1013_v21, %v5174_v27  ;;  %v5596_v27 = vpop.f32.mrf.mxu1 }
 0x1b9   :  { %v1015_v60 = vpop.f32.mrf.mxu0 }
 0x1ba   :  { %v5586_v18 = vadd.f32 %v1015_v60, %v5176_v23  ;;  %v5604_v60 = vpop.f32.mrf.mxu1 }
 0x1bb   :  { %v1019_v8 = vpop.f32.mrf.mxu0  ;;  %4113 = vmatmul.mubr.msk.bf16.gmra.mxu0 %vm230_vm1, %v4701_v31 }
 0x1bc   :  { %7204 = vst [vmem:[#allocation57_spill] sm:$0xff] %v5586_v18  ;;  %v5593_v59 = vadd.f32 %v1019_v8, %v5182_v50  ;;  %1839 = vmatprep.mubr.bf16.mxu0 %v7185_v42  ;;  %v4702_v8 = vld [vmem:[%s7135_s0 + $0x58] sm:$0xff]  }
 0x1bd   :  { %v1021_v35 = vpop.f32.mrf.mxu0 }
 0x1be   :  { %v5599_v22 = vadd.f32 %v1021_v35, %v5186_v55 }
 0x1bf   :  { %v1023_v23 = vpop.f32.mrf.mxu0 }
 0x1c0   :  { %7205 = vst [vmem:[#allocation58_spill] sm:$0xff] %v5599_v22  ;;  %v5602_v21 = vadd.f32 %v1023_v23, %v5188_v61  ;;  %v5617_v61 = vpop.f32.mrf.mxu1  ;;  %v7243_v22 = vld [vmem:[#allocation13_spill] sm:$0xff] }
 0x1c1   :  { %v1025_v18 = vpop.f32.mrf.mxu0 }
 0x1c2   :  { %7206 = vst [vmem:[#allocation59_spill] sm:$0xff] %v5602_v21  ;;  %v5607_v31 = vadd.f32 %v1025_v18, %v5190_v24 }
 0x1c3   :  { %v1029_v50 = vpop.f32.mrf.mxu0  ;;  %4114 = vmatmul.mubr.msk.bf16.gmra.mxu0 %vm230_vm1, %v4702_v8 }
 0x1c4   :  { %7207 = vst [vmem:[#allocation60_spill] sm:$0xff] %v5607_v31  ;;  %v5614_v55 = vadd.f32 %v1029_v50, %v5196_v9  ;;  %1849 = vmatprep.mubr.bf16.mxu0 %v7185_v42  ;;  %v5625_v31 = vpop.f32.mrf.mxu1  ;;  %v4703_v50 = vld [vmem:[%s7135_s0 + $0x60] sm:$0xff]  }
 0x1c5   :  { %v1031_v35 = vpop.f32.mrf.mxu0 }
 0x1c6   :  { %7208 = vst [vmem:[#allocation61_spill] sm:$0xff] %v5614_v55  ;;  %v5620_v23 = vadd.f32 %v1031_v35, %v5200_v15  ;;  %v7221_v55 = vld [vmem:[#allocation4_spill] sm:$0xff] }
 0x1c7   :  { %v1033_v24 = vpop.f32.mrf.mxu0 }
 0x1c8   :  { %7209 = vst [vmem:[#allocation62_spill] sm:$0xff] %v5620_v23  ;;  %v5623_v18 = vadd.f32 %v1033_v24, %v5202_v26  ;;  %v5638_v26 = vpop.f32.mrf.mxu1 }
 0x1c9   :  { %v1035_v21 = vpop.f32.mrf.mxu0 }
 0x1ca   :  { %7210 = vst [vmem:[#allocation63_spill] sm:$0xff] %v5623_v18  ;;  %v5628_v8 = vadd.f32 %v1035_v21, %v5204_v30 }
 0x1cb   :  { %v1039_v9 = vpop.f32.mrf.mxu0  ;;  %4115 = vmatmul.mubr.msk.bf16.gmra.mxu0 %vm230_vm1, %v4703_v50 }
 0x1cc   :  { %7211 = vst [vmem:[#allocation64_spill] sm:$0xff] %v5628_v8  ;;  %v5635_v15 = vadd.f32 %v1039_v9, %v5210_v51  ;;  %1859 = vmatprep.mubr.bf16.mxu0 %v7185_v42  ;;  %v5646_v8 = vpop.f32.mrf.mxu1  ;;  %v4547_v51 = vld [vmem:[%s7136_s3 + $0xb0] ss:$8 sps:$4 sm:$0xff]   ;;  %v4549_v9 = vld [vmem:[%s7136_s3 + $0xb4] ss:$8 sps:$4 sm:$0xff]  }
 0x1cd   :  { %v1041_v35 = vpop.f32.mrf.mxu0  ;;  %2390 = vmatprep.subr.bf16.mxu1 %v4549_v9  ;;  %v4705_v9 = vld [vmem:[%s7135_s0 + $0x70] sm:$0xff]  }
 0x1ce   :  { %7212 = vst [vmem:[#allocation65_spill] sm:$0xff] %v5635_v15  ;;  %v5641_v24 = vadd.f32 %v1041_v35, %v5214_v58  ;;  %2391 = vmatpush1.bf16.msra.mxu1 %v4547_v51 }
 0x1cf   :  { %v1043_v30 = vpop.f32.mrf.mxu0 }
 0x1d0   :  { %7213 = vst [vmem:[#allocation66_spill] sm:$0xff] %v5641_v24  ;;  %v5644_v21 = vadd.f32 %v1043_v30, %v5216_v4  ;;  %v4704_v4 = vld [vmem:[%s7135_s0 + $0x68] sm:$0xff]   ;;  %v7217_v30 = vld [vmem:[#allocation2_spill] sm:$0xff] }
 0x1d1   :  { %v1045_v18 = vpop.f32.mrf.mxu0  ;;  %v7219_v24 = vld [vmem:[#allocation3_spill] sm:$0xff] }
 0x1d2   :  { %7214 = vst [vmem:[#allocation67_spill] sm:$0xff] %v5644_v21  ;;  %v5649_v50 = vadd.f32 %v1045_v18, %v5218_v32  ;;  %v5665_v32 = vpop.f32.mrf.mxu1 }
 0x1d3   :  { %v1049_v58 = vpop.f32.mrf.mxu0  ;;  %4116 = vmatmul.mubr.msk.bf16.gmra.mxu0 %vm230_vm1, %v4704_v4 }
 0x1d4   :  { %7215 = vst [vmem:[#allocation68_spill] sm:$0xff] %v5649_v50  ;;  %v5662_v35 = vadd.f32 %v1049_v58, %v5224_v19  ;;  %1869 = vmatprep.mubr.bf16.mxu0 %v7185_v42  ;;  %v5673_v23 = vpop.f32.mrf.mxu1 }
 0x1d5   :  { %v1051_v18 = vpop.f32.mrf.mxu0 }
 0x1d6   :  { %7216 = vst [vmem:[#allocation69_spill] sm:$0xff] %v5662_v35  ;;  %v5668_v50 = vadd.f32 %v1051_v18, %v7217_v30  ;;  %v7224_v18 = vld [vmem:[#allocation5_spill] sm:$0xff]  ;;  %v7228_v35 = vld [vmem:[#allocation7_spill] sm:$0xff] }
 0x1d7   :  { %v1053_v21 = vpop.f32.mrf.mxu0 }
 0x1d8   :  { %7218 = vst [vmem:[#allocation2_spill] sm:$0xff] %v5668_v50  ;;  %v5671_v15 = vadd.f32 %v1053_v21, %v7219_v24  ;;  %v5686_v24 = vpop.f32.mrf.mxu1 }
 0x1d9   :  { %v1055_v4 = vpop.f32.mrf.mxu0 }
 0x1da   :  { %7220 = vst [vmem:[#allocation3_spill] sm:$0xff] %v5671_v15  ;;  %v5676_v19 = vadd.f32 %v1055_v4, %v7221_v55  ;;  %v7226_v4 = vld [vmem:[#allocation6_spill] sm:$0xff]  ;;  %v5694_v15 = vpop.f32.mrf.mxu1 }
 0x1db   :  { %v1059_v58 = vpop.f32.mrf.mxu0  ;;  %4117 = vmatmul.mubr.msk.bf16.gmra.mxu0 %vm230_vm1, %v4705_v9 }
 0x1dc   :  { %7222 = vst [vmem:[#allocation4_spill] sm:$0xff] %v5676_v19  ;;  %v5683_v51 = vadd.f32 %v1059_v58, %v5238_v12  ;;  %1879 = vmatprep.mubr.bf16.mxu0 %v7185_v42  ;;  %v4706_v58 = vld [vmem:[%s7135_s0 + $0x78] sm:$0xff]  }
 0x1dd   :  { %v1061_v21 = vpop.f32.mrf.mxu0 }
 0x1de   :  { %7223 = vst [vmem:[#allocation70_spill] sm:$0xff] %v5683_v51  ;;  %v5689_v30 = vadd.f32 %v1061_v21, %v7224_v18  ;;  %v5707_v18 = vpop.f32.mrf.mxu1 }
 0x1df   :  { %v1063_v55 = vpop.f32.mrf.mxu0 }
 0x1e0   :  { %7225 = vst [vmem:[#allocation5_spill] sm:$0xff] %v5689_v30  ;;  %v5692_v19 = vadd.f32 %v1063_v55, %v7226_v4  ;;  %v7231_v4 = vld [vmem:[#allocation8_spill] sm:$0xff]  ;;  %v4552_v30 = vld [vmem:[%s7136_s3 + $0xa4] ss:$8 sps:$4 sm:$0xff]  }
 0x1e1   :  { %v1065_v50 = vpop.f32.mrf.mxu0  ;;  %2392 = vmatprep.subr.bf16.mxu1 %v4552_v30 }
 0x1e2   :  { %7227 = vst [vmem:[#allocation6_spill] sm:$0xff] %v5692_v19  ;;  %v5697_v9 = vadd.f32 %v1065_v50, %v7228_v35  ;;  %v7233_v35 = vld [vmem:[#allocation9_spill] sm:$0xff] }
 0x1e3   :  { %v1069_v12 = vpop.f32.mrf.mxu0  ;;  %4118 = vmatmul.mubr.msk.bf16.gmra.mxu0 %vm230_vm1, %v4706_v58  ;;  %v5718_v58 = vpop.f32.mrf.mxu1 }
 0x1e4   :  { %7229 = vst [vmem:[#allocation7_spill] sm:$0xff] %v5697_v9  ;;  %v5704_v21 = vadd.f32 %v1069_v12, %v5252_v7  ;;  %1889 = vmatprep.mubr.bf16.mxu0 %v7185_v42  ;;  %v4550_v12 = vld [vmem:[%s7136_s3 + $0xa0] ss:$8 sps:$4 sm:$0xff]  }
 0x1e5   :  { %v1071_v55 = vpop.f32.mrf.mxu0  ;;  %2393 = vmatpush1.bf16.msra.mxu1 %v4550_v12 }
 0x1e6   :  { %7230 = vst [vmem:[#allocation71_spill] sm:$0xff] %v5704_v21  ;;  %v5710_v19 = vadd.f32 %v1071_v55, %v7231_v4  ;;  %v7235_v21 = vld [vmem:[#allocation10_spill] sm:$0xff] }
 0x1e7   :  { %v1073_v50 = vpop.f32.mrf.mxu0  ;;  %v4707_v4 = vld [vmem:[%s7135_s0 + $0x80] sm:$0xff]  }
 0x1e8   :  { %7232 = vst [vmem:[#allocation8_spill] sm:$0xff] %v5710_v19  ;;  %v5713_v9 = vadd.f32 %v1073_v50, %v7233_v35  ;;  %v4555_v35 = vld [vmem:[%s7136_s3 + $0x94] ss:$8 sps:$4 sm:$0xff]  }
 0x1e9   :  { %v1075_v7 = vpop.f32.mrf.mxu0  ;;  %2394 = vmatprep.subr.bf16.mxu1 %v4555_v35 }
 0x1ea   :  { %7234 = vst [vmem:[#allocation9_spill] sm:$0xff] %v5713_v9  ;;  %v5724_v51 = vadd.f32 %v1075_v7, %v7235_v21  ;;  %v5737_v21 = vpop.f32.mrf.mxu1  ;;  %v4553_v7 = vld [vmem:[%s7136_s3 + $0x90] ss:$8 sps:$4 sm:$0xff]  }
 0x1eb   :  { %v1079_v55 = vpop.f32.mrf.mxu0  ;;  %4119 = vmatmul.mubr.msk.bf16.gmra.mxu0 %vm230_vm1, %v4707_v4  ;;  %7238 = vst [vmem:[#allocation73_spill] sm:$0xff] %v5737_v21  ;;  %2395 = vmatpush1.bf16.msra.mxu1 %v4553_v7  ;;  %v4558_v4 = vld [vmem:[%s7136_s3 + $0x84] ss:$8 sps:$4 sm:$0xff]   ;;  %v4556_v21 = vld [vmem:[%s7136_s3 + $0x80] ss:$8 sps:$4 sm:$0xff]  }
 0x1ec   :  { %7236 = vst [vmem:[#allocation10_spill] sm:$0xff] %v5724_v51  ;;  %v5731_v50 = vadd.f32 %v1079_v55, %v5266_v47  ;;  %1899 = vmatprep.mubr.bf16.mxu0 %v7185_v42  ;;  %v7239_v51 = vld [vmem:[#allocation11_spill] sm:$0xff]  ;;  %v7241_v47 = vld [vmem:[#allocation12_spill] sm:$0xff]  ;;  %2396 = vmatprep.subr.bf16.mxu1 %v4558_v4  ;;  %v7247_v4 = vld [vmem:[#allocation14_spill] sm:$0xff] }
 0x1ed   :  { %v1081_v30 = vpop.f32.mrf.mxu0 }
 0x1ee   :  { %7237 = vst [vmem:[#allocation72_spill] sm:$0xff] %v5731_v50  ;;  %v5743_v9 = vadd.f32 %v1081_v30, %v7239_v51  ;;  %v5751_v50 = vpop.f32.mrf.mxu1  ;;  %v4708_v30 = vld [vmem:[%s7135_s0 + $0x88] sm:$0xff]  }
 0x1ef   :  { %v1083_v12 = vpop.f32.mrf.mxu0  ;;  %2397 = vmatpush1.bf16.msra.mxu1 %v4556_v21 }
 0x1f0   :  { %7240 = vst [vmem:[#allocation11_spill] sm:$0xff] %v5743_v9  ;;  %v5746_v55 = vadd.f32 %v1083_v12, %v7241_v47  ;;  %v4561_v12 = vld [vmem:[%s7136_s3 + $0x1f4] ss:$8 sps:$4 sm:$0xff]   ;;  %v4559_v47 = vld [vmem:[%s7136_s3 + $0x1f0] ss:$8 sps:$4 sm:$0xff]  }
 0x1f1   :  { %v1085_v19 = vpop.f32.mrf.mxu0  ;;  %3027 = vmatprep.subr.bf16.mxu0 %v4561_v12  ;;  %v4562_v9 = vld [vmem:[%s7136_s3 + $0x1e0] ss:$8 sps:$4 sm:$0xff]  }
 0x1f2   :  { %7242 = vst [vmem:[#allocation12_spill] sm:$0xff] %v5746_v55  ;;  %v5757_v51 = vadd.f32 %v1085_v19, %v7243_v22  ;;  %v5770_v22 = vpop.f32.mrf.mxu1  ;;  %3028 = vmatpush1.bf16.msra.mxu0 %v4559_v47  ;;  %v4709_v47 = vld [vmem:[%s7135_s0 + $0x90] sm:$0xff]  }
 0x1f3   :  { %v1089_v35 = vpop.f32.mrf.mxu0  ;;  %4120 = vmatmul.mubr.msk.bf16.gmra.mxu0 %vm230_vm1, %v4708_v30  ;;  %7246 = vst [vmem:[#allocation75_spill] sm:$0xff] %v5770_v22  ;;  %v4564_v30 = vld [vmem:[%s7136_s3 + $0x1e4] ss:$8 sps:$4 sm:$0xff]   ;;  %v7251_v22 = vld [vmem:[#allocation16_spill] sm:$0xff] }
 0x1f4   :  { %7244 = vst [vmem:[#allocation13_spill] sm:$0xff] %v5757_v51  ;;  %v5764_v7 = vadd.f32 %v1089_v35, %v5280_v29  ;;  %1909 = vmatprep.mubr.bf16.mxu0 %v7185_v42  ;;  %v7249_v29 = vld [vmem:[#allocation15_spill] sm:$0xff]  ;;  %3029 = vmatprep.subr.bf16.mxu0 %v4564_v30  ;;  %v7255_v30 = vld [vmem:[#allocation17_spill] sm:$0xff] }
 0x1f5   :  { %v1091_v19 = vpop.f32.mrf.mxu0 }
 0x1f6   :  { %7245 = vst [vmem:[#allocation74_spill] sm:$0xff] %v5764_v7  ;;  %v5776_v51 = vadd.f32 %v1091_v19, %v7247_v4  ;;  %v5784_v7 = vpop.f32.mrf.mxu1  ;;  %3030 = vmatpush1.bf16.msra.mxu0 %v4562_v9  ;;  %v4570_v9 = vld [vmem:[%s7136_s3 + $0x1c4] ss:$8 sps:$4 sm:$0xff]  }
 0x1f7   :  { %v1093_v21 = vpop.f32.mrf.mxu0 }
 0x1f8   :  { %7248 = vst [vmem:[#allocation14_spill] sm:$0xff] %v5776_v51  ;;  %v5779_v35 = vadd.f32 %v1093_v21, %v7249_v29  ;;  %v4567_v21 = vld [vmem:[%s7136_s3 + $0x1d4] ss:$8 sps:$4 sm:$0xff]   ;;  %v4565_v29 = vld [vmem:[%s7136_s3 + $0x1d0] ss:$8 sps:$4 sm:$0xff]  }
 0x1f9   :  { %v1095_v55 = vpop.f32.mrf.mxu0  ;;  %3031 = vmatprep.subr.bf16.mxu0 %v4567_v21  ;;  %v4568_v51 = vld [vmem:[%s7136_s3 + $0x1c0] ss:$8 sps:$4 sm:$0xff]  }
 0x1fa   :  { %7250 = vst [vmem:[#allocation15_spill] sm:$0xff] %v5779_v35  ;;  %v5790_v19 = vadd.f32 %v1095_v55, %v7251_v22  ;;  %v5803_v55 = vpop.f32.mrf.mxu1  ;;  %3032 = vmatpush1.bf16.msra.mxu0 %v4565_v29  ;;  %v4710_v29 = vld [vmem:[%s7135_s0 + $0x98] sm:$0xff]  }
 0x1fb   :  { %v1099_v12 = vpop.f32.mrf.mxu0  ;;  %4121 = vmatmul.mubr.msk.bf16.gmra.mxu0 %vm230_vm1, %v4709_v47  ;;  %7254 = vst [vmem:[#allocation77_spill] sm:$0xff] %v5803_v55  ;;  %v7259_v55 = vld [vmem:[#allocation19_spill] sm:$0xff]  ;;  %3033 = vmatprep.subr.bf16.mxu0 %v4570_v9  ;;  %v7263_v9 = vld [vmem:[#allocation20_spill] sm:$0xff] }
 0x1fc   :  { %7252 = vst [vmem:[#allocation16_spill] sm:$0xff] %v5790_v19  ;;  %v5797_v4 = vadd.f32 %v1099_v12, %v5294_v28  ;;  %1919 = vmatprep.mubr.bf16.mxu0 %v7185_v42  ;;  %v7257_v12 = vld [vmem:[#allocation18_spill] sm:$0xff] }
 0x1fd   :  { %v1101_v22 = vpop.f32.mrf.mxu0 }
 0x1fe   :  { %7253 = vst [vmem:[#allocation76_spill] sm:$0xff] %v5797_v4  ;;  %v5809_v19 = vadd.f32 %v1101_v22, %v7255_v30  ;;  %v5817_v4 = vpop.f32.mrf.mxu1  ;;  %3034 = vmatpush1.bf16.msra.mxu0 %v4568_v51  ;;  %v4576_v51 = vld [vmem:[%s7136_s3 + $0x1a4] ss:$8 sps:$4 sm:$0xff]  }
 0x1ff   :  { %v1103_v28 = vpop.f32.mrf.mxu0 }
 0x200   :  { %7256 = vst [vmem:[#allocation17_spill] sm:$0xff] %v5809_v19  ;;  %v5812_v47 = vadd.f32 %v1103_v28, %v7257_v12  ;;  %v4573_v28 = vld [vmem:[%s7136_s3 + $0x1b4] ss:$8 sps:$4 sm:$0xff]   ;;  %v4571_v12 = vld [vmem:[%s7136_s3 + $0x1b0] ss:$8 sps:$4 sm:$0xff]  }
 0x201   :  { %v1105_v35 = vpop.f32.mrf.mxu0  ;;  %3035 = vmatprep.subr.bf16.mxu0 %v4573_v28  ;;  %v4574_v19 = vld [vmem:[%s7136_s3 + $0x1a0] ss:$8 sps:$4 sm:$0xff]  }
 0x202   :  { %7258 = vst [vmem:[#allocation18_spill] sm:$0xff] %v5812_v47  ;;  %v5823_v22 = vadd.f32 %v1105_v35, %v7259_v55  ;;  %v5836_v35 = vpop.f32.mrf.mxu1  ;;  %3036 = vmatpush1.bf16.msra.mxu0 %v4571_v12  ;;  %v4711_v12 = vld [vmem:[%s7135_s0 + $0xa0] sm:$0xff]  }
 0x203   :  { %v1109_v21 = vpop.f32.mrf.mxu0  ;;  %4122 = vmatmul.mubr.msk.bf16.gmra.mxu0 %vm230_vm1, %v4710_v29  ;;  %7262 = vst [vmem:[#allocation79_spill] sm:$0xff] %v5836_v35  ;;  %v7268_v35 = vld [vmem:[#allocation22_spill] sm:$0xff]  ;;  %3037 = vmatprep.subr.bf16.mxu0 %v4576_v51  ;;  %v7272_v51 = vld [vmem:[#allocation23_spill] sm:$0xff] }
 0x204   :  { %7260 = vst [vmem:[#allocation19_spill] sm:$0xff] %v5823_v22  ;;  %v5830_v30 = vadd.f32 %v1109_v21, %v5308_v16  ;;  %1929 = vmatprep.mubr.bf16.mxu0 %v7185_v42  ;;  %v7265_v21 = vld [vmem:[#allocation21_spill] sm:$0xff] }
 0x205   :  { %v1111_v55 = vpop.f32.mrf.mxu0 }
 0x206   :  { %7261 = vst [vmem:[#allocation78_spill] sm:$0xff] %v5830_v30  ;;  %v5842_v22 = vadd.f32 %v1111_v55, %v7263_v9  ;;  %v5850_v30 = vpop.f32.mrf.mxu1  ;;  %3038 = vmatpush1.bf16.msra.mxu0 %v4574_v19  ;;  %v4582_v19 = vld [vmem:[%s7136_s3 + $0x184] ss:$8 sps:$4 sm:$0xff]  }
 0x207   :  { %v1113_v16 = vpop.f32.mrf.mxu0  ;;  %7267 = vst [vmem:[#allocation80_spill] sm:$0xff] %v5850_v30 }
 0x208   :  { %7264 = vst [vmem:[#allocation20_spill] sm:$0xff] %v5842_v22  ;;  %v5845_v29 = vadd.f32 %v1113_v16, %v7265_v21  ;;  %v4579_v16 = vld [vmem:[%s7136_s3 + $0x194] ss:$8 sps:$4 sm:$0xff]   ;;  %v4577_v21 = vld [vmem:[%s7136_s3 + $0x190] ss:$8 sps:$4 sm:$0xff]  }
 0x209   :  { %v1115_v47 = vpop.f32.mrf.mxu0  ;;  %3039 = vmatprep.subr.bf16.mxu0 %v4579_v16  ;;  %v4580_v22 = vld [vmem:[%s7136_s3 + $0x180] ss:$8 sps:$4 sm:$0xff]  }
 0x20a   :  { %7266 = vst [vmem:[#allocation21_spill] sm:$0xff] %v5845_v29  ;;  %v5856_v55 = vadd.f32 %v1115_v47, %v7268_v35  ;;  %v5869_v47 = vpop.f32.mrf.mxu1  ;;  %3040 = vmatpush1.bf16.msra.mxu0 %v4577_v21  ;;  %v4712_v21 = vld [vmem:[%s7135_s0 + $0xa8] sm:$0xff]  }
 0x20b   :  { %v1119_v28 = vpop.f32.mrf.mxu0  ;;  %4123 = vmatmul.mubr.msk.bf16.gmra.mxu0 %vm230_vm1, %v4711_v12  ;;  %7271 = vst [vmem:[#allocation82_spill] sm:$0xff] %v5869_v47  ;;  %v7277_v47 = vld [vmem:[#allocation25_spill] sm:$0xff]  ;;  %3041 = vmatprep.subr.bf16.mxu0 %v4582_v19  ;;  %v7282_v19 = vld [vmem:[#allocation27_spill] sm:$0xff] }
 0x20c   :  { %7269 = vst [vmem:[#allocation22_spill] sm:$0xff] %v5856_v55  ;;  %v5863_v9 = vadd.f32 %v1119_v28, %v5322_v10  ;;  %1939 = vmatprep.mubr.bf16.mxu0 %v7185_v42  ;;  %v7274_v28 = vld [vmem:[#allocation24_spill] sm:$0xff] }
 0x20d   :  { %v1121_v35 = vpop.f32.mrf.mxu0 }
 0x20e   :  { %7270 = vst [vmem:[#allocation81_spill] sm:$0xff] %v5863_v9  ;;  %v5875_v55 = vadd.f32 %v1121_v35, %v7272_v51  ;;  %v5883_v9 = vpop.f32.mrf.mxu1  ;;  %3042 = vmatpush1.bf16.msra.mxu0 %v4580_v22  ;;  %v4713_v22 = vld [vmem:[%s7135_s0 + $0xb0] sm:$0xff]  }
 0x20f   :  { %v1123_v10 = vpop.f32.mrf.mxu0  ;;  %7276 = vst [vmem:[#allocation83_spill] sm:$0xff] %v5883_v9 }
 0x210   :  { %7273 = vst [vmem:[#allocation23_spill] sm:$0xff] %v5875_v55  ;;  %v5878_v12 = vadd.f32 %v1123_v10, %v7274_v28  ;;  %v5899_v10 = vpop.f32.mrf.mxu1 }
 0x211   :  { %v1125_v29 = vpop.f32.mrf.mxu0 }
 0x212   :  { %7275 = vst [vmem:[#allocation24_spill] sm:$0xff] %v5878_v12  ;;  %v5889_v35 = vadd.f32 %v1125_v29, %v7277_v47  ;;  %v7280_v12 = vld [vmem:[#allocation26_spill] sm:$0xff]  ;;  %v5907_v55 = vpop.f32.mrf.mxu1 }
 0x213   :  { %v1129_v16 = vpop.f32.mrf.mxu0  ;;  %4124 = vmatmul.mubr.msk.bf16.gmra.mxu0 %vm230_vm1, %v4712_v21  ;;  %v7284_v21 = vld [vmem:[#allocation28_spill] sm:$0xff] }
 0x214   :  { %7278 = vst [vmem:[#allocation25_spill] sm:$0xff] %v5889_v35  ;;  %v5896_v51 = vadd.f32 %v1129_v16, %v5336_v57  ;;  %1949 = vmatprep.mubr.bf16.mxu0 %v7185_v42  ;;  %v5920_v16 = vpop.f32.mrf.mxu1 }
 0x215   :  { %v1131_v28 = vpop.f32.mrf.mxu0 }
 0x216   :  { %7279 = vst [vmem:[#allocation84_spill] sm:$0xff] %v5896_v51  ;;  %v5902_v29 = vadd.f32 %v1131_v28, %v7280_v12  ;;  %v7291_v51 = vld [vmem:[#allocation31_spill] sm:$0xff] }
 0x217   :  { %v1133_v47 = vpop.f32.mrf.mxu0 }
 0x218   :  { %7281 = vst [vmem:[#allocation26_spill] sm:$0xff] %v5902_v29  ;;  %v5905_v35 = vadd.f32 %v1133_v47, %v7282_v19  ;;  %v7287_v47 = vld [vmem:[#allocation29_spill] sm:$0xff] }
 0x219   :  { %v1135_v9 = vpop.f32.mrf.mxu0 }
 0x21a   :  { %7283 = vst [vmem:[#allocation27_spill] sm:$0xff] %v5905_v35  ;;  %v5910_v30 = vadd.f32 %v1135_v9, %v7284_v21  ;;  %v7289_v21 = vld [vmem:[#allocation30_spill] sm:$0xff]  ;;  %v5928_v35 = vpop.f32.mrf.mxu1 }
 0x21b   :  { %v1139_v57 = vpop.f32.mrf.mxu0  ;;  %4125 = vmatmul.mubr.msk.bf16.gmra.mxu0 %vm230_vm1, %v4713_v22 }
 0x21c   :  { %7285 = vst [vmem:[#allocation28_spill] sm:$0xff] %v5910_v30  ;;  %v5917_v12 = vadd.f32 %v1139_v57, %v5350_v63  ;;  %1959 = vmatprep.mubr.bf16.mxu0 %v7185_v42  ;;  %v4714_v57 = vld [vmem:[%s7135_s0 + $0xb8] sm:$0xff]  }
 0x21d   :  { %v1141_v28 = vpop.f32.mrf.mxu0 }
 0x21e   :  { %7286 = vst [vmem:[#allocation85_spill] sm:$0xff] %v5917_v12  ;;  %v5923_v19 = vadd.f32 %v1141_v28, %v7287_v47  ;;  %v5941_v47 = vpop.f32.mrf.mxu1 }
 0x21f   :  { %v1143_v9 = vpop.f32.mrf.mxu0  ;;  %7294 = vst [vmem:[#allocation87_spill] sm:$0xff] %v5941_v47 }
 0x220   :  { %7288 = vst [vmem:[#allocation29_spill] sm:$0xff] %v5923_v19  ;;  %v5926_v30 = vadd.f32 %v1143_v9, %v7289_v21  ;;  %v7298_v19 = vld [vmem:[#allocation32_spill] sm:$0xff] }
 0x221   :  { %v1145_v29 = vpop.f32.mrf.mxu0 }
 0x222   :  { %7290 = vst [vmem:[#allocation30_spill] sm:$0xff] %v5926_v30  ;;  %v5931_v22 = vadd.f32 %v1145_v29, %v7291_v51 }
 0x223   :  { %v1149_v63 = vpop.f32.mrf.mxu0  ;;  %4126 = vmatmul.mubr.msk.bf16.gmra.mxu0 %vm230_vm1, %v4714_v57 }
 0x224   :  { %7292 = vst [vmem:[#allocation31_spill] sm:$0xff] %v5931_v22  ;;  %v5938_v28 = vadd.f32 %v1149_v63, %v5364_v54  ;;  %1969 = vmatprep.mubr.bf16.mxu0 %v7185_v42  ;;  %v5949_v22 = vpop.f32.mrf.mxu1  ;;  %v4715_v63 = vld [vmem:[%s7135_s0 + $0xc0] sm:$0xff]  }
 0x225   :  { %v1151_v9 = vpop.f32.mrf.mxu0  ;;  %7297 = vst [vmem:[#allocation90_spill] sm:$0xff] %v5949_v22  ;;  %v7309_v22 = vld [vmem:[#allocation39_spill] sm:$0xff] }
 0x226   :  { %7293 = vst [vmem:[#allocation86_spill] sm:$0xff] %v5938_v28  ;;  %v5944_v21 = vadd.f32 %v1151_v9, %v5368_v34  ;;  %v7300_v28 = vld [vmem:[#allocation33_spill] sm:$0xff] }
 0x227   :  { %v1153_v51 = vpop.f32.mrf.mxu0 }
 0x228   :  { %7295 = vst [vmem:[#allocation88_spill] sm:$0xff] %v5944_v21  ;;  %v5947_v29 = vadd.f32 %v1153_v51, %v5370_v39  ;;  %v5962_v39 = vpop.f32.mrf.mxu1  ;;  %v7303_v51 = vld [vmem:[#allocation34_spill] sm:$0xff] }
 0x229   :  { %v1155_v30 = vpop.f32.mrf.mxu0  ;;  %7302 = vst [vmem:[#allocation91_spill] sm:$0xff] %v5962_v39 }
 0x22a   :  { %7296 = vst [vmem:[#allocation89_spill] sm:$0xff] %v5947_v29  ;;  %v5952_v57 = vadd.f32 %v1155_v30, %v7298_v19  ;;  %v7305_v19 = vld [vmem:[#allocation35_spill] sm:$0xff]  ;;  %v5970_v21 = vpop.f32.mrf.mxu1 }
 0x22b   :  { %v1159_v54 = vpop.f32.mrf.mxu0  ;;  %4127 = vmatmul.mubr.msk.bf16.gmra.mxu0 %vm230_vm1, %v4715_v63  ;;  %7307 = vst [vmem:[#allocation92_spill] sm:$0xff] %v5970_v21  ;;  %v7320_v21 = vld [vmem:[#allocation44_spill] sm:$0xff] }
 0x22c   :  { %7299 = vst [vmem:[#allocation32_spill] sm:$0xff] %v5952_v57  ;;  %v5959_v34 = vadd.f32 %v1159_v54, %v7300_v28  ;;  %1979 = vmatprep.mubr.bf16.mxu0 %v7185_v42  ;;  %v7310_v28 = vld [vmem:[#allocation38_spill] sm:$0xff] }
 0x22d   :  { %v1161_v9 = vpop.f32.mrf.mxu0 }
 0x22e   :  { %7301 = vst [vmem:[#allocation33_spill] sm:$0xff] %v5959_v34  ;;  %v5965_v29 = vadd.f32 %v1161_v9, %v7303_v51  ;;  %v4585_v9 = vld [vmem:[%s7136_s3 + $0x74] ss:$8 sps:$4 sm:$0xff]   ;;  %v5983_v51 = vpop.f32.mrf.mxu1 }
 0x22f   :  { %v1163_v30 = vpop.f32.mrf.mxu0  ;;  %7312 = vst [vmem:[#allocation38_spill] sm:$0xff] %v5983_v51  ;;  %2575 = vmatprep.subr.bf16.mxu1 %v4585_v9 }
 0x230   :  { %7304 = vst [vmem:[#allocation34_spill] sm:$0xff] %v5965_v29  ;;  %v5968_v57 = vadd.f32 %v1163_v30, %v7305_v19  ;;  %v7313_v19 = vld [vmem:[#allocation40_spill] sm:$0xff]  ;;  %v7315_v29 = vld [vmem:[#allocation41_spill] sm:$0xff] }
 0x231   :  { %v5972_v12 = vpop.f32.mrf.mxu0 }
 0x232   :  { %7306 = vst [vmem:[#allocation35_spill] sm:$0xff] %v5968_v57  ;;  %7308 = vst [vmem:[#allocation93_spill] sm:$0xff] %v5972_v12 }
 0x233   :  { %v1169_v63 = vpop.f32.mrf.mxu0  ;;  %4128 = vmatmul.mubr.msk.bf16.gmra.mxu0 %vm230_vm1, %v7309_v22  ;;  %v5991_v22 = vpop.f32.mrf.mxu1 }
 0x234   :  { %v5977_v54 = vadd.f32 %v1169_v63, %v7310_v28  ;;  %1989 = vmatprep.mubr.bf16.mxu0 %v7185_v42  ;;  %7317 = vst [vmem:[#allocation94_spill] sm:$0xff] %v5991_v22 }
 0x235   :  { %v1171_v30 = vpop.f32.mrf.mxu0 }
 0x236   :  { %7311 = vst [vmem:[#allocation39_spill] sm:$0xff] %v5977_v54  ;;  %v5986_v57 = vadd.f32 %v1171_v30, %v7313_v19  ;;  %v7319_v54 = vld [vmem:[#allocation45_spill] sm:$0xff]  ;;  %v6001_v30 = vpop.f32.mrf.mxu1  ;;  %v7323_v19 = vld [vmem:[#allocation46_spill] sm:$0xff] }
 0x237   :  { %v1173_v12 = vpop.f32.mrf.mxu0  ;;  %7322 = vst [vmem:[#allocation44_spill] sm:$0xff] %v6001_v30 }
 0x238   :  { %7314 = vst [vmem:[#allocation40_spill] sm:$0xff] %v5986_v57  ;;  %v5989_v34 = vadd.f32 %v1173_v12, %v7315_v29  ;;  %v4546_v29 = vld [vmem:[%s7135_s0 + $0xd8] sm:$0xff]  }
 0x239   :  { %v5993_v63 = vpop.f32.mrf.mxu0 }
 0x23a   :  { %7316 = vst [vmem:[#allocation41_spill] sm:$0xff] %v5989_v34  ;;  %7318 = vst [vmem:[#allocation95_spill] sm:$0xff] %v5993_v63  ;;  %v7325_v34 = vld [vmem:[#allocation47_spill] sm:$0xff] }
 0x23b   :  { %v1179_v28 = vpop.f32.mrf.mxu0  ;;  %4129 = vmatmul.mubr.msk.bf16.gmra.mxu0 %vm230_vm1, %v7319_v54  ;;  %v6012_v54 = vpop.f32.mrf.mxu1 }
 0x23c   :  { %v5998_v39 = vadd.f32 %v1179_v28, %v7320_v21  ;;  %1999 = vmatprep.mubr.bf16.mxu0 %v7185_v42  ;;  %7327 = vst [vmem:[#allocation96_spill] sm:$0xff] %v6012_v54 }
 0x23d   :  { %v1181_v9 = vpop.f32.mrf.mxu0 }
 0x23e   :  { %7321 = vst [vmem:[#allocation45_spill] sm:$0xff] %v5998_v39  ;;  %v6004_v57 = vadd.f32 %v1181_v9, %v7323_v19  ;;  %v7329_v39 = vld [vmem:[#allocation50_spill] sm:$0xff]  ;;  %v6021_v9 = vpop.f32.mrf.mxu1 }
 0x23f   :  { %v1183_v12 = vpop.f32.mrf.mxu0  ;;  %7331 = vst [vmem:[#allocation98_spill] sm:$0xff] %v6021_v9 }
 0x240   :  { %7324 = vst [vmem:[#allocation46_spill] sm:$0xff] %v6004_v57  ;;  %v6010_v63 = vadd.f32 %v1183_v12, %v7325_v34  ;;  %v7332_v57 = vld [vmem:[#allocation51_spill] sm:$0xff]  ;;  %v7334_v12 = vld [vmem:[#allocation52_spill] sm:$0xff]  ;;  %v6029_v54 = vpop.f32.mrf.mxu1 }
 0x241   :  { %v6014_v21 = vpop.f32.mrf.mxu0  ;;  %7336 = vst [vmem:[#allocation99_spill] sm:$0xff] %v6029_v54 }
 0x242   :  { %7326 = vst [vmem:[#allocation47_spill] sm:$0xff] %v6010_v63  ;;  %7328 = vst [vmem:[#allocation97_spill] sm:$0xff] %v6014_v21 }
 0x243   :  { %v1189_v28 = vpop.f32.mrf.mxu0  ;;  %4130 = vmatmul.mubr.msk.bf16.gmra.mxu0 %vm230_vm1, %v4546_v29 }
 0x244   :  { %v6018_v30 = vadd.f32 %v1189_v28, %v7329_v39  ;;  %3059 = vmatprep.mubr.bf16.mxu0 %v7185_v42  ;;  %v6034_v28 = vpop.f32.mrf.mxu1 }
 0x245   :  { %v1191_v19 = vpop.f32.mrf.mxu0  ;;  %7338 = vst [vmem:[#allocation101_spill] sm:$0xff] %v6034_v28 }
 0x246   :  { %7330 = vst [vmem:[#allocation50_spill] sm:$0xff] %v6018_v30  ;;  %v6024_v22 = vadd.f32 %v1191_v19, %v7332_v57  ;;  %v1607_v57 = vadd.f32 %v5472_v33, %v5475_v44  ;;  %v6049_v33 = vld [vmem:[%s7137_s2] ss:$0 sm:$0xff] }
 0x247   :  { %v1193_v34 = vpop.f32.mrf.mxu0 }
 0x248   :  { %7333 = vst [vmem:[#allocation51_spill] sm:$0xff] %v6024_v22  ;;  %v6027_v63 = vadd.f32 %v1193_v34, %v7334_v12  ;;  %v7339_v22 = vld [vmem:[#allocation55_spill] sm:$0xff]  ;;  %v6040_v12 = vpop.f32.mrf.mxu1 }
 0x249   :  { %v6031_v21 = vpop.f32.mrf.mxu0 }
 0x24a   :  { %7335 = vst [vmem:[#allocation52_spill] sm:$0xff] %v6027_v63  ;;  %7337 = vst [vmem:[#allocation100_spill] sm:$0xff] %v6031_v21 }
 0x24b   :  { %v1771_v29 = vpop.f32.mrf.mxu0 }
 0x24c   :  { %v2010_v39 = vadd.f32 %v1771_v29, %v5467_v36  ;;  %v6043_v29 = vpop.f32.mrf.mxu1 }
 0x24d   :  { %v1773_v30 = vpop.f32.mrf.mxu0 }
 0x24e   :  { %v2011_v9 = vadd.f32 %v1773_v30, %v5470_v38  ;;  %v6054_v30 = vpop.f32.mrf.mxu1 }
 0x24f   :  { %v1775_v51 = vpop.f32.mrf.mxu0 }
 0x250   :  { %v2106_v19 = vmax.f32 %v2010_v39, %v2011_v9  ;;  %v2012_v34 = vadd.f32 %v1775_v51, %v7339_v22  ;;  %v1611_v51 = vadd.f32 %v5527_v25, %v5492_v56  ;;  %v1612_v39 = vadd.f32 %v5535_v40, %v5501_v5  ;;  %v6062_v25 = vpop.f32.mrf.mxu1 }
 0x251   :  { %v1777_v63 = vpop.f32.mrf.mxu0  ;;  %v1615_v5 = vadd.f32 %v5569_v6, %v5517_v1 }
 0x252   :  { %v2013_v54 = vadd.f32 %v1777_v63, %v1607_v57 }
 0x253   :  { %v1781_v21 = vpop.f32.mrf.mxu0 }
 0x254   :  { %v2107_v47 = vmax.f32 %v2012_v34, %v2013_v54  ;;  %v2014_v36 = vadd.f32 %v1781_v21, %v5486_v62  ;;  %v2161_v54 = vadd.f32 %v6049_v33, %v2106_v19 }
 0x255   :  { %v1783_v28 = vpop.f32.mrf.mxu0 }
 0x256   :  { %v2015_v38 = vadd.f32 %v1783_v28, %v5489_v48  ;;  %v1613_v28 = vadd.f32 %v5548_v53, %v5505_v41  ;;  %v2162_v34 = vadd.f32 %v6049_v33, %v2107_v47  ;;  %v6070_v53 = vpop.f32.mrf.mxu1 }
 0x257   :  { %v1785_v44 = vpop.f32.mrf.mxu0 }
 0x258   :  { %v2108_v22 = vmax.f32 %v2014_v36, %v2015_v38  ;;  %v2016_v63 = vadd.f32 %v1785_v44, %v5494_v52  ;;  %v6082_v6 = vpop.f32.mrf.mxu1 }
 0x259   :  { %v1787_v62 = vpop.f32.mrf.mxu0 }
 0x25a   :  { %v2163_v21 = vadd.f32 %v6049_v33, %v2108_v22  ;;  %v2017_v48 = vadd.f32 %v1787_v62, %v1611_v51  ;;  %v1614_v51 = vadd.f32 %v5556_v3, %v5514_v45  ;;  %v1617_v45 = vadd.f32 %v5596_v27, %v5530_v46 }
 0x25b   :  { %v1791_v9 = vpop.f32.mrf.mxu0 }
 0x25c   :  { %v2209_v57 = vmax.f32 %v2161_v54, %v2163_v21  ;;  %v2109_v56 = vmax.f32 %v2016_v63, %v2017_v48  ;;  %v2018_v19 = vadd.f32 %v1791_v9, %v1612_v39  ;;  %v1616_v48 = vadd.f32 %v5583_v37, %v5524_v43  ;;  %v6088_v37 = vpop.f32.mrf.mxu1 }
 0x25d   :  { %v1793_v52 = vpop.f32.mrf.mxu0 }
 0x25e   :  { %v2164_v36 = vadd.f32 %v6049_v33, %v2109_v56  ;;  %v2019_v38 = vadd.f32 %v1793_v52, %v1613_v28  ;;  %v6072_v63 = vmax.f32 %v2209_v57, 0.0  ;;  %v1618_v56 = vadd.f32 %v5604_v60, %v5533_v2 }
 0x25f   :  { %v1795_v44 = vpop.f32.mrf.mxu0  ;;  %v1619_v52 = vadd.f32 %v5617_v61, %v5538_v11  ;;  %v1621_v2 = vadd.f32 %v5638_v26, %v5551_v14  ;;  %v6096_v11 = vpop.f32.mrf.mxu1 }
 0x260   :  { %v2210_v40 = vmax.f32 %v2162_v34, %v2164_v36  ;;  %v2110_v41 = vmax.f32 %v2018_v19, %v2019_v38  ;;  %v2020_v47 = vadd.f32 %v1795_v44, %v1614_v51  ;;  %v1620_v44 = vadd.f32 %v5625_v31, %v5545_v49 }
 0x261   :  { %v1797_v22 = vpop.f32.mrf.mxu0  ;;  %v1623_v49 = vadd.f32 %v5665_v32, %v5559_v20  ;;  %v6104_v26 = vpop.f32.mrf.mxu1 }
 0x262   :  { %v6074_v62 = vmax.f32 %v2210_v40, 0.0  ;;  %v2021_v54 = vadd.f32 %v1797_v22, %v1615_v5  ;;  %v2165_v27 = vadd.f32 %v6049_v33, %v2110_v41 }
 0x263   :  { %v1801_v21 = vpop.f32.mrf.mxu0 }
 0x264   :  { %v2257_v1 = vpack.c.bf16 %v6074_v62, %v6072_v63  ;;  %v2111_v3 = vmax.f32 %v2020_v47, %v2021_v54  ;;  %v2022_v39 = vadd.f32 %v1801_v21, %v1616_v48  ;;  %v1622_v54 = vadd.f32 %v5646_v8, %v5554_v17  ;;  %v7340_v8 = vld [vmem:[#allocation56_spill] sm:$0xff]  ;;  %v7421_v62 = vld [vmem:[#allocation42_spill] sm:$0xff] }
 0x265   :  { %v1803_v9 = vpop.f32.mrf.mxu0  ;;  %v1624_v17 = vadd.f32 %v5673_v23, %v5566_v0  ;;  %v1625_v20 = vadd.f32 %v5686_v24, %v7340_v8  ;;  %v4586_v0 = vld [vmem:[%s7136_s3 + $0x60] ss:$8 sps:$4 sm:$0xff]   ;;  %v1626_v23 = vadd.f32 %v5694_v15, %v5581_v13  ;;  %v7341_v24 = vld [vmem:[#allocation57_spill] sm:$0xff]  ;;  %v1628_v15 = vadd.f32 %v5718_v58, %v5593_v59 }
 0x266   :  { %v2023_v28 = vadd.f32 %v1803_v9, %v1617_v45  ;;  %v2166_v5 = vadd.f32 %v6049_v33, %v2111_v3  ;;  %v4589_v13 = vld [vmem:[%s7136_s3 + $0x50] ss:$8 sps:$4 sm:$0xff]   ;;  %v4592_v58 = vld [vmem:[%s7136_s3 + $0x40] ss:$8 sps:$4 sm:$0xff]   ;;  %v4615_v63 = vld [vmem:[%s7136_s3 + $0x154] ss:$8 sps:$4 sm:$0xff]  }
 0x267   :  { %v1805_v57 = vpop.f32.mrf.mxu0 }
 0x268   :  { %v2112_v43 = vmax.f32 %v2022_v39, %v2023_v28  ;;  %v2024_v36 = vadd.f32 %v1805_v57, %v1618_v56  ;;  %v4583_v28 = vld [vmem:[%s7136_s3 + $0x70] ss:$8 sps:$4 sm:$0xff]   ;;  %v4588_v56 = vld [vmem:[%s7136_s3 + $0x64] ss:$8 sps:$4 sm:$0xff]  }
 0x269   :  { %v1807_v46 = vpop.f32.mrf.mxu0 }
 0x26a   :  { %v2167_v34 = vadd.f32 %v6049_v33, %v2112_v43  ;;  %v2025_v19 = vadd.f32 %v1807_v46, %v1619_v52  ;;  %v6118_v52 = vpop.f32.mrf.mxu1 }
 0x26b   :  { %v1811_v38 = vpop.f32.mrf.mxu0 }
 0x26c   :  { %v2211_v60 = vmax.f32 %v2165_v27, %v2167_v34  ;;  %v2113_v51 = vmax.f32 %v2024_v36, %v2025_v19  ;;  %v2026_v41 = vadd.f32 %v1811_v38, %v1620_v44  ;;  %v1627_v36 = vadd.f32 %v5707_v18, %v7341_v24  ;;  %v4591_v38 = vld [vmem:[%s7136_s3 + $0x54] ss:$8 sps:$4 sm:$0xff]   ;;  %v6132_v44 = vpop.f32.mrf.mxu1  ;;  %v7342_v18 = vld [vmem:[#allocation58_spill] sm:$0xff] }
 0x26d   :  { %v1813_v61 = vpop.f32.mrf.mxu0 }
 0x26e   :  { %v2168_v40 = vadd.f32 %v6049_v33, %v2113_v51  ;;  %v2027_v22 = vadd.f32 %v1813_v61, %v1621_v2  ;;  %v2235_v48 = vmax.f32 %v2211_v60, 0.0 }
 0x26f   :  { %v1815_v47 = vpop.f32.mrf.mxu0 }
 0x270   :  { %v2212_v31 = vmax.f32 %v2166_v5, %v2168_v40  ;;  %v2114_v14 = vmax.f32 %v2026_v41, %v2027_v22  ;;  %v2028_v9 = vadd.f32 %v1815_v47, %v1622_v54  ;;  %v7343_v41 = vld [vmem:[#allocation73_spill] sm:$0xff] }
 0x271   :  { %v1817_v21 = vpop.f32.mrf.mxu0  ;;  %v1629_v22 = vadd.f32 %v7343_v41, %v7342_v18 }
 0x272   :  { %v2236_v45 = vmax.f32 %v2212_v31, 0.0  ;;  %v2029_v3 = vadd.f32 %v1817_v21, %v1623_v49  ;;  %v2169_v60 = vadd.f32 %v6049_v33, %v2114_v14  ;;  %v4594_v49 = vld [vmem:[%s7136_s3 + $0x44] ss:$8 sps:$4 sm:$0xff]   ;;  %v6146_v31 = vpop.f32.mrf.mxu1 }
 0x273   :  { %v1821_v39 = vpop.f32.mrf.mxu0 }
 0x274   :  { %v6113_v32 = vpack.c.bf16 %v2236_v45, %v2235_v48  ;;  %v2115_v57 = vmax.f32 %v2028_v9, %v2029_v3  ;;  %v2030_v46 = vadd.f32 %v1821_v39, %v1624_v17  ;;  %v7344_v3 = vld [vmem:[#allocation59_spill] sm:$0xff] }
 0x275   :  { %v1823_v43 = vpop.f32.mrf.mxu0  ;;  %v1630_v39 = vadd.f32 %v5751_v50, %v7344_v3  ;;  %v7346_v17 = vld [vmem:[#allocation75_spill] sm:$0xff]  ;;  %v4595_v50 = vld [vmem:[%s7136_s3 + $0x30] ss:$8 sps:$4 sm:$0xff]  }
 0x276   :  { %v2031_v27 = vadd.f32 %v1823_v43, %v1625_v20  ;;  %2415 = vmatmul.mubr.bf16.vlgmr.msra.gmra.mxu1 %v6113_v32  ;;  %v2170_v21 = vadd.f32 %v6049_v33, %v2115_v57  ;;  %v4597_v57 = vld [vmem:[%s7136_s3 + $0x34] ss:$8 sps:$4 sm:$0xff]   ;;  %v6160_v43 = vpop.f32.mrf.mxu1 }
 0x277   :  { %v1825_v34 = vpop.f32.mrf.mxu0  ;;  %2424 = vmatprep.mubr.bf16.mxu1 %v7185_v42  ;;  %2576 = vmatpush1.bf16.msra.mxu1 %v4583_v28  ;;  %v7345_v28 = vld [vmem:[#allocation60_spill] sm:$0xff] }
 0x278   :  { %v2116_v19 = vmax.f32 %v2030_v46, %v2031_v27  ;;  %2577 = vmatprep.subr.bf16.mxu1 %v4588_v56  ;;  %v2032_v61 = vadd.f32 %v1825_v34, %v1626_v23  ;;  %v1631_v8 = vadd.f32 %v7346_v17, %v7345_v28  ;;  %v7353_v17 = vld [vmem:[#allocation65_spill] sm:$0xff] }
 0x279   :  { %v1827_v2 = vpop.f32.mrf.mxu0 }
 0x27a   :  { %v2171_v51 = vadd.f32 %v6049_v33, %v2116_v19  ;;  %v2033_v5 = vadd.f32 %v1827_v2, %v1627_v36  ;;  %v7347_v36 = vld [vmem:[#allocation61_spill] sm:$0xff] }
 0x27b   :  { %v1831_v40 = vpop.f32.mrf.mxu0  ;;  %2578 = vmatpush1.bf16.msra.mxu1 %v4586_v0  ;;  %v1632_v19 = vadd.f32 %v5784_v7, %v7347_v36  ;;  %v7349_v2 = vld [vmem:[#allocation77_spill] sm:$0xff]  ;;  %v4598_v7 = vld [vmem:[%s7136_s3 + $0x20] ss:$8 sps:$4 sm:$0xff]  }
 0x27c   :  { %v2213_v47 = vmax.f32 %v2169_v60, %v2171_v51  ;;  %v2117_v54 = vmax.f32 %v2032_v61, %v2033_v5  ;;  %2579 = vmatprep.subr.bf16.mxu1 %v4591_v38  ;;  %v2034_v45 = vadd.f32 %v1831_v40, %v1628_v15  ;;  %v7348_v38 = vld [vmem:[#allocation62_spill] sm:$0xff]  ;;  %v6174_v40 = vpop.f32.mrf.mxu1 }
 0x27d   :  { %v1833_v14 = vpop.f32.mrf.mxu0  ;;  %v1633_v60 = vadd.f32 %v7349_v2, %v7348_v38  ;;  %v4600_v5 = vld [vmem:[%s7136_s3 + $0x24] ss:$8 sps:$4 sm:$0xff]  }
 0x27e   :  { %v2172_v48 = vadd.f32 %v6049_v33, %v2117_v54  ;;  %v2035_v9 = vadd.f32 %v1833_v14, %v1629_v22  ;;  %v2237_v27 = vmax.f32 %v2213_v47, 0.0  ;;  %v7350_v22 = vld [vmem:[#allocation63_spill] sm:$0xff]  ;;  %v7351_v54 = vld [vmem:[#allocation64_spill] sm:$0xff] }
 0x27f   :  { %v1835_v59 = vpop.f32.mrf.mxu0  ;;  %2580 = vmatpush1.bf16.msra.mxu1 %v4589_v13  ;;  %v1634_v47 = vadd.f32 %v5817_v4, %v7350_v22  ;;  %v4601_v4 = vld [vmem:[%s7136_s3 + $0x10] ss:$8 sps:$4 sm:$0xff]  }
 0x280   :  { %v2214_v20 = vmax.f32 %v2170_v21, %v2172_v48  ;;  %v2118_v56 = vmax.f32 %v2034_v45, %v2035_v9  ;;  %2581 = vmatprep.subr.bf16.mxu1 %v4594_v49  ;;  %v2036_v0 = vadd.f32 %v1835_v59, %v1630_v39  ;;  %v7352_v49 = vld [vmem:[#allocation79_spill] sm:$0xff]  ;;  %v4603_v48 = vld [vmem:[%s7136_s3 + $0x14] ss:$8 sps:$4 sm:$0xff]   ;;  %v6188_v45 = vpop.f32.mrf.mxu1 }
 0x281   :  { %v1837_v46 = vpop.f32.mrf.mxu0  ;;  %v1635_v14 = vadd.f32 %v7352_v49, %v7351_v54 }
 0x282   :  { %v2238_v34 = vmax.f32 %v2214_v20, 0.0  ;;  %v2037_v23 = vadd.f32 %v1837_v46, %v1631_v8  ;;  %v2173_v59 = vadd.f32 %v6049_v33, %v2118_v56  ;;  %v7354_v8 = vld [vmem:[#allocation80_spill] sm:$0xff]  ;;  %v7356_v46 = vld [vmem:[#allocation82_spill] sm:$0xff] }
 0x283   :  { %v1841_v24 = vpop.f32.mrf.mxu0  ;;  %2582 = vmatpush1.bf16.msra.mxu1 %v4592_v58  ;;  %v1636_v20 = vadd.f32 %v7354_v8, %v7353_v17  ;;  %v4606_v56 = vld [vmem:[%s7136_s3 + $0x4] ss:$8 sps:$4 sm:$0xff]  }
 0x284   :  { %v2119_v51 = vmax.f32 %v2036_v0, %v2037_v23  ;;  %v6169_v61 = vpack.c.bf16 %v2238_v34, %v2237_v27  ;;  %2583 = vmatprep.subr.bf16.mxu1 %v4597_v57  ;;  %v2038_v15 = vadd.f32 %v1841_v24, %v1632_v19  ;;  %v7355_v57 = vld [vmem:[#allocation66_spill] sm:$0xff]  ;;  %v6202_v23 = vpop.f32.mrf.mxu1 }
 0x285   :  { %v1843_v13 = vpop.f32.mrf.mxu0  ;;  %v1637_v27 = vadd.f32 %v7356_v46, %v7355_v57  ;;  %v7363_v46 = vld [vmem:[#allocation4_spill] sm:$0xff] }
 0x286   :  { %v2039_v18 = vadd.f32 %v1843_v13, %v1633_v60  ;;  %2425 = vmatmul.mubr.bf16.gmra.mxu1 %v6169_v61  ;;  %v4604_v60 = vld [vmem:[%s7136_s3] ss:$8 sps:$4 sm:$0xff]  }
 0x287   :  { %v1845_v41 = vpop.f32.mrf.mxu0  ;;  %2434 = vmatprep.mubr.bf16.mxu1 %v7185_v42  ;;  %2584 = vmatpush1.bf16.msra.mxu1 %v4595_v50  ;;  %v2174_v50 = vadd.f32 %v6049_v33, %v2119_v51  ;;  %v7358_v13 = vld [vmem:[#allocation83_spill] sm:$0xff]  ;;  %v4609_v51 = vld [vmem:[%s7136_s3 + $0x174] ss:$8 sps:$4 sm:$0xff]  }
 0x288   :  { %v2120_v21 = vmax.f32 %v2038_v15, %v2039_v18  ;;  %2585 = vmatprep.subr.bf16.mxu1 %v4600_v5  ;;  %v2040_v3 = vadd.f32 %v1845_v41, %v1634_v47  ;;  %v7357_v5 = vld [vmem:[#allocation67_spill] sm:$0xff]  ;;  %v7359_v18 = vld [vmem:[#allocation68_spill] sm:$0xff]  ;;  %v6216_v47 = vpop.f32.mrf.mxu1 }
 0x289   :  { %v1847_v9 = vpop.f32.mrf.mxu0  ;;  %v1638_v15 = vadd.f32 %v7358_v13, %v7357_v5  ;;  %v1639_v41 = vadd.f32 %v5899_v10, %v7359_v18  ;;  %v7361_v10 = vld [vmem:[#allocation2_spill] sm:$0xff]  ;;  %v7368_v18 = vld [vmem:[#allocation91_spill] sm:$0xff] }
 0x28a   :  { %v2175_v58 = vadd.f32 %v6049_v33, %v2120_v21  ;;  %v2041_v39 = vadd.f32 %v1847_v9, %v1635_v14  ;;  %v7366_v5 = vld [vmem:[#allocation90_spill] sm:$0xff] }
 0x28b   :  { %v1851_v28 = vpop.f32.mrf.mxu0  ;;  %2586 = vmatpush1.bf16.msra.mxu1 %v4598_v7 }
 0x28c   :  { %v2215_v34 = vmax.f32 %v2173_v59, %v2175_v58  ;;  %v2121_v0 = vmax.f32 %v2040_v3, %v2041_v39  ;;  %2587 = vmatprep.subr.bf16.mxu1 %v4603_v48  ;;  %v2042_v19 = vadd.f32 %v1851_v28, %v1636_v20  ;;  %v7360_v59 = vld [vmem:[#allocation69_spill] sm:$0xff]  ;;  %v1641_v3 = vadd.f32 %v5920_v16, %v7361_v10  ;;  %v7371_v10 = vld [vmem:[#allocation7_spill] sm:$0xff] }
 0x28d   :  { %v1853_v24 = vpop.f32.mrf.mxu0  ;;  %v1640_v58 = vadd.f32 %v5907_v55, %v7360_v59  ;;  %v7362_v55 = vld [vmem:[#allocation3_spill] sm:$0xff]  ;;  %v7370_v59 = vld [vmem:[#allocation92_spill] sm:$0xff] }
 0x28e   :  { %v2176_v36 = vadd.f32 %v6049_v33, %v2121_v0  ;;  %v2043_v38 = vadd.f32 %v1853_v24, %v1637_v27  ;;  %v2239_v49 = vmax.f32 %v2215_v34, 0.0  ;;  %v1642_v16 = vadd.f32 %v5928_v35, %v7362_v55  ;;  %v7364_v27 = vld [vmem:[#allocation87_spill] sm:$0xff] }
 0x28f   :  { %v1855_v2 = vpop.f32.mrf.mxu0  ;;  %2588 = vmatpush1.bf16.msra.mxu1 %v4601_v4  ;;  %v6224_v4 = vpop.f32.mrf.mxu1  ;;  %v1643_v34 = vadd.f32 %v7364_v27, %v7363_v46 }
 0x290   :  { %v2216_v7 = vmax.f32 %v2174_v50, %v2176_v36  ;;  %v2122_v22 = vmax.f32 %v2042_v19, %v2043_v38  ;;  %2589 = vmatprep.subr.bf16.mxu1 %v4606_v56  ;;  %v2044_v21 = vadd.f32 %v1855_v2, %v1638_v15  ;;  %v7367_v15 = vld [vmem:[#allocation5_spill] sm:$0xff] }
 0x291   :  { %v1857_v54 = vpop.f32.mrf.mxu0  ;;  %v6234_v56 = vpop.f32.mrf.mxu1  ;;  %v1645_v35 = vadd.f32 %v7368_v18, %v7367_v15 }
 0x292   :  { %v2240_v14 = vmax.f32 %v2216_v7, 0.0  ;;  %v2045_v48 = vadd.f32 %v1857_v54, %v1639_v41  ;;  %v2177_v50 = vadd.f32 %v6049_v33, %v2122_v22 }
 0x293   :  { %v1861_v9 = vpop.f32.mrf.mxu0  ;;  %2590 = vmatpush1.bf16.msra.mxu1 %v4604_v60  ;;  %v7365_v60 = vld [vmem:[#allocation70_spill] sm:$0xff] }
 0x294   :  { %v2123_v39 = vmax.f32 %v2044_v21, %v2045_v48  ;;  %v6222_v28 = vpack.c.bf16 %v2240_v14, %v2239_v49  ;;  %2785 = vmatprep.subr.bf16.mxu1 %v4609_v51  ;;  %v2046_v8 = vadd.f32 %v1861_v9, %v1640_v58  ;;  %v1644_v13 = vadd.f32 %v7366_v5, %v7365_v60  ;;  %v6242_v51 = vpop.f32.mrf.mxu1  ;;  %v7369_v9 = vld [vmem:[#allocation6_spill] sm:$0xff] }
 0x295   :  { %v1863_v17 = vpop.f32.mrf.mxu0  ;;  %v1646_v58 = vadd.f32 %v7370_v59, %v7369_v9 }
 0x296   :  { %v2047_v20 = vadd.f32 %v1863_v17, %v1641_v3  ;;  %2435 = vmatmul.mubr.bf16.gmra.mxu1 %v6222_v28  ;;  %3060 = vmatmul.mubr.bf16.vlgmr.msra.gmra.mxu0 %v6222_v28  ;;  %v2178_v49 = vadd.f32 %v6049_v33, %v2123_v39  ;;  %v7372_v3 = vld [vmem:[#allocation38_spill] sm:$0xff] }
 0x297   :  { %v1865_v57 = vpop.f32.mrf.mxu0  ;;  %2444 = vmatprep.mubr.bf16.mxu1 %v7185_v42  ;;  %3069 = vmatprep.mubr.bf16.mxu0 %v7185_v42  ;;  %v1647_v17 = vadd.f32 %v7372_v3, %v7371_v10 }
 0x298   :  { %v2124_v0 = vmax.f32 %v2046_v8, %v2047_v20  ;;  %v2048_v19 = vadd.f32 %v1865_v57, %v1642_v16  ;;  %v6250_v57 = vpop.f32.mrf.mxu1 }
 0x299   :  { %v1867_v24 = vpop.f32.mrf.mxu0 }
 0x29a   :  { %v2179_v36 = vadd.f32 %v6049_v33, %v2124_v0  ;;  %v2049_v38 = vadd.f32 %v1867_v24, %v1643_v34  ;;  %v7373_v0 = vld [vmem:[#allocation71_spill] sm:$0xff]  ;;  %v7374_v24 = vld [vmem:[#allocation94_spill] sm:$0xff]  ;;  %v6258_v5 = vpop.f32.mrf.mxu1 }
 0x29b   :  { %v1871_v2 = vpop.f32.mrf.mxu0 }
 0x29c   :  { %v2217_v41 = vmax.f32 %v2177_v50, %v2179_v36  ;;  %v2125_v7 = vmax.f32 %v2048_v19, %v2049_v38  ;;  %v2050_v14 = vadd.f32 %v1871_v2, %v1644_v13  ;;  %v1648_v50 = vadd.f32 %v7374_v24, %v7373_v0  ;;  %v7375_v36 = vld [vmem:[#allocation8_spill] sm:$0xff] }
 0x29d   :  { %v1873_v54 = vpop.f32.mrf.mxu0  ;;  %v7376_v19 = vld [vmem:[#allocation44_spill] sm:$0xff] }
 0x29e   :  { %v2180_v22 = vadd.f32 %v6049_v33, %v2125_v7  ;;  %v2051_v21 = vadd.f32 %v1873_v54, %v1645_v35  ;;  %v2241_v16 = vmax.f32 %v2217_v41, 0.0  ;;  %v1649_v38 = vadd.f32 %v7376_v19, %v7375_v36  ;;  %v7377_v41 = vld [vmem:[#allocation9_spill] sm:$0xff]  ;;  %v7378_v7 = vld [vmem:[#allocation96_spill] sm:$0xff] }
 0x29f   :  { %v1875_v48 = vpop.f32.mrf.mxu0  ;;  %v1650_v54 = vadd.f32 %v7378_v7, %v7377_v41 }
 0x2a0   :  { %v2218_v8 = vmax.f32 %v2178_v49, %v2180_v22  ;;  %v2126_v20 = vmax.f32 %v2050_v14, %v2051_v21  ;;  %v2052_v27 = vadd.f32 %v1875_v48, %v1646_v58  ;;  %v7379_v49 = vld [vmem:[#allocation10_spill] sm:$0xff]  ;;  %v6268_v48 = vpop.f32.mrf.mxu1 }
 0x2a1   :  { %v1877_v55 = vpop.f32.mrf.mxu0  ;;  %v7380_v22 = vld [vmem:[#allocation98_spill] sm:$0xff] }
 0x2a2   :  { %v2242_v46 = vmax.f32 %v2218_v8, 0.0  ;;  %v2053_v39 = vadd.f32 %v1877_v55, %v1647_v17  ;;  %v1651_v14 = vadd.f32 %v7380_v22, %v7379_v49  ;;  %v2181_v59 = vadd.f32 %v6049_v33, %v2126_v20  ;;  %v7381_v8 = vld [vmem:[#allocation72_spill] sm:$0xff]  ;;  %v7382_v55 = vld [vmem:[#allocation99_spill] sm:$0xff]  ;;  %v6276_v24 = vpop.f32.mrf.mxu1 }
 0x2a3   :  { %v1881_v34 = vpop.f32.mrf.mxu0 }
 0x2a4   :  { %v6256_v2 = vpack.c.bf16 %v2242_v46, %v2241_v16  ;;  %v2127_v60 = vmax.f32 %v2052_v27, %v2053_v39  ;;  %v2054_v15 = vadd.f32 %v1881_v34, %v1648_v50  ;;  %v1652_v16 = vadd.f32 %v7382_v55, %v7381_v8  ;;  %v7383_v46 = vld [vmem:[#allocation11_spill] sm:$0xff]  ;;  %v7384_v27 = vld [vmem:[#allocation101_spill] sm:$0xff]  ;;  %v6284_v49 = vpop.f32.mrf.mxu1 }
 0x2a5   :  { %v1883_v13 = vpop.f32.mrf.mxu0  ;;  %v1653_v39 = vadd.f32 %v7384_v27, %v7383_v46 }
 0x2a6   :  { %v2055_v18 = vadd.f32 %v1883_v13, %v1649_v38  ;;  %2445 = vmatmul.mubr.bf16.gmra.mxu1 %v6256_v2  ;;  %3070 = vmatmul.mubr.bf16.gmra.mxu0 %v6256_v2  ;;  %v2182_v36 = vadd.f32 %v6049_v33, %v2127_v60 }
 0x2a7   :  { %v1885_v35 = vpop.f32.mrf.mxu0  ;;  %2454 = vmatprep.mubr.bf16.mxu1 %v7185_v42  ;;  %3079 = vmatprep.mubr.bf16.mxu0 %v7185_v42 }
 0x2a8   :  { %v2128_v21 = vmax.f32 %v2054_v15, %v2055_v18  ;;  %v2056_v10 = vadd.f32 %v1885_v35, %v1650_v54  ;;  %v7385_v15 = vld [vmem:[#allocation12_spill] sm:$0xff]  ;;  %v7386_v35 = vld [vmem:[#allocation13_spill] sm:$0xff] }
 0x2a9   :  { %v1887_v9 = vpop.f32.mrf.mxu0  ;;  %v1654_v18 = vadd.f32 %v6040_v12, %v7385_v15  ;;  %v1655_v41 = vadd.f32 %v6043_v29, %v7386_v35  ;;  %v6292_v29 = vpop.f32.mrf.mxu1 }
 0x2aa   :  { %v2183_v58 = vadd.f32 %v6049_v33, %v2128_v21  ;;  %v2057_v3 = vadd.f32 %v1887_v9, %v1651_v14 }
 0x2ab   :  { %v1891_v17 = vpop.f32.mrf.mxu0 }
 0x2ac   :  { %v2219_v34 = vmax.f32 %v2181_v59, %v2183_v58  ;;  %v2129_v0 = vmax.f32 %v2056_v10, %v2057_v3  ;;  %v2058_v19 = vadd.f32 %v1891_v17, %v1652_v16  ;;  %v7387_v58 = vld [vmem:[#allocation74_spill] sm:$0xff] }
 0x2ad   :  { %v1893_v50 = vpop.f32.mrf.mxu0  ;;  %v1656_v10 = vadd.f32 %v6054_v30, %v7387_v58  ;;  %v7388_v3 = vld [vmem:[#allocation14_spill] sm:$0xff]  ;;  %v7389_v30 = vld [vmem:[#allocation15_spill] sm:$0xff] }
 0x2ae   :  { %v2184_v20 = vadd.f32 %v6049_v33, %v2129_v0  ;;  %v2059_v38 = vadd.f32 %v1893_v50, %v1653_v39  ;;  %v2243_v14 = vmax.f32 %v2219_v34, 0.0  ;;  %v1657_v17 = vadd.f32 %v6062_v25, %v7388_v3  ;;  %v7390_v39 = vld [vmem:[#allocation16_spill] sm:$0xff]  ;;  %v6302_v50 = vpop.f32.mrf.mxu1  ;;  %v7393_v58 = vld [vmem:[#allocation18_spill] sm:$0xff]  ;;  %v7394_v3 = vld [vmem:[#allocation19_spill] sm:$0xff] }
 0x2af   :  { %v1895_v13 = vpop.f32.mrf.mxu0  ;;  %v1658_v25 = vadd.f32 %v6070_v53, %v7389_v30  ;;  %v1659_v34 = vadd.f32 %v6082_v6, %v7390_v39  ;;  %v7395_v39 = vld [vmem:[#allocation78_spill] sm:$0xff] }
 0x2b0   :  { %v2220_v7 = vmax.f32 %v2182_v36, %v2184_v20  ;;  %v2130_v54 = vmax.f32 %v2058_v19, %v2059_v38  ;;  %v2060_v9 = vadd.f32 %v1895_v13, %v1654_v18  ;;  %v7391_v18 = vld [vmem:[#allocation76_spill] sm:$0xff]  ;;  %v6310_v6 = vpop.f32.mrf.mxu1 }
 0x2b1   :  { %v1897_v22 = vpop.f32.mrf.mxu0  ;;  %v1660_v35 = vadd.f32 %v6088_v37, %v7391_v18  ;;  %v1663_v37 = vadd.f32 %v6118_v52, %v7394_v3  ;;  %v7398_v18 = vld [vmem:[#allocation22_spill] sm:$0xff] }
 0x2b2   :  { %v2244_v21 = vmax.f32 %v2220_v7, 0.0  ;;  %v2061_v60 = vadd.f32 %v1897_v22, %v1655_v41  ;;  %v2185_v20 = vadd.f32 %v6049_v33, %v2130_v54  ;;  %v7392_v41 = vld [vmem:[#allocation17_spill] sm:$0xff] }
 0x2b3   :  { %v1901_v59 = vpop.f32.mrf.mxu0  ;;  %v1661_v53 = vadd.f32 %v6096_v11, %v7392_v41 }
 0x2b4   :  { %v6290_v12 = vpack.c.bf16 %v2244_v21, %v2243_v14  ;;  %v2131_v8 = vmax.f32 %v2060_v9, %v2061_v60  ;;  %v2062_v16 = vadd.f32 %v1901_v59, %v1656_v10  ;;  %v1662_v10 = vadd.f32 %v6104_v26, %v7393_v58  ;;  %v7400_v58 = vld [vmem:[#allocation23_spill] sm:$0xff] }
 0x2b5   :  { %v1903_v55 = vpop.f32.mrf.mxu0 }
 0x2b6   :  { %v2063_v46 = vadd.f32 %v1903_v55, %v1657_v17  ;;  %2455 = vmatmul.mubr.bf16.gmra.mxu1 %v6290_v12  ;;  %3080 = vmatmul.mubr.bf16.gmra.mxu0 %v6290_v12  ;;  %v2186_v21 = vadd.f32 %v6049_v33, %v2131_v8  ;;  %v6318_v55 = vpop.f32.mrf.mxu1 }
 0x2b7   :  { %v1905_v27 = vpop.f32.mrf.mxu0  ;;  %2464 = vmatprep.mubr.bf16.mxu1 %v7185_v42  ;;  %3089 = vmatprep.mubr.bf16.mxu0 %v7185_v42 }
 0x2b8   :  { %v2132_v0 = vmax.f32 %v2062_v16, %v2063_v46  ;;  %v2064_v38 = vadd.f32 %v1905_v27, %v1658_v25  ;;  %v6326_v52 = vpop.f32.mrf.mxu1 }
 0x2b9   :  { %v1907_v36 = vpop.f32.mrf.mxu0 }
 0x2ba   :  { %v2187_v19 = vadd.f32 %v6049_v33, %v2132_v0  ;;  %v2065_v13 = vadd.f32 %v1907_v36, %v1659_v34  ;;  %v1664_v34 = vadd.f32 %v6132_v44, %v7395_v39  ;;  %v7396_v0 = vld [vmem:[#allocation20_spill] sm:$0xff]  ;;  %v7397_v44 = vld [vmem:[#allocation21_spill] sm:$0xff] }
 0x2bb   :  { %v1911_v15 = vpop.f32.mrf.mxu0  ;;  %v1665_v36 = vadd.f32 %v6146_v31, %v7396_v0  ;;  %v1666_v31 = vadd.f32 %v6160_v43, %v7397_v44  ;;  %v1669_v43 = vadd.f32 %v6202_v23, %v7400_v58 }
 0x2bc   :  { %v2221_v7 = vmax.f32 %v2185_v20, %v2187_v19  ;;  %v2133_v22 = vmax.f32 %v2064_v38, %v2065_v13  ;;  %v2066_v9 = vadd.f32 %v1911_v15, %v1660_v35  ;;  %v1667_v35 = vadd.f32 %v6174_v40, %v7398_v18 }
 0x2bd   :  { %v1913_v14 = vpop.f32.mrf.mxu0 }
 0x2be   :  { %v2188_v54 = vadd.f32 %v6049_v33, %v2133_v22  ;;  %v2067_v60 = vadd.f32 %v1913_v14, %v1661_v53  ;;  %v2245_v46 = vmax.f32 %v2221_v7, 0.0  ;;  %v6336_v53 = vpop.f32.mrf.mxu1 }
 0x2bf   :  { %v1915_v59 = vpop.f32.mrf.mxu0 }
 0x2c0   :  { %v2222_v17 = vmax.f32 %v2186_v21, %v2188_v54  ;;  %v2134_v11 = vmax.f32 %v2066_v9, %v2067_v60  ;;  %v2068_v30 = vadd.f32 %v1915_v59, %v1662_v10  ;;  %v7399_v60 = vld [vmem:[#allocation81_spill] sm:$0xff]  ;;  %v6344_v40 = vpop.f32.mrf.mxu1 }
 0x2c1   :  { %v1917_v16 = vpop.f32.mrf.mxu0  ;;  %v1668_v59 = vadd.f32 %v6188_v45, %v7399_v60 }
 0x2c2   :  { %v2246_v27 = vmax.f32 %v2222_v17, 0.0  ;;  %v2069_v8 = vadd.f32 %v1917_v16, %v1663_v37  ;;  %v2189_v22 = vadd.f32 %v6049_v33, %v2134_v11 }
 0x2c3   :  { %v1921_v25 = vpop.f32.mrf.mxu0 }
 0x2c4   :  { %v6324_v26 = vpack.c.bf16 %v2246_v27, %v2245_v46  ;;  %v2135_v20 = vmax.f32 %v2068_v30, %v2069_v8  ;;  %v2070_v38 = vadd.f32 %v1921_v25, %v1664_v34  ;;  %v7401_v30 = vld [vmem:[#allocation24_spill] sm:$0xff]  ;;  %v7402_v25 = vld [vmem:[#allocation25_spill] sm:$0xff]  ;;  %v6352_v34 = vpop.f32.mrf.mxu1 }
 0x2c5   :  { %v1923_v19 = vpop.f32.mrf.mxu0  ;;  %v1670_v8 = vadd.f32 %v6216_v47, %v7401_v30  ;;  %v1671_v45 = vadd.f32 %v6224_v4, %v7402_v25 }
 0x2c6   :  { %v2071_v13 = vadd.f32 %v1923_v19, %v1665_v36  ;;  %2465 = vmatmul.mubr.bf16.gmra.mxu1 %v6324_v26  ;;  %3090 = vmatmul.mubr.bf16.gmra.mxu0 %v6324_v26  ;;  %v2190_v17 = vadd.f32 %v6049_v33, %v2135_v20  ;;  %v6360_v4 = vpop.f32.mrf.mxu1 }
 0x2c7   :  { %v1925_v15 = vpop.f32.mrf.mxu0  ;;  %2474 = vmatprep.mubr.bf16.mxu1 %v7185_v42  ;;  %3099 = vmatprep.mubr.bf16.mxu0 %v7185_v42 }
 0x2c8   :  { %v2136_v41 = vmax.f32 %v2070_v38, %v2071_v13  ;;  %v2072_v21 = vadd.f32 %v1925_v15, %v1666_v31  ;;  %v7403_v15 = vld [vmem:[#allocation84_spill] sm:$0xff]  ;;  %v7404_v31 = vld [vmem:[#allocation26_spill] sm:$0xff]  ;;  %v6370_v60 = vpop.f32.mrf.mxu1 }
 0x2c9   :  { %v1927_v7 = vpop.f32.mrf.mxu0  ;;  %v1672_v44 = vadd.f32 %v6234_v56, %v7403_v15  ;;  %v1673_v18 = vadd.f32 %v6242_v51, %v7404_v31  ;;  %v7405_v56 = vld [vmem:[#allocation27_spill] sm:$0xff] }
 0x2ca   :  { %v2191_v14 = vadd.f32 %v6049_v33, %v2136_v41  ;;  %v2073_v54 = vadd.f32 %v1927_v7, %v1667_v35  ;;  %v1674_v51 = vadd.f32 %v6250_v57, %v7405_v56 }
 0x2cb   :  { %v1931_v9 = vpop.f32.mrf.mxu0 }
 0x2cc   :  { %v2223_v10 = vmax.f32 %v2189_v22, %v2191_v14  ;;  %v2137_v3 = vmax.f32 %v2072_v21, %v2073_v54  ;;  %v2074_v16 = vadd.f32 %v1931_v9, %v1668_v59  ;;  %v7406_v21 = vld [vmem:[#allocation28_spill] sm:$0xff] }
 0x2cd   :  { %v1933_v37 = vpop.f32.mrf.mxu0  ;;  %v1675_v54 = vadd.f32 %v6258_v5, %v7406_v21  ;;  %v6378_v5 = vpop.f32.mrf.mxu1 }
 0x2ce   :  { %v2192_v11 = vadd.f32 %v6049_v33, %v2137_v3  ;;  %v2075_v46 = vadd.f32 %v1933_v37, %v1669_v43  ;;  %v2247_v36 = vmax.f32 %v2223_v10, 0.0 }
 0x2cf   :  { %v1935_v27 = vpop.f32.mrf.mxu0 }
 0x2d0   :  { %v2224_v39 = vmax.f32 %v2190_v17, %v2192_v11  ;;  %v2138_v23 = vmax.f32 %v2074_v16, %v2075_v46  ;;  %v2076_v38 = vadd.f32 %v1935_v27, %v1670_v8  ;;  %v7407_v17 = vld [vmem:[#allocation85_spill] sm:$0xff] }
 0x2d1   :  { %v1937_v0 = vpop.f32.mrf.mxu0  ;;  %v1676_v11 = vadd.f32 %v6268_v48, %v7407_v17  ;;  %v7408_v16 = vld [vmem:[#allocation29_spill] sm:$0xff] }
 0x2d2   :  { %v2248_v19 = vmax.f32 %v2224_v39, 0.0  ;;  %v2077_v20 = vadd.f32 %v1937_v0, %v1671_v45  ;;  %v2193_v58 = vadd.f32 %v6049_v33, %v2138_v23  ;;  %v1677_v57 = vadd.f32 %v6276_v24, %v7408_v16  ;;  %v7409_v0 = vld [vmem:[#allocation30_spill] sm:$0xff] }
 0x2d3   :  { %v1941_v13 = vpop.f32.mrf.mxu0 }
 0x2d4   :  { %v6358_v47 = vpack.c.bf16 %v2248_v19, %v2247_v36  ;;  %v2139_v35 = vmax.f32 %v2076_v38, %v2077_v20  ;;  %v2078_v7 = vadd.f32 %v1941_v13, %v1672_v44  ;;  %v1678_v36 = vadd.f32 %v6284_v49, %v7409_v0  ;;  %v7410_v19 = vld [vmem:[#allocation31_spill] sm:$0xff]  ;;  %v6386_v20 = vpop.f32.mrf.mxu1 }
 0x2d5   :  { %v1943_v41 = vpop.f32.mrf.mxu0  ;;  %v1679_v48 = vadd.f32 %v6292_v29, %v7410_v19  ;;  %v4612_v19 = vld [vmem:[%s7136_s3 + $0x164] ss:$8 sps:$4 sm:$0xff]  }
 0x2d6   :  { %v2079_v22 = vadd.f32 %v1943_v41, %v1673_v18  ;;  %2475 = vmatmul.mubr.bf16.gmra.mxu1 %v6358_v47  ;;  %3100 = vmatmul.mubr.bf16.gmra.mxu0 %v6358_v47  ;;  %v2194_v8 = vadd.f32 %v6049_v33, %v2139_v35  ;;  %v7411_v41 = vld [vmem:[#allocation86_spill] sm:$0xff]  ;;  %v6394_v29 = vpop.f32.mrf.mxu1 }
 0x2d7   :  { %v1945_v14 = vpop.f32.mrf.mxu0  ;;  %2484 = vmatprep.mubr.bf16.mxu1 %v7185_v42  ;;  %3109 = vmatprep.mubr.bf16.mxu0 %v7185_v42 }
 0x2d8   :  { %v2140_v9 = vmax.f32 %v2078_v7, %v2079_v22  ;;  %v2080_v10 = vadd.f32 %v1945_v14, %v1674_v51  ;;  %v1680_v7 = vadd.f32 %v6302_v50, %v7411_v41  ;;  %v7412_v22 = vld [vmem:[#allocation88_spill] sm:$0xff]  ;;  %v7413_v50 = vld [vmem:[#allocation89_spill] sm:$0xff]  ;;  %v6406_v17 = vpop.f32.mrf.mxu1 }
 0x2d9   :  { %v1947_v59 = vpop.f32.mrf.mxu0  ;;  %v1681_v14 = vadd.f32 %v6310_v6, %v7412_v22  ;;  %v1682_v6 = vadd.f32 %v6318_v55, %v7413_v50  ;;  %v7423_v50 = vld [vmem:[#allocation39_spill] sm:$0xff] }
 0x2da   :  { %v2195_v43 = vadd.f32 %v6049_v33, %v2140_v9  ;;  %v2081_v3 = vadd.f32 %v1947_v59, %v1675_v54  ;;  %v7414_v59 = vld [vmem:[#allocation32_spill] sm:$0xff] }
 0x2db   :  { %v1951_v37 = vpop.f32.mrf.mxu0 }
 0x2dc   :  { %v2225_v46 = vmax.f32 %v2193_v58, %v2195_v43  ;;  %v2141_v27 = vmax.f32 %v2080_v10, %v2081_v3  ;;  %v2082_v45 = vadd.f32 %v1951_v37, %v1676_v11  ;;  %v1683_v58 = vadd.f32 %v6326_v52, %v7414_v59  ;;  %v7415_v10 = vld [vmem:[#allocation36_spill] sm:$0xff]  ;;  %v7416_v3 = vld [vmem:[#allocation37_spill] sm:$0xff] }
 0x2dd   :  { %v1953_v30 = vpop.f32.mrf.mxu0  ;;  %v856_v37 = vadd.f32 %v7416_v3, %v7415_v10  ;;  %v4607_v52 = vld [vmem:[%s7136_s3 + $0x170] ss:$8 sps:$4 sm:$0xff]  }
 0x2de   :  { %v2196_v25 = vadd.f32 %v6049_v33, %v2141_v27  ;;  %v2083_v39 = vadd.f32 %v1953_v30, %v1677_v57  ;;  %v2249_v15 = vmax.f32 %v2225_v46, 0.0  ;;  %v7417_v30 = vld [vmem:[#allocation33_spill] sm:$0xff]  ;;  %v7424_v59 = vld [vmem:[#allocation40_spill] sm:$0xff] }
 0x2df   :  { %v1955_v23 = vpop.f32.mrf.mxu0 }
 0x2e0   :  { %v2226_v38 = vmax.f32 %v2194_v8, %v2196_v25  ;;  %v2142_v24 = vmax.f32 %v2082_v45, %v2083_v39  ;;  %v2084_v31 = vadd.f32 %v1955_v23, %v1678_v36  ;;  %v1684_v8 = vadd.f32 %v6336_v53, %v7417_v30  ;;  %v7418_v25 = vld [vmem:[#allocation34_spill] sm:$0xff]  ;;  %v7419_v39 = vld [vmem:[#allocation93_spill] sm:$0xff] }
 0x2e1   :  { %v1957_v13 = vpop.f32.mrf.mxu0  ;;  %v1685_v45 = vadd.f32 %v6344_v40, %v7418_v25  ;;  %v1281_v23 = vadd.f32 %v7419_v39, %v856_v37  ;;  %v7426_v30 = vld [vmem:[#allocation41_spill] sm:$0xff]  ;;  %v7427_v25 = vld [vmem:[#allocation48_spill] sm:$0xff] }
 0x2e2   :  { %v2250_v44 = vmax.f32 %v2226_v38, 0.0  ;;  %v2085_v18 = vadd.f32 %v1957_v13, %v1679_v48  ;;  %v2197_v16 = vadd.f32 %v6049_v33, %v2142_v24  ;;  %v1587_v48 = vpop.f32.mrf.mxu1 }
 0x2e3   :  { %v1961_v35 = vpop.f32.mrf.mxu0 }
 0x2e4   :  { %v2143_v49 = vmax.f32 %v2084_v31, %v2085_v18  ;;  %v6392_v56 = vpack.c.bf16 %v2250_v44, %v2249_v15  ;;  %v2086_v21 = vadd.f32 %v1961_v35, %v1680_v7  ;;  %v4610_v44 = vld [vmem:[%s7136_s3 + $0x160] ss:$8 sps:$4 sm:$0xff]   ;;  %v1687_v35 = vadd.f32 %v6360_v4, %v1281_v23 }
 0x2e5   :  { %v1963_v51 = vpop.f32.mrf.mxu0  ;;  %v7420_v31 = vld [vmem:[#allocation35_spill] sm:$0xff] }
 0x2e6   :  { %v2087_v54 = vadd.f32 %v1963_v51, %v1681_v14  ;;  %2485 = vmatmul.mubr.bf16.gmra.mxu1 %v6392_v56  ;;  %3110 = vmatmul.mubr.bf16.gmra.mxu0 %v6392_v56  ;;  %v2198_v53 = vadd.f32 %v6049_v33, %v2143_v49  ;;  %v1686_v18 = vadd.f32 %v6352_v34, %v7420_v31  ;;  %v1589_v14 = vpop.f32.mrf.mxu1 }
 0x2e7   :  { %v1965_v9 = vpop.f32.mrf.mxu0  ;;  %2607 = vmatprep.mubr.bf16.mxu1 %v7185_v42  ;;  %3119 = vmatprep.mubr.bf16.mxu0 %v7185_v42  ;;  %v1688_v34 = vadd.f32 %v6370_v60, %v7423_v50 }
 0x2e8   :  { %v2144_v43 = vmax.f32 %v2086_v21, %v2087_v54  ;;  %v2088_v46 = vadd.f32 %v1965_v9, %v1682_v6  ;;  %v4613_v6 = vld [vmem:[%s7136_s3 + $0x150] ss:$8 sps:$4 sm:$0xff]   ;;  %v1591_v60 = vpop.f32.mrf.mxu1 }
 0x2e9   :  { %v1967_v11 = vpop.f32.mrf.mxu0 }
 0x2ea   :  { %v2199_v57 = vadd.f32 %v6049_v33, %v2144_v43  ;;  %v2089_v27 = vadd.f32 %v1967_v11, %v1683_v58  ;;  %v1689_v58 = vadd.f32 %v6378_v5, %v7424_v59  ;;  %v7425_v43 = vld [vmem:[#allocation95_spill] sm:$0xff]  ;;  %v1595_v23 = vpop.f32.mrf.mxu1 }
 0x2eb   :  { %v1971_v55 = vpop.f32.mrf.mxu0  ;;  %v4618_v11 = vld [vmem:[%s7136_s3 + $0x144] ss:$8 sps:$4 sm:$0xff]   ;;  %v4616_v5 = vld [vmem:[%s7136_s3 + $0x140] ss:$8 sps:$4 sm:$0xff]  }
 0x2ec   :  { %v2227_v0 = vmax.f32 %v2197_v16, %v2199_v57  ;;  %v2145_v36 = vmax.f32 %v2088_v46, %v2089_v27  ;;  %v2090_v13 = vadd.f32 %v1971_v55, %v1684_v8  ;;  %v1690_v8 = vadd.f32 %v6386_v20, %v7426_v30  ;;  %v7437_v30 = vld [vmem:[#allocation100_spill] sm:$0xff] }
 0x2ed   :  { %v1973_v38 = vpop.f32.mrf.mxu0 }
 0x2ee   :  { %v2200_v24 = vadd.f32 %v6049_v33, %v2145_v36  ;;  %v2091_v15 = vadd.f32 %v1973_v38, %v1685_v45  ;;  %2608 = vmatmul.mubr.bf16.vlgmr.msra.gmra.mxu1 %v2257_v1  ;;  %v7422_v1 = vld [vmem:[#allocation43_spill] sm:$0xff]  ;;  %v2251_v51 = vmax.f32 %v2227_v0, 0.0  ;;  %v7428_v45 = vld [vmem:[#allocation49_spill] sm:$0xff] }
 0x2ef   :  { %v1975_v40 = vpop.f32.mrf.mxu0  ;;  %2786 = vmatpush1.bf16.msra.mxu1 %v4607_v52  ;;  %2617 = vmatprep.mubr.bf16.mxu1 %v7185_v42  ;;  %v866_v22 = vadd.f32 %v7422_v1, %v7421_v62  ;;  %v876_v39 = vadd.f32 %v7428_v45, %v7427_v25 }
 0x2f0   :  { %v2228_v41 = vmax.f32 %v2198_v53, %v2200_v24  ;;  %v2146_v7 = vmax.f32 %v2090_v13, %v2091_v15  ;;  %2787 = vmatprep.subr.bf16.mxu1 %v4612_v19  ;;  %v2092_v54 = vadd.f32 %v1975_v40, %v1686_v18  ;;  %v4619_v13 = vld [vmem:[%s7136_s3 + $0x130] ss:$8 sps:$4 sm:$0xff]   ;;  %v7430_v15 = vld [vmem:[#allocation46_spill] sm:$0xff] }
 0x2f1   :  { %v1977_v49 = vpop.f32.mrf.mxu0  ;;  %v1285_v10 = vadd.f32 %v7425_v43, %v866_v22  ;;  %v1693_v40 = vadd.f32 %v1587_v48, %v7430_v15 }
 0x2f2   :  { %v2252_v21 = vmax.f32 %v2228_v41, 0.0  ;;  %v2093_v9 = vadd.f32 %v1977_v49, %v1687_v35  ;;  %v2201_v36 = vadd.f32 %v6049_v33, %v2146_v7  ;;  %v1597_v41 = vpop.f32.mrf.mxu1  ;;  %v4622_v49 = vld [vmem:[%s7136_s3 + $0x120] ss:$8 sps:$4 sm:$0xff]  }
 0x2f3   :  { %v1981_v4 = vpop.f32.mrf.mxu0  ;;  %2788 = vmatpush1.bf16.msra.mxu1 %v4610_v44  ;;  %v1691_v55 = vadd.f32 %v6394_v29, %v1285_v10  ;;  %v7429_v29 = vld [vmem:[#allocation45_spill] sm:$0xff] }
 0x2f4   :  { %v2147_v3 = vmax.f32 %v2092_v54, %v2093_v9  ;;  %v6446_v37 = vpack.c.bf16 %v2252_v21, %v2251_v51  ;;  %2789 = vmatprep.subr.bf16.mxu1 %v4615_v63  ;;  %v2094_v57 = vadd.f32 %v1981_v4, %v1688_v34  ;;  %v1692_v53 = vadd.f32 %v6406_v17, %v7429_v29  ;;  %v7431_v44 = vld [vmem:[#allocation97_spill] sm:$0xff]  ;;  %v4716_v17 = vld [vmem:[%s7137_s2] ss:$0 sm:$0xff]  ;;  %v7432_v51 = vld [vmem:[#allocation47_spill] sm:$0xff] }
 0x2f5   :  { %v1983_v16 = vpop.f32.mrf.mxu0  ;;  %v1289_v31 = vadd.f32 %v7431_v44, %v876_v39  ;;  %v1694_v21 = vadd.f32 %v1589_v14, %v7432_v51  ;;  %v4627_v34 = vld [vmem:[%s7136_s3 + $0x114] ss:$8 sps:$4 sm:$0xff]   ;;  %v4640_v51 = vld [vmem:[%s7136_s3 + $0x240] ss:$8 sps:$4 sm:$0xff]  }
 0x2f6   :  { %v2095_v46 = vadd.f32 %v1983_v16, %v1689_v58  ;;  %2618 = vmatmul.mubr.bf16.gmra.mxu1 %v6113_v32  ;;  %3120 = vmatmul.mubr.bf16.gmra.mxu0 %v6446_v37  ;;  %v4621_v32 = vld [vmem:[%s7136_s3 + $0x134] ss:$8 sps:$4 sm:$0xff]   ;;  %v2202_v63 = vadd.f32 %v4716_v17, %v2147_v3  ;;  %v1599_v58 = vpop.f32.mrf.mxu1 }
 0x2f7   :  { %v1985_v27 = vpop.f32.mrf.mxu0  ;;  %2627 = vmatprep.mubr.bf16.mxu1 %v7185_v42  ;;  %2790 = vmatpush1.bf16.msra.mxu1 %v4613_v6  ;;  %v1695_v54 = vadd.f32 %v1591_v60, %v1289_v31  ;;  %v7433_v4 = vld [vmem:[#allocation53_spill] sm:$0xff]  ;;  %v7434_v6 = vld [vmem:[#allocation54_spill] sm:$0xff] }
 0x2f8   :  { %v2148_v52 = vmax.f32 %v2094_v57, %v2095_v46  ;;  %3129 = vmatprep.mubr.bf16.mxu0 %v7185_v42  ;;  %2791 = vmatprep.subr.bf16.mxu1 %v4618_v11  ;;  %v2096_v20 = vadd.f32 %v1985_v27, %v1690_v8  ;;  %v886_v59 = vadd.f32 %v7434_v6, %v7433_v4  ;;  %v7435_v57 = vld [vmem:[#allocation50_spill] sm:$0xff]  ;;  %v4625_v60 = vld [vmem:[%s7136_s3 + $0x110] ss:$8 sps:$4 sm:$0xff]   ;;  %v7436_v27 = vld [vmem:[#allocation51_spill] sm:$0xff]  ;;  %v1601_v25 = vpop.f32.mrf.mxu1 }
 0x2f9   :  { %v1987_v0 = vpop.f32.mrf.mxu0  ;;  %v1696_v46 = vadd.f32 %v1595_v23, %v7435_v57  ;;  %v4654_v6 = vld [vmem:[%s7136_s3 + $0x204] ss:$8 sps:$4 sm:$0xff]  }
 0x2fa   :  { %v2203_v19 = vadd.f32 %v6049_v33, %v2148_v52  ;;  %v2097_v38 = vadd.f32 %v1987_v0, %v1691_v55  ;;  %v4624_v33 = vld [vmem:[%s7136_s3 + $0x124] ss:$8 sps:$4 sm:$0xff]   ;;  %v1293_v8 = vadd.f32 %v7437_v30, %v886_v59  ;;  %v4652_v59 = vld [vmem:[%s7136_s3 + $0x200] ss:$8 sps:$4 sm:$0xff]  }
 0x2fb   :  { %v1991_v24 = vpop.f32.mrf.mxu0  ;;  %2792 = vmatpush1.bf16.msra.mxu1 %v4616_v5  ;;  %v1697_v5 = vadd.f32 %v1597_v41, %v7436_v27 }
 0x2fc   :  { %v2229_v18 = vmax.f32 %v2201_v36, %v2203_v19  ;;  %v2149_v35 = vmax.f32 %v2096_v20, %v2097_v38  ;;  %2793 = vmatprep.subr.bf16.mxu1 %v4621_v32  ;;  %v2098_v1 = vadd.f32 %v1991_v24, %v1692_v53  ;;  %v4630_v32 = vld [vmem:[%s7136_s3 + $0x104] ss:$8 sps:$4 sm:$0xff]   ;;  %v4628_v36 = vld [vmem:[%s7136_s3 + $0x100] ss:$8 sps:$4 sm:$0xff]   ;;  %v7438_v19 = vld [vmem:[#allocation52_spill] sm:$0xff]  ;;  %v1699_v38 = vadd.f32 %v1601_v25, %v1293_v8 }
 0x2fd   :  { %v1993_v7 = vpop.f32.mrf.mxu0  ;;  %v1698_v20 = vadd.f32 %v1599_v58, %v7438_v19  ;;  %v4633_v53 = vld [vmem:[%s7136_s3 + $0x274] ss:$8 sps:$4 sm:$0xff]  }
 0x2fe   :  { %v2204_v62 = vadd.f32 %v4716_v17, %v2149_v35  ;;  %v2099_v22 = vadd.f32 %v1993_v7, %v1693_v40  ;;  %2628 = vmatmul.mubr.bf16.gmra.mxu1 %v6169_v61  ;;  %v2253_v10 = vmax.f32 %v2229_v18, 0.0  ;;  %v4656_v19 = vld [vmem:[%s7138_s5 + $0x38] sm:$0xff]  }
 0x2ff   :  { %v1995_v48 = vpop.f32.mrf.mxu0  ;;  %2637 = vmatprep.mubr.bf16.mxu1 %v7185_v42  ;;  %2794 = vmatpush1.bf16.msra.mxu1 %v4619_v13 }
 0x300   :  { %v2230_v9 = vmax.f32 %v2202_v63, %v2204_v62  ;;  %v2150_v50 = vmax.f32 %v2098_v1, %v2099_v22  ;;  %2795 = vmatprep.subr.bf16.mxu1 %v4624_v33  ;;  %v2100_v11 = vadd.f32 %v1995_v48, %v1694_v21  ;;  %v4636_v1 = vld [vmem:[%s7136_s3 + $0x264] ss:$8 sps:$4 sm:$0xff]   ;;  %v4634_v22 = vld [vmem:[%s7136_s3 + $0x260] ss:$8 sps:$4 sm:$0xff]   ;;  %v4639_v48 = vld [vmem:[%s7136_s3 + $0x254] ss:$8 sps:$4 sm:$0xff]  }
 0x301   :  { %v1997_v43 = vpop.f32.mrf.mxu0  ;;  %v4645_v21 = vld [vmem:[%s7136_s3 + $0x234] ss:$8 sps:$4 sm:$0xff]  }
 0x302   :  { %v2254_v3 = vmax.f32 %v2230_v9, 0.0  ;;  %v2101_v16 = vadd.f32 %v1997_v43, %v1695_v54  ;;  %v2205_v13 = vadd.f32 %v4716_v17, %v2150_v50  ;;  %v4643_v54 = vld [vmem:[%s7136_s3 + $0x230] ss:$8 sps:$4 sm:$0xff]   ;;  %v4646_v9 = vld [vmem:[%s7136_s3 + $0x220] ss:$8 sps:$4 sm:$0xff]  }
 0x303   :  { %v2001_v14 = vpop.f32.mrf.mxu0  ;;  %2796 = vmatpush1.bf16.msra.mxu1 %v4622_v49  ;;  %v4637_v49 = vld [vmem:[%s7136_s3 + $0x250] ss:$8 sps:$4 sm:$0xff]   ;;  %v4651_v50 = vld [vmem:[%s7136_s3 + $0x214] ss:$8 sps:$4 sm:$0xff]  }
 0x304   :  { %v2151_v55 = vmax.f32 %v2100_v11, %v2101_v16  ;;  %v6498_v52 = vpack.c.bf16 %v2254_v3, %v2253_v10  ;;  %2797 = vmatprep.subr.bf16.mxu1 %v4627_v34  ;;  %v2102_v39 = vadd.f32 %v2001_v14, %v1696_v46  ;;  %v4649_v34 = vld [vmem:[%s7136_s3 + $0x210] ss:$8 sps:$4 sm:$0xff]  }
 0x305   :  { %v2003_v45 = vpop.f32.mrf.mxu0 }
 0x306   :  { %v2103_v23 = vadd.f32 %v2003_v45, %v1697_v5  ;;  %2638 = vmatmul.mubr.bf16.gmra.mxu1 %v6222_v28  ;;  %3130 = vmatmul.mubr.bf16.gmra.mxu0 %v6498_v52  ;;  %v2206_v35 = vadd.f32 %v4716_v17, %v2151_v55 }
 0x307   :  { %v2005_v0 = vpop.f32.mrf.mxu0  ;;  %2647 = vmatprep.mubr.bf16.mxu1 %v7185_v42  ;;  %2798 = vmatpush1.bf16.msra.mxu1 %v4625_v60 }
 0x308   :  { %v2152_v29 = vmax.f32 %v2102_v39, %v2103_v23  ;;  %2799 = vmatprep.subr.bf16.mxu1 %v4630_v32  ;;  %v2104_v40 = vadd.f32 %v2005_v0, %v1698_v20  ;;  %v7146_v0 = vmov 0.0   ;;  %v4657_v20 = vld [vmem:[%s7138_s5 + $0x70] sm:$0xff]  }
 0x309   :  { %v2007_v24 = vpop.f32.mrf.mxu0  ;;  %4394 = vmatprep.subr.bf16.mxu0 %v7146_v0  ;;  %4410 = vmatprep.mubr.msk.bf16.mxu0 %vm4719_vm2, %v7146_v0 }
 0x30a   :  { %v2207_v15 = vadd.f32 %v4716_v17, %v2152_v29  ;;  %v2105_v44 = vadd.f32 %v2007_v24, %v1699_v38  ;;  %v4659_v24 = vld [vmem:[%s7138_s5 + $0x68] sm:$0xff]  }
 0x30b   :  { %2800 = vmatpush1.bf16.msra.mxu1 %v4628_v36 }
 0x30c   :  { %v2231_v31 = vmax.f32 %v2205_v13, %v2207_v15  ;;  %v2153_v18 = vmax.f32 %v2104_v40, %v2105_v44  ;;  %3269 = vmatprep.subr.bf16.mxu1 %v4633_v53  ;;  %v4660_v15 = vld [vmem:[%s7138_s5 + $0x28] sm:$0xff]  }
 0x30e   :  { %v2208_v33 = vadd.f32 %v4716_v17, %v2153_v18  ;;  %2648 = vmatmul.mubr.bf16.gmra.mxu1 %v6256_v2  ;;  %v6515_v7 = vmax.f32 %v2231_v31, 0.0  ;;  %v4631_v17 = vld [vmem:[%s7136_s3 + $0x270] ss:$8 sps:$4 sm:$0xff]  }
 0x30f   :  { %2657 = vmatprep.mubr.bf16.mxu1 %v7185_v42 }
 0x310   :  { %v2232_v41 = vmax.f32 %v2206_v35, %v2208_v33  ;;  %v4662_v35 = vld [vmem:[%s7138_s5 + $0x20] sm:$0xff]  }
 0x311   :  { %v4661_v33 = vld [vmem:[%s7138_s5 + $0x60] sm:$0xff]  }
 0x312   :  { %v6517_v63 = vmax.f32 %v2232_v41, 0.0 }
 0x314   :  { %v2268_v62 = vpack.c.bf16 %v6517_v63, %v6515_v7  ;;  %v4664_v63 = vld [vmem:[%s7138_s5 + $0x18] sm:$0xff]  }
 0x316   :  { %2658 = vmatmul.mubr.bf16.gmra.mxu1 %v6290_v12 }
 0x317   :  { %2667 = vmatprep.mubr.bf16.mxu1 %v7185_v42 }
 0x31e   :  { %2668 = vmatmul.mubr.bf16.gmra.mxu1 %v6324_v26 }
 0x31f   :  { %2677 = vmatprep.mubr.bf16.mxu1 %v7185_v42 }
 0x326   :  { %2678 = vmatmul.mubr.bf16.gmra.mxu1 %v6358_v47 }
 0x327   :  { %2817 = vmatprep.mubr.bf16.mxu1 %v7185_v42 }
 0x32e   :  { %2818 = vmatmul.mubr.bf16.vlgmr.msra.gmra.mxu1 %v6169_v61  ;;  %v4642_v61 = vld [vmem:[%s7136_s3 + $0x244] ss:$8 sps:$4 sm:$0xff]  }
 0x32f   :  { %3270 = vmatpush1.bf16.msra.mxu1 %v4631_v17  ;;  %2827 = vmatprep.mubr.bf16.mxu1 %v7185_v42 }
 0x330   :  { %3271 = vmatprep.subr.bf16.mxu1 %v4636_v1  ;;  %v4665_v1 = vld [vmem:[%s7138_s5 + $0x10] sm:$0xff]  }
 0x333   :  { %3272 = vmatpush1.bf16.msra.mxu1 %v4634_v22 }
 0x334   :  { %3273 = vmatprep.subr.bf16.mxu1 %v4639_v48 }
 0x336   :  { %2828 = vmatmul.mubr.bf16.gmra.mxu1 %v6222_v28  ;;  %v4648_v28 = vld [vmem:[%s7136_s3 + $0x224] ss:$8 sps:$4 sm:$0xff]   ;;  %v6572_v4 = vpop.f32.mrf.mxu1 }
 0x337   :  { %2837 = vmatprep.mubr.bf16.mxu1 %v7185_v42  ;;  %3274 = vmatpush1.bf16.msra.mxu1 %v4637_v49  ;;  %v4667_v49 = vld [vmem:[%s7138_s5 + $0x8] sm:$0xff]  }
 0x338   :  { %3275 = vmatprep.subr.bf16.mxu1 %v4642_v61  ;;  %v6582_v58 = vpop.f32.mrf.mxu1  ;;  %v4663_v61 = vld [vmem:[%s7138_s5 + $0x58] sm:$0xff]  }
 0x33a   :  { %v6584_v43 = vpop.f32.mrf.mxu1 }
 0x33b   :  { %3276 = vmatpush1.bf16.msra.mxu1 %v4640_v51 }
 0x33c   :  { %3277 = vmatprep.subr.bf16.mxu1 %v4645_v21  ;;  %v6588_v10 = vpop.f32.mrf.mxu1 }
 0x33e   :  { %2838 = vmatmul.mubr.bf16.gmra.mxu1 %v6256_v2 }
 0x33f   :  { %2847 = vmatprep.mubr.bf16.mxu1 %v7185_v42  ;;  %3278 = vmatpush1.bf16.msra.mxu1 %v4643_v54  ;;  %v4668_v54 = vld [vmem:[%s7138_s5] sm:$0xff]  }
 0x340   :  { %3279 = vmatprep.subr.bf16.mxu1 %v4648_v28 }
 0x343   :  { %3280 = vmatpush1.bf16.msra.mxu1 %v4646_v9  ;;  %v4666_v9 = vld [vmem:[%s7138_s5 + $0x50] sm:$0xff]  }
 0x344   :  { %3281 = vmatprep.subr.bf16.mxu1 %v4651_v50 }
 0x346   :  { %2848 = vmatmul.mubr.bf16.gmra.mxu1 %v6290_v12  ;;  %v6590_v3 = vpop.f32.mrf.mxu1 }
 0x347   :  { %2857 = vmatprep.mubr.bf16.mxu1 %v7185_v42  ;;  %3282 = vmatpush1.bf16.msra.mxu1 %v4649_v34 }
 0x348   :  { %3283 = vmatprep.subr.bf16.mxu1 %v4654_v6  ;;  %v6592_v11 = vpop.f32.mrf.mxu1 }
 0x34a   :  { %v6596_v16 = vpop.f32.mrf.mxu1 }
 0x34b   :  { %3284 = vmatpush1.bf16.msra.mxu1 %v4652_v59 }
 0x34c   :  { %v6598_v57 = vpop.f32.mrf.mxu1  ;;  %4414 = vmatprep.subr.bf16.mxu1 %v7146_v0 }
 0x34d   :  { %7439 = vst [vmem:[#allocation55_spill] sm:$0xff] %v6598_v57 }
 0x34e   :  { %2858 = vmatmul.mubr.bf16.gmra.mxu1 %v6324_v26 }
 0x34f   :  { %2867 = vmatprep.mubr.bf16.mxu1 %v7185_v42 }
 0x356   :  { %2868 = vmatmul.mubr.bf16.gmra.mxu1 %v6358_v47  ;;  %v6602_v46 = vpop.f32.mrf.mxu1 }
 0x357   :  { %2877 = vmatprep.mubr.bf16.mxu1 %v7185_v42 }
 0x358   :  { %v6604_v14 = vpop.f32.mrf.mxu1 }
 0x35a   :  { %v6608_v60 = vpop.f32.mrf.mxu1 }
 0x35c   :  { %v6610_v27 = vpop.f32.mrf.mxu1 }
 0x35e   :  { %2878 = vmatmul.mubr.bf16.gmra.mxu1 %v6392_v56 }
 0x35f   :  { %2887 = vmatprep.mubr.bf16.mxu1 %v7185_v42 }
 0x366   :  { %2888 = vmatmul.mubr.bf16.gmra.mxu1 %v6446_v37  ;;  %v6612_v5 = vpop.f32.mrf.mxu1 }
 0x367   :  { %3301 = vmatprep.mubr.bf16.mxu1 %v7185_v42 }
 0x368   :  { %v6616_v30 = vpop.f32.mrf.mxu1 }
 0x36a   :  { %v6618_v8 = vpop.f32.mrf.mxu1 }
 0x36b   :  { %7440 = vst [vmem:[#allocation56_spill] sm:$0xff] %v6618_v8 }
 0x36c   :  { %v6622_v55 = vpop.f32.mrf.mxu1 }
 0x36d   :  { %7441 = vst [vmem:[#allocation57_spill] sm:$0xff] %v6622_v55 }
 0x36e   :  { %3302 = vmatmul.mubr.bf16.vlgmr.msra.gmra.mxu1 %v6256_v2 }
 0x36f   :  { %3311 = vmatprep.mubr.bf16.mxu1 %v7185_v42  ;;  %4415 = vmatpush3.bf16.msra.mxu1 %v4656_v19 }
 0x370   :  { %4416 = vmatprep.subr.bf16.mxu1 %v7146_v0 }
 0x376   :  { %3312 = vmatmul.mubr.bf16.gmra.mxu1 %v6290_v12  ;;  %v6624_v32 = vpop.f32.mrf.mxu1 }
 0x377   :  { %3321 = vmatprep.mubr.bf16.mxu1 %v7185_v42 }
 0x378   :  { %v6628_v25 = vpop.f32.mrf.mxu1 }
 0x37a   :  { %v6630_v2 = vpop.f32.mrf.mxu1 }
 0x37c   :  { %v6634_v45 = vpop.f32.mrf.mxu1 }
 0x37e   :  { %3322 = vmatmul.mubr.bf16.gmra.mxu1 %v6324_v26 }
 0x37f   :  { %3331 = vmatprep.mubr.bf16.mxu1 %v7185_v42 }
 0x386   :  { %3332 = vmatmul.mubr.bf16.gmra.mxu1 %v6358_v47  ;;  %v6636_v12 = vpop.f32.mrf.mxu1 }
 0x387   :  { %3341 = vmatprep.mubr.bf16.mxu1 %v7185_v42 }
 0x388   :  { %v6638_v39 = vpop.f32.mrf.mxu1 }
 0x38a   :  { %v6642_v26 = vpop.f32.mrf.mxu1 }
 0x38c   :  { %v6644_v23 = vpop.f32.mrf.mxu1 }
 0x38e   :  { %3342 = vmatmul.mubr.bf16.gmra.mxu1 %v6392_v56  ;;  %v4655_v56 = vld [vmem:[%s7138_s5 + $0x78] sm:$0xff]  }
 0x38f   :  { %3351 = vmatprep.mubr.bf16.mxu1 %v7185_v42  ;;  %4395 = vmatpush3.bf16.msra.mxu0 %v4655_v56  ;;  %v4669_v56 = vld [vmem:[%s7138_s5 + $0x48] sm:$0xff]  }
 0x390   :  { %4396 = vmatprep.subr.bf16.mxu0 %v7146_v0 }
 0x393   :  { %4397 = vmatpush3.bf16.msra.mxu0 %v4657_v20 }
 0x394   :  { %4398 = vmatprep.subr.bf16.mxu0 %v7146_v0 }
 0x396   :  { %3352 = vmatmul.mubr.bf16.gmra.mxu1 %v6446_v37  ;;  %v6648_v47 = vpop.f32.mrf.mxu1 }
 0x397   :  { %3361 = vmatprep.mubr.bf16.mxu1 %v7185_v42  ;;  %4399 = vmatpush3.bf16.msra.mxu0 %v4659_v24 }
 0x398   :  { %v6652_v36 = vpop.f32.mrf.mxu1  ;;  %4400 = vmatprep.subr.bf16.mxu0 %v7146_v0 }
 0x39a   :  { %v6662_v37 = vpop.f32.mrf.mxu1 }
 0x39b   :  { %4401 = vmatpush3.bf16.msra.mxu0 %v4661_v33 }
 0x39c   :  { %v6669_v38 = vpop.f32.mrf.mxu1  ;;  %4402 = vmatprep.subr.bf16.mxu0 %v7146_v0 }
 0x39e   :  { %3362 = vmatmul.mubr.bf16.gmra.mxu1 %v6498_v52  ;;  %v4658_v52 = vld [vmem:[%s7138_s5 + $0x30] sm:$0xff]  }
 0x39f   :  { %3371 = vmatprep.mubr.bf16.mxu1 %v7185_v42  ;;  %4417 = vmatpush3.bf16.msra.mxu1 %v4658_v52  ;;  %v4670_v52 = vld [vmem:[%s7138_s5 + $0x40] sm:$0xff]  }
 0x3a0   :  { %4418 = vmatprep.subr.bf16.mxu1 %v7146_v0  ;;  %4403 = vmatpush3.bf16.msra.mxu0 %v4663_v61 }
 0x3a1   :  { %4404 = vmatprep.subr.bf16.mxu0 %v7146_v0 }
 0x3a3   :  { %4419 = vmatpush3.bf16.msra.mxu1 %v4660_v15 }
 0x3a4   :  { %4420 = vmatprep.subr.bf16.mxu1 %v7146_v0  ;;  %4405 = vmatpush3.bf16.msra.mxu0 %v4666_v9 }
 0x3a5   :  { %4406 = vmatprep.subr.bf16.mxu0 %v7146_v0 }
 0x3a6   :  { %v6674_v29 = vpop.f32.mrf.mxu1  ;;  %3372 = vmatmul.mubr.bf16.gmra.mxu1 %v2268_v62 }
 0x3a7   :  { %4421 = vmatpush3.bf16.msra.mxu1 %v4662_v35  ;;  %4430 = vmatprep.mubr.msk.bf16.mxu1 %vm4719_vm2, %v7146_v0 }
 0x3a8   :  { %v6680_v42 = vpop.f32.mrf.mxu1  ;;  %4422 = vmatprep.subr.bf16.mxu1 %v7146_v0  ;;  %4407 = vmatpush3.bf16.msra.mxu0 %v4669_v56 }
 0x3a9   :  { %4408 = vmatprep.subr.bf16.mxu0 %v7146_v0 }
 0x3aa   :  { %v6683_v53 = vpop.f32.mrf.mxu1 }
 0x3ab   :  { %4423 = vmatpush3.bf16.msra.mxu1 %v4664_v63 }
 0x3ac   :  { %v6688_v13 = vpop.f32.mrf.mxu1  ;;  %4424 = vmatprep.subr.bf16.mxu1 %v7146_v0  ;;  %4409 = vmatpush3.bf16.msra.mxu0 %v4670_v52 }
 0x3ad   :  { %4434 = vmatprep.subr.bf16.mxu0 %v7146_v0 }
 0x3ae   :  { %v6693_v40 = vpop.f32.mrf.mxu1 }
 0x3af   :  { %4425 = vmatpush3.bf16.msra.mxu1 %v4665_v1 }
 0x3b0   :  { %v6696_v44 = vpop.f32.mrf.mxu1  ;;  %4426 = vmatprep.subr.bf16.mxu1 %v7146_v0 }
 0x3b2   :  { %v6699_v31 = vpop.f32.mrf.mxu1 }
 0x3b3   :  { %4427 = vmatpush3.bf16.msra.mxu1 %v4667_v49 }
 0x3b4   :  { %v6701_v18 = vpop.f32.mrf.mxu1  ;;  %4428 = vmatprep.subr.bf16.mxu1 %v7146_v0 }
 0x3b6   :  { %v6709_v41 = vpop.f32.mrf.mxu1 }
 0x3b7   :  { %4429 = vmatpush3.bf16.msra.mxu1 %v4668_v54 }
 0x3b8   :  { %v6712_v7 = vpop.f32.mrf.mxu1  ;;  %4454 = vmatprep.subr.bf16.mxu1 %v7146_v0 }
 0x3ba   :  { %v6718_v62 = vpop.f32.mrf.mxu1 }
 0x3bc   :  { %v6721_v17 = vpop.f32.mrf.mxu1 }
 0x3bd   :  { %7442 = vst [vmem:[#allocation58_spill] sm:$0xff] %v6721_v17  ;;  %v2610_v17 = vadd.f32 %v6693_v40, %v6572_v4 }
 0x3be   :  { %v6726_v22 = vpop.f32.mrf.mxu1 }
 0x3c0   :  { %v6729_v48 = vpop.f32.mrf.mxu1 }
 0x3c2   :  { %v6737_v51 = vpop.f32.mrf.mxu1 }
 0x3c4   :  { %v6740_v21 = vpop.f32.mrf.mxu1 }
 0x3c6   :  { %v6746_v28 = vpop.f32.mrf.mxu1 }
 0x3c8   :  { %v6752_v50 = vpop.f32.mrf.mxu1 }
 0x3ca   :  { %v6758_v34 = vpop.f32.mrf.mxu1 }
 0x3cb   :  { %7443 = vst [vmem:[#allocation73_spill] sm:$0xff] %v6758_v34 }
 0x3cc   :  { %v6761_v6 = vpop.f32.mrf.mxu1 }
 0x3cd   :  { %7444 = vst [vmem:[#allocation59_spill] sm:$0xff] %v6761_v6 }
 0x3ce   :  { %v6763_v59 = vpop.f32.mrf.mxu1 }
 0x3d0   :  { %v6768_v19 = vpop.f32.mrf.mxu1 }
 0x3d2   :  { %v6770_v20 = vpop.f32.mrf.mxu1 }
 0x3d4   :  { %v6776_v24 = vpop.f32.mrf.mxu1 }
 0x3d6   :  { %v6778_v15 = vpop.f32.mrf.mxu1 }
 0x3d8   :  { %v6781_v35 = vpop.f32.mrf.mxu1 }
 0x3da   :  { %v6783_v33 = vpop.f32.mrf.mxu1 }
 0x3dc   :  { %v6785_v63 = vpop.f32.mrf.mxu1 }
 0x3de   :  { %v6787_v1 = vpop.f32.mrf.mxu1 }
 0x3e0   :  { %v6789_v49 = vpop.f32.mrf.mxu1 }
 0x3e2   :  { %v6791_v61 = vpop.f32.mrf.mxu1 }
 0x3e4   :  { %v2675_v54 = vpop.f32.mrf.mxu1 }
 0x3e5   :  { %v6794_v9 = vadd.f32 %v2675_v54, %v6669_v38 }
 0x3e6   :  { %v2679_v56 = vpop.f32.mrf.mxu1 }
 0x3e7   :  { %v6797_v52 = vadd.f32 %v2679_v56, %v6674_v29  ;;  %v2612_v29 = vadd.f32 %v6696_v44, %v6582_v58  ;;  %v2622_v44 = vadd.f32 %v6712_v7, %v6592_v11 }
 0x3e8   :  { %v2681_v0 = vpop.f32.mrf.mxu1 }
 0x3e9   :  { %v6800_v6 = vadd.f32 %v2681_v0, %v6680_v42  ;;  %v2614_v0 = vadd.f32 %v6699_v31, %v6584_v43 }
 0x3ea   :  { %v2683_v55 = vpop.f32.mrf.mxu1 }
 0x3eb   :  { %v6803_v34 = vadd.f32 %v2683_v55, %v6683_v53  ;;  %v2616_v53 = vadd.f32 %v6701_v18, %v6588_v10  ;;  %v6834_v10 = vpop.f32.mrf.mxu0 }
 0x3ec   :  { %v2685_v8 = vpop.f32.mrf.mxu1 }
 0x3ed   :  { %v6808_v57 = vadd.f32 %v2685_v8, %v6688_v13  ;;  %v2620_v13 = vadd.f32 %v6709_v41, %v6590_v3  ;;  %v2630_v3 = vadd.f32 %v6726_v22, %v6602_v46  ;;  %v6844_v11 = vpop.f32.mrf.mxu0 }
 0x3ee   :  { %v2819_v38 = vpop.f32.mrf.mxu1 }
 0x3ef   :  { %v6812_v54 = vadd.f32 %v2819_v38, %v2610_v17  ;;  %v6854_v46 = vpop.f32.mrf.mxu0 }
 0x3f0   :  { %v2821_v56 = vpop.f32.mrf.mxu1 }
 0x3f1   :  { %v6816_v42 = vadd.f32 %v2821_v56, %v2612_v29  ;;  %v2632_v29 = vadd.f32 %v6729_v48, %v6604_v14  ;;  %v2640_v14 = vadd.f32 %v6746_v28, %v6612_v5  ;;  %v2650_v5 = vadd.f32 %v6763_v59, %v6624_v32 }
 0x3f2   :  { %v2823_v55 = vpop.f32.mrf.mxu1  ;;  %v2656_v32 = vadd.f32 %v6776_v24, %v6634_v45  ;;  %v2664_v45 = vadd.f32 %v6783_v33, %v6642_v26  ;;  %v2672_v26 = vadd.f32 %v6789_v49, %v6652_v36 }
 0x3f3   :  { %v6820_v4 = vadd.f32 %v2823_v55, %v2614_v0  ;;  %v2634_v0 = vadd.f32 %v6737_v51, %v6608_v60  ;;  %v2642_v60 = vadd.f32 %v6752_v50, %v6616_v30  ;;  %v2652_v30 = vadd.f32 %v6768_v19, %v6628_v25 }
 0x3f4   :  { %v2825_v8 = vpop.f32.mrf.mxu1  ;;  %v2660_v25 = vadd.f32 %v6778_v15, %v6636_v12  ;;  %v2666_v12 = vadd.f32 %v6785_v63, %v6644_v23  ;;  %v2674_v23 = vadd.f32 %v6791_v61, %v6662_v37 }
 0x3f5   :  { %v6824_v40 = vadd.f32 %v2825_v8, %v2616_v53  ;;  %v2636_v8 = vadd.f32 %v6740_v21, %v6610_v27 }
 0x3f6   :  { %v2829_v58 = vpop.f32.mrf.mxu1 }
 0x3f7   :  { %v6828_v17 = vadd.f32 %v2829_v58, %v2620_v13 }
 0x3f8   :  { %v2831_v43 = vpop.f32.mrf.mxu1 }
 0x3f9   :  { %v6830_v31 = vadd.f32 %v2831_v43, %v2622_v44  ;;  %v6864_v44 = vpop.f32.mrf.mxu0 }
 0x3fa   :  { %v6832_v38 = vpop.f32.mrf.mxu1 }
 0x3fb   :  { %v6868_v21 = vpop.f32.mrf.mxu0 }
 0x3fc   :  { %v6836_v18 = vpop.f32.mrf.mxu1 }
 0x3fd   :  { %v6876_v28 = vpop.f32.mrf.mxu0 }
 0x3fe   :  { %v2839_v41 = vpop.f32.mrf.mxu1 }
 0x3ff   :  { %v6842_v56 = vadd.f32 %v2839_v41, %v2630_v3 }
 0x400   :  { %v2841_v7 = vpop.f32.mrf.mxu1 }
 0x401   :  { %v6848_v55 = vadd.f32 %v2841_v7, %v2632_v29 }
 0x402   :  { %v2843_v53 = vpop.f32.mrf.mxu1 }
 0x403   :  { %v6852_v13 = vadd.f32 %v2843_v53, %v2634_v0  ;;  %v2654_v0 = vadd.f32 %v6770_v20, %v6630_v2  ;;  %v2662_v2 = vadd.f32 %v6781_v35, %v6638_v39  ;;  %v2670_v39 = vadd.f32 %v6787_v1, %v6648_v47 }
 0x404   :  { %v2845_v22 = vpop.f32.mrf.mxu1 }
 0x405   :  { %v6858_v48 = vadd.f32 %v2845_v22, %v2636_v8  ;;  %v6886_v8 = vpop.f32.mrf.mxu0 }
 0x406   :  { %v2849_v58 = vpop.f32.mrf.mxu1 }
 0x407   :  { %v6862_v51 = vadd.f32 %v2849_v58, %v2640_v14  ;;  %v6896_v58 = vpop.f32.mrf.mxu0 }
 0x408   :  { %v2851_v43 = vpop.f32.mrf.mxu1 }
 0x409   :  { %v6866_v27 = vadd.f32 %v2851_v43, %v2642_v60  ;;  %v6902_v43 = vpop.f32.mrf.mxu0 }
 0x40a   :  { %v6870_v3 = vpop.f32.mrf.mxu1 }
 0x40c   :  { %v6872_v41 = vpop.f32.mrf.mxu1 }
 0x40e   :  { %v2859_v29 = vpop.f32.mrf.mxu1 }
 0x40f   :  { %v6880_v50 = vadd.f32 %v2859_v29, %v2650_v5 }
 0x410   :  { %v2861_v7 = vpop.f32.mrf.mxu1 }
 0x411   :  { %v6884_v53 = vadd.f32 %v2861_v7, %v2652_v30  ;;  %v6912_v30 = vpop.f32.mrf.mxu0 }
 0x412   :  { %v2863_v22 = vpop.f32.mrf.mxu1 }
 0x413   :  { %v6890_v59 = vadd.f32 %v2863_v22, %v2654_v0  ;;  %v6922_v22 = vpop.f32.mrf.mxu0 }
 0x414   :  { %v2865_v14 = vpop.f32.mrf.mxu1 }
 0x415   :  { %v6894_v19 = vadd.f32 %v2865_v14, %v2656_v32  ;;  %v6930_v47 = vpop.f32.mrf.mxu0 }
 0x416   :  { %v2869_v60 = vpop.f32.mrf.mxu1 }
 0x417   :  { %v6900_v20 = vadd.f32 %v2869_v60, %v2660_v25  ;;  %v6935_v36 = vpop.f32.mrf.mxu0 }
 0x418   :  { %v2871_v5 = vpop.f32.mrf.mxu1 }
 0x419   :  { %v6906_v24 = vadd.f32 %v2871_v5, %v2662_v2  ;;  %v6943_v61 = vpop.f32.mrf.mxu0 }
 0x41a   :  { %v2873_v29 = vpop.f32.mrf.mxu1 }
 0x41b   :  { %v6910_v15 = vadd.f32 %v2873_v29, %v2664_v45 }
 0x41c   :  { %v2875_v7 = vpop.f32.mrf.mxu1 }
 0x41d   :  { %v6916_v35 = vadd.f32 %v2875_v7, %v2666_v12  ;;  %v6949_v12 = vpop.f32.mrf.mxu0  ;;  %v3140_v7 = vadd.f32 %v6834_v10, %v6812_v54  ;;  %v2624_v54 = vadd.f32 %v6718_v62, %v6596_v16  ;;  %v7446_v10 = vld [vmem:[#allocation58_spill] sm:$0xff] }
 0x41e   :  { %v2879_v0 = vpop.f32.mrf.mxu1 }
 0x41f   :  { %v6920_v33 = vadd.f32 %v2879_v0, %v2670_v39 }
 0x420   :  { %v2881_v32 = vpop.f32.mrf.mxu1 }
 0x421   :  { %v6926_v63 = vadd.f32 %v2881_v32, %v2672_v26 }
 0x422   :  { %v2883_v14 = vpop.f32.mrf.mxu1 }
 0x423   :  { %v6928_v25 = vadd.f32 %v2883_v14, %v2674_v23  ;;  %v3142_v14 = vadd.f32 %v6854_v46, %v6820_v4  ;;  %v2904_v4 = vadd.f32 %v6832_v38, %v2624_v54 }
 0x424   :  { %v2885_v1 = vpop.f32.mrf.mxu1 }
 0x425   :  { %v6933_v60 = vadd.f32 %v2885_v1, %v6794_v9  ;;  %v3143_v1 = vadd.f32 %v6864_v44, %v6824_v40  ;;  %v3145_v44 = vadd.f32 %v6876_v28, %v6830_v31  ;;  %v3146_v38 = vadd.f32 %v6886_v8, %v2904_v4 }
 0x426   :  { %v2889_v49 = vpop.f32.mrf.mxu1  ;;  %v3149_v8 = vadd.f32 %v6912_v30, %v6848_v55  ;;  %v3151_v55 = vadd.f32 %v6930_v47, %v6858_v48  ;;  %v7448_v30 = vld [vmem:[#allocation73_spill] sm:$0xff] }
 0x427   :  { %v6938_v2 = vadd.f32 %v2889_v49, %v6797_v52  ;;  %v3141_v52 = vadd.f32 %v6844_v11, %v6816_v42  ;;  %v7445_v42 = vld [vmem:[#allocation55_spill] sm:$0xff]  ;;  %v4672_v48 = vld [vmem:[%s7138_s5 + $0xf8] sm:$0xff]  }
 0x428   :  { %v2891_v5 = vpop.f32.mrf.mxu1  ;;  %v2626_v11 = vadd.f32 %v7446_v10, %v7445_v42 }
 0x429   :  { %v6941_v37 = vadd.f32 %v2891_v5, %v6800_v6  ;;  %v6955_v6 = vpop.f32.mrf.mxu0 }
 0x42a   :  { %v6945_v45 = vpop.f32.mrf.mxu1  ;;  %v2905_v46 = vadd.f32 %v6836_v18, %v2626_v11 }
 0x42b   :  { %v6961_v49 = vpop.f32.mrf.mxu0 }
 0x42c   :  { %v6947_v29 = vpop.f32.mrf.mxu1  ;;  %v3147_v18 = vadd.f32 %v6896_v58, %v2905_v46 }
 0x42e   :  { %v3303_v9 = vpop.f32.mrf.mxu1 }
 0x42f   :  { %v3382_v0 = vadd.f32 %v3303_v9, %v3140_v7 }
 0x430   :  { %v3305_v39 = vpop.f32.mrf.mxu1 }
 0x431   :  { %v3383_v26 = vadd.f32 %v3305_v39, %v3141_v52  ;;  %v3144_v52 = vadd.f32 %v6868_v21, %v6828_v17 }
 0x432   :  { %v3307_v32 = vpop.f32.mrf.mxu1 }
 0x433   :  { %v3414_v23 = vmax.f32 %v3382_v0, %v3383_v26  ;;  %v3384_v9 = vadd.f32 %v3307_v32, %v3142_v14  ;;  %v6973_v0 = vpop.f32.mrf.mxu0  ;;  %v6978_v32 = vld [vmem:[%s7139_s4] ss:$0 sm:$0xff] }
 0x434   :  { %v3309_v5 = vpop.f32.mrf.mxu1 }
 0x435   :  { %v3385_v7 = vadd.f32 %v3309_v5, %v3143_v1  ;;  %v6982_v14 = vpop.f32.mrf.mxu0  ;;  %v3437_v31 = vadd.f32 %v6978_v32, %v3414_v23 }
 0x436   :  { %v3313_v39 = vpop.f32.mrf.mxu1 }
 0x437   :  { %v3415_v40 = vmax.f32 %v3384_v9, %v3385_v7  ;;  %v3386_v62 = vadd.f32 %v3313_v39, %v3144_v52  ;;  %v3148_v9 = vadd.f32 %v6902_v43, %v6842_v56  ;;  %v6990_v7 = vpop.f32.mrf.mxu0  ;;  %v3150_v56 = vadd.f32 %v6922_v22, %v6852_v13  ;;  %v7447_v43 = vld [vmem:[#allocation56_spill] sm:$0xff] }
 0x438   :  { %v3315_v16 = vpop.f32.mrf.mxu1  ;;  %v3152_v13 = vadd.f32 %v6935_v36, %v6862_v51  ;;  %v4674_v51 = vld [vmem:[%s7138_s5 + $0xf0] sm:$0xff]   ;;  %v7451_v36 = vmov 0.0  }
 0x439   :  { %v3387_v26 = vadd.f32 %v3315_v16, %v3145_v44  ;;  %v3438_v52 = vadd.f32 %v6978_v32, %v3415_v40  ;;  %v6994_v46 = vpop.f32.mrf.mxu0  ;;  %v7450_v40 = vld [vmem:[#allocation59_spill] sm:$0xff] }
 0x43a   :  { %v3317_v17 = vpop.f32.mrf.mxu1 }
 0x43b   :  { %v3416_v21 = vmax.f32 %v3386_v62, %v3387_v26  ;;  %v3388_v5 = vadd.f32 %v3317_v17, %v3146_v38  ;;  %v2644_v26 = vadd.f32 %v7448_v30, %v7447_v43  ;;  %v7449_v17 = vld [vmem:[#allocation57_spill] sm:$0xff]  ;;  %v4676_v43 = vld [vmem:[%s7138_s5 + $0xe8] sm:$0xff]  }
 0x43c   :  { %v3319_v1 = vpop.f32.mrf.mxu1 }
 0x43d   :  { %v3439_v28 = vadd.f32 %v6978_v32, %v3416_v21  ;;  %v3389_v54 = vadd.f32 %v3319_v1, %v3147_v18  ;;  %v2646_v21 = vadd.f32 %v7450_v40, %v7449_v17 }
 0x43e   :  { %v3323_v42 = vpop.f32.mrf.mxu1 }
 0x43f   :  { %v3453_v10 = vmax.f32 %v3437_v31, %v3439_v28  ;;  %v3417_v11 = vmax.f32 %v3388_v5, %v3389_v54  ;;  %v3390_v39 = vadd.f32 %v3323_v42, %v3148_v9  ;;  %v7004_v5 = vpop.f32.mrf.mxu0  ;;  %v2912_v54 = vadd.f32 %v6870_v3, %v2644_v26 }
 0x440   :  { %v3325_v58 = vpop.f32.mrf.mxu1  ;;  %v2913_v47 = vadd.f32 %v6872_v41, %v2646_v21  ;;  %v3157_v26 = vadd.f32 %v6973_v0, %v6884_v53  ;;  %v3158_v53 = vadd.f32 %v6982_v14, %v6890_v59  ;;  %v3159_v0 = vadd.f32 %v6990_v7, %v6894_v19  ;;  %v4680_v59 = vld [vmem:[%s7138_s5 + $0xd8] sm:$0xff]  }
 0x441   :  { %v3440_v23 = vadd.f32 %v6978_v32, %v3417_v11  ;;  %v3391_v4 = vadd.f32 %v3325_v58, %v3149_v8  ;;  %v3461_v18 = vmax.f32 %v3453_v10, 0.0  ;;  %v3153_v10 = vadd.f32 %v6943_v61, %v6866_v27  ;;  %v7015_v3 = vpop.f32.mrf.mxu0 }
 0x442   :  { %v3327_v44 = vpop.f32.mrf.mxu1  ;;  %v3155_v27 = vadd.f32 %v6955_v6, %v2913_v47  ;;  %v3156_v6 = vadd.f32 %v6961_v49, %v6880_v50  ;;  %v3160_v7 = vadd.f32 %v6994_v46, %v6900_v20  ;;  %v4682_v20 = vld [vmem:[%s7138_s5 + $0xd0] sm:$0xff]  }
 0x443   :  { %v3454_v16 = vmax.f32 %v3438_v52, %v3440_v23  ;;  %v3418_v62 = vmax.f32 %v3390_v39, %v3391_v4  ;;  %v3392_v31 = vadd.f32 %v3327_v44, %v3150_v56  ;;  %v3154_v23 = vadd.f32 %v6949_v12, %v2912_v54  ;;  %v3117_v56 = vpop.f32.mrf.mxu0 }
 0x444   :  { %v3329_v38 = vpop.f32.mrf.mxu1 }
 0x445   :  { %v3462_v1 = vmax.f32 %v3454_v16, 0.0  ;;  %v3393_v28 = vadd.f32 %v3329_v38, %v3151_v55  ;;  %v3441_v39 = vadd.f32 %v6978_v32, %v3418_v62  ;;  %v3121_v62 = vpop.f32.mrf.mxu0 }
 0x446   :  { %v3333_v22 = vpop.f32.mrf.mxu1 }
 0x447   :  { %v3469_v42 = vpack.c.bf16 %v3462_v1, %v3461_v18  ;;  %v3419_v11 = vmax.f32 %v3392_v31, %v3393_v28  ;;  %v3394_v8 = vadd.f32 %v3333_v22, %v3152_v13  ;;  %v4678_v31 = vld [vmem:[%s7138_s5 + $0xe0] sm:$0xff]   ;;  %v3123_v28 = vpop.f32.mrf.mxu0 }
 0x448   :  { %v3335_v9 = vpop.f32.mrf.mxu1 }
 0x449   :  { %v3395_v58 = vadd.f32 %v3335_v9, %v3153_v10  ;;  %4431 = vmatmul.mubr.bf16.vlgmr.msra.gmra.mxu1 %v3469_v42  ;;  %v3442_v40 = vadd.f32 %v6978_v32, %v3419_v11  ;;  %v4671_v11 = vld [vmem:[%s7138_s5 + $0xb8] sm:$0xff]   ;;  %v3161_v10 = vadd.f32 %v7004_v5, %v6906_v24  ;;  %v3125_v9 = vpop.f32.mrf.mxu0  ;;  %v3162_v24 = vadd.f32 %v7015_v3, %v6910_v15  ;;  %v4675_v3 = vld [vmem:[%s7138_s5 + $0xa8] sm:$0xff]  }
 0x44a   :  { %v3337_v52 = vpop.f32.mrf.mxu1  ;;  %4455 = vmatpush3.bf16.msra.mxu1 %v4672_v48  ;;  %4470 = vmatprep.mubr.msk.bf16.mxu1 %vm4719_vm2, %v7451_v36  ;;  %v3163_v5 = vadd.f32 %v3117_v56, %v6916_v35  ;;  %v3164_v15 = vadd.f32 %v3121_v62, %v6920_v33  ;;  %v4684_v56 = vld [vmem:[%s7138_s5 + $0xc8] sm:$0xff]  }
 0x44b   :  { %v3420_v41 = vmax.f32 %v3394_v8, %v3395_v58  ;;  %4456 = vmatprep.subr.bf16.mxu1 %v7451_v36  ;;  %v3396_v44 = vadd.f32 %v3337_v52, %v3154_v23  ;;  %v3127_v23 = vpop.f32.mrf.mxu0 }
 0x44c   :  { %v3339_v61 = vpop.f32.mrf.mxu1 }
 0x44d   :  { %v3443_v4 = vadd.f32 %v6978_v32, %v3420_v41  ;;  %v3397_v16 = vadd.f32 %v3339_v61, %v3155_v27  ;;  %v4673_v41 = vld [vmem:[%s7138_s5 + $0xb0] sm:$0xff]  }
 0x44e   :  { %v3343_v55 = vpop.f32.mrf.mxu1  ;;  %4457 = vmatpush3.bf16.msra.mxu1 %v4674_v51 }
 0x44f   :  { %v3455_v30 = vmax.f32 %v3441_v39, %v3443_v4  ;;  %v3421_v12 = vmax.f32 %v3396_v44, %v3397_v16  ;;  %4458 = vmatprep.subr.bf16.mxu1 %v7451_v36  ;;  %v3398_v38 = vadd.f32 %v3343_v55, %v3156_v6  ;;  %v3131_v16 = vpop.f32.mrf.mxu0 }
 0x450   :  { %v3345_v17 = vpop.f32.mrf.mxu1 }
 0x451   :  { %v3444_v21 = vadd.f32 %v6978_v32, %v3421_v12  ;;  %v3399_v18 = vadd.f32 %v3345_v17, %v3157_v26  ;;  %v3463_v13 = vmax.f32 %v3455_v30, 0.0  ;;  %v3165_v30 = vadd.f32 %v3123_v28, %v6926_v63  ;;  %v3133_v17 = vpop.f32.mrf.mxu0  ;;  %v4677_v63 = vld [vmem:[%s7138_s5 + $0xa0] sm:$0xff]  }
 0x452   :  { %v3347_v1 = vpop.f32.mrf.mxu1  ;;  %4459 = vmatpush3.bf16.msra.mxu1 %v4676_v43 }
 0x453   :  { %v3456_v50 = vmax.f32 %v3442_v40, %v3444_v21  ;;  %v3422_v49 = vmax.f32 %v3398_v38, %v3399_v18  ;;  %4460 = vmatprep.subr.bf16.mxu1 %v7451_v36  ;;  %v3400_v48 = vadd.f32 %v3347_v1, %v3158_v53  ;;  %v3166_v40 = vadd.f32 %v3125_v9, %v6928_v25  ;;  %v4686_v38 = vld [vmem:[%s7138_s5 + $0xc0] sm:$0xff]   ;;  %v3135_v28 = vpop.f32.mrf.mxu0 }
 0x454   :  { %v3349_v54 = vpop.f32.mrf.mxu1 }
 0x455   :  { %v3464_v22 = vmax.f32 %v3456_v50, 0.0  ;;  %v3401_v47 = vadd.f32 %v3349_v54, %v3159_v0  ;;  %v3445_v61 = vadd.f32 %v6978_v32, %v3422_v49  ;;  %v2928_v54 = vadd.f32 %v6945_v45, %v6803_v34 }
 0x456   :  { %v3353_v42 = vpop.f32.mrf.mxu1  ;;  %4461 = vmatpush3.bf16.msra.mxu1 %v4678_v31  ;;  %v3167_v31 = vadd.f32 %v3127_v23, %v6933_v60  ;;  %v4679_v60 = vld [vmem:[%s7138_s5 + $0x98] sm:$0xff]  }
 0x457   :  { %v3470_v14 = vpack.c.bf16 %v3464_v22, %v3463_v13  ;;  %v3423_v19 = vmax.f32 %v3400_v48, %v3401_v47  ;;  %4462 = vmatprep.subr.bf16.mxu1 %v7451_v36  ;;  %v3402_v58 = vadd.f32 %v3353_v42, %v3160_v7  ;;  %v3168_v13 = vadd.f32 %v3131_v16, %v6938_v2 }
 0x458   :  { %v3355_v8 = vpop.f32.mrf.mxu1  ;;  %v2929_v48 = vadd.f32 %v6947_v29, %v6808_v57 }
 0x459   :  { %v3403_v52 = vadd.f32 %v3355_v8, %v3161_v10  ;;  %4411 = vmatmul.mubr.bf16.vlgmr.msra.gmra.mxu0 %v3470_v14  ;;  %v3446_v33 = vadd.f32 %v6978_v32, %v3423_v19  ;;  %v3137_v14 = vpop.f32.mrf.mxu0  ;;  %v4681_v19 = vld [vmem:[%s7138_s5 + $0x90] sm:$0xff]   ;;  %v3170_v10 = vadd.f32 %v3135_v28, %v2928_v54 }
 0x45a   :  { %4435 = vmatpush3.bf16.msra.mxu0 %v4671_v11  ;;  %v3357_v51 = vpop.f32.mrf.mxu1  ;;  %4463 = vmatpush3.bf16.msra.mxu1 %v4680_v59  ;;  %v3169_v11 = vadd.f32 %v3133_v17, %v6941_v37  ;;  %v3171_v9 = vadd.f32 %v3137_v14, %v2929_v48 }
 0x45b   :  { %v3424_v46 = vmax.f32 %v3402_v58, %v3403_v52  ;;  %4436 = vmatprep.subr.bf16.mxu0 %v7451_v36  ;;  %4464 = vmatprep.subr.bf16.mxu1 %v7451_v36  ;;  %v3404_v4 = vadd.f32 %v3357_v51, %v3162_v24  ;;  %v4683_v52 = vld [vmem:[%s7138_s5 + $0x88] sm:$0xff]   ;;  %v4685_v24 = vld [vmem:[%s7138_s5 + $0x80] sm:$0xff]  }
 0x45c   :  { %v3359_v27 = vpop.f32.mrf.mxu1  ;;  %4450 = vmatprep.mubr.msk.bf16.mxu0 %vm4719_vm2, %v7451_v36 }
 0x45d   :  { %v3447_v39 = vadd.f32 %v6978_v32, %v3424_v46  ;;  %v3405_v44 = vadd.f32 %v3359_v27, %v3163_v5 }
 0x45e   :  { %4437 = vmatpush3.bf16.msra.mxu0 %v4673_v41  ;;  %v3363_v35 = vpop.f32.mrf.mxu1  ;;  %4465 = vmatpush3.bf16.msra.mxu1 %v4682_v20 }
 0x45f   :  { %v3457_v55 = vmax.f32 %v3445_v61, %v3447_v39  ;;  %v3425_v43 = vmax.f32 %v3404_v4, %v3405_v44  ;;  %4438 = vmatprep.subr.bf16.mxu0 %v7451_v36  ;;  %4466 = vmatprep.subr.bf16.mxu1 %v7451_v36  ;;  %v3406_v26 = vadd.f32 %v3363_v35, %v3164_v15 }
 0x460   :  { %v3365_v12 = vpop.f32.mrf.mxu1 }
 0x461   :  { %v3448_v6 = vadd.f32 %v6978_v32, %v3425_v43  ;;  %v3407_v62 = vadd.f32 %v3365_v12, %v3165_v30  ;;  %v3465_v25 = vmax.f32 %v3457_v55, 0.0 }
 0x462   :  { %4439 = vmatpush3.bf16.msra.mxu0 %v4675_v3  ;;  %v3367_v21 = vpop.f32.mrf.mxu1  ;;  %4467 = vmatpush3.bf16.msra.mxu1 %v4684_v56 }
 0x463   :  { %v3458_v18 = vmax.f32 %v3446_v33, %v3448_v6  ;;  %v3426_v1 = vmax.f32 %v3406_v26, %v3407_v62  ;;  %4440 = vmatprep.subr.bf16.mxu0 %v7451_v36  ;;  %4468 = vmatprep.subr.bf16.mxu1 %v7451_v36  ;;  %v3408_v53 = vadd.f32 %v3367_v21, %v3166_v40 }
 0x464   :  { %v3369_v50 = vpop.f32.mrf.mxu1 }
 0x465   :  { %v3466_v49 = vmax.f32 %v3458_v18, 0.0  ;;  %v3409_v0 = vadd.f32 %v3369_v50, %v3167_v31  ;;  %v3449_v37 = vadd.f32 %v6978_v32, %v3426_v1 }
 0x466   :  { %4441 = vmatpush3.bf16.msra.mxu0 %v4677_v63  ;;  %v3373_v22 = vpop.f32.mrf.mxu1  ;;  %4469 = vmatpush3.bf16.msra.mxu1 %v4686_v38 }
 0x467   :  { %v3471_v47 = vpack.c.bf16 %v3466_v49, %v3465_v25  ;;  %v3427_v42 = vmax.f32 %v3408_v53, %v3409_v0  ;;  %4442 = vmatprep.subr.bf16.mxu0 %v7451_v36  ;;  %v3410_v34 = vadd.f32 %v3373_v22, %v3168_v13 }
 0x468   :  { %v3375_v59 = vpop.f32.mrf.mxu1 }
 0x469   :  { %v3411_v45 = vadd.f32 %v3375_v59, %v3169_v11  ;;  %v3450_v20 = vadd.f32 %v6978_v32, %v3427_v42 }
 0x46a   :  { %4443 = vmatpush3.bf16.msra.mxu0 %v4679_v60  ;;  %v3377_v2 = vpop.f32.mrf.mxu1 }
 0x46b   :  { %v3428_v7 = vmax.f32 %v3410_v34, %v3411_v45  ;;  %4444 = vmatprep.subr.bf16.mxu0 %v7451_v36  ;;  %v3412_v8 = vadd.f32 %v3377_v2, %v3170_v10 }
 0x46c   :  { %v3379_v57 = vpop.f32.mrf.mxu1 }
 0x46d   :  { %v3451_v29 = vadd.f32 %v6978_v32, %v3428_v7  ;;  %v3413_v58 = vadd.f32 %v3379_v57, %v3171_v9 }
 0x46e   :  { %4445 = vmatpush3.bf16.msra.mxu0 %v4681_v19 }
 0x46f   :  { %v3459_v51 = vmax.f32 %v3449_v37, %v3451_v29  ;;  %v3429_v41 = vmax.f32 %v3412_v8, %v3413_v58  ;;  %4446 = vmatprep.subr.bf16.mxu0 %v7451_v36 }
 0x471   :  { %v3452_v46 = vadd.f32 %v6978_v32, %v3429_v41  ;;  %v3467_v23 = vmax.f32 %v3459_v51, 0.0 }
 0x472   :  { %4447 = vmatpush3.bf16.msra.mxu0 %v4683_v52 }
 0x473   :  { %v3460_v5 = vmax.f32 %v3450_v20, %v3452_v46  ;;  %4448 = vmatprep.subr.bf16.mxu0 %v7451_v36  ;;  %v4357_v36 = vld [vmem:[%s7140_s6] ss:$0 sm:$0xff] }
 0x475   :  { %v3468_v27 = vmax.f32 %v3460_v5, 0.0 }
 0x476   :  { %4449 = vmatpush3.bf16.msra.mxu0 %v4685_v24 }
 0x477   :  { %v3472_v61 = vpack.c.bf16 %v3468_v27, %v3467_v23 }
 0x479   :  { %4451 = vmatmul.mubr.bf16.vlgmr.msra.gmra.mxu0 %v3471_v47  ;;  %4471 = vmatmul.mubr.bf16.vlgmr.msra.gmra.mxu1 %v3472_v61 }
 0x509   :  { %v3677_v39 = vpop.f32.mrf.mxu1 }
 0x50b   :  { %v4432_v4 = vpop.f32.mrf.mxu1 }
 0x50d   :  { %v3680_v44 = vpop.f32.mrf.mxu1 }
 0x50f   :  { %v4433_v16 = vpop.f32.mrf.mxu1 }
 0x519   :  { %v3588_v15 = vpop.f32.mrf.mxu0 }
 0x51a   :  { %v3678_v56 = vadd.f32 %v3677_v39, %v3588_v15 }
 0x51b   :  { %v4412_v32 = vpop.f32.mrf.mxu0 }
 0x51d   :  { %v3591_v35 = vpop.f32.mrf.mxu0 }
 0x51e   :  { %v3681_v6 = vadd.f32 %v3680_v44, %v3591_v35 }
 0x51f   :  { %v4413_v3 = vpop.f32.mrf.mxu0 }
 0x539   :  { %v3783_v55 = vpop.f32.mrf.mxu0  ;;  %v3891_v43 = vpop.f32.mrf.mxu1 }
 0x53a   :  { %v3790_v30 = vadd.f32 %v3783_v55, %v3678_v56 }
 0x53b   :  { %v4452_v12 = vpop.f32.mrf.mxu0  ;;  %v4472_v33 = vpop.f32.mrf.mxu1 }
 0x53c   :  { %v3898_v26 = vadd.f32 %v3891_v43, %v3790_v30 }
 0x53d   :  { %v3786_v62 = vpop.f32.mrf.mxu0  ;;  %v3894_v17 = vpop.f32.mrf.mxu1 }
 0x53e   :  { %v3907_v40 = vadd.f32 %v4357_v36, %v3898_v26  ;;  %v3791_v21 = vadd.f32 %v3786_v62, %v3681_v6 }
 0x53f   :  { %v4453_v63 = vpop.f32.mrf.mxu0  ;;  %v4473_v38 = vpop.f32.mrf.mxu1 }
 0x540   :  { %v3899_v18 = vadd.f32 %v3894_v17, %v3791_v21  ;;  %v3910_v1 = vsel %vm3909_vm3, %v3907_v40, -inf }
 0x541   :  { %3911 = vmax.xlane.f32.xlu0 %v3910_v1 }
 0x542   :  { %v3908_v31 = vadd.f32 %v4357_v36, %v3899_v18 }
 0x544   :  { %v3913_v50 = vsel %vm3909_vm3, %v3908_v31, -inf }
 0x545   :  { %3914 = vmax.xlane.f32.xlu0 %v3913_v50 }
 0x5ca   :  { %v3912_v25 = vpop.xlane.xlu0 %3911 }
 0x5cb   :  { %v3916_v49 = vsub.f32 %v3907_v40, %v3912_v25 }
 0x5cd   :  { %v3918_v53 = vmul.f32 1.442695, %v3916_v49 }
 0x5ce   :  { %v3915_v0 = vpop.xlane.xlu0 %3914 }
 0x5cf   :  { %4687 = vpow2.f32 %v3918_v53  ;;  %v3917_v28 = vsub.f32 %v3908_v31, %v3915_v0 }
 0x5d1   :  { %v3920_v54 = vmul.f32 1.442695, %v3917_v28 }
 0x5d3   :  { %4689 = vpow2.f32 %v3920_v54 }
 0x5dc   :  { %v4688_v13 = vpop.eup %4687 }
 0x5dd   :  { %v3922_v22 = vsel %vm3909_vm3, %v4688_v13, 0.0 }
 0x5de   :  { %3923 = vadd.xlane.f32.xlu1 %v3922_v22 }
 0x5e0   :  { %v4690_v60 = vpop.eup %4689 }
 0x5e1   :  { %v3925_v48 = vsel %vm3909_vm3, %v4690_v60, 0.0 }
 0x5e2   :  { %3926 = vadd.xlane.f32.xlu1 %v3925_v48 }
 0x667   :  { %v3924_v47 = vpop.xlane.xlu1 %3923 }
 0x668   :  { %4691 = vlog2.f32 %v3924_v47 }
 0x66b   :  { %v3927_v42 = vpop.xlane.xlu1 %3926 }
 0x66c   :  { %4693 = vlog2.f32 %v3927_v42 }
 0x675   :  { %v4692_v11 = vpop.eup %4691 }
 0x676   :  { %v3929_v59 = vmul.f32 0.6931472, %v4692_v11 }
 0x678   :  { %v3932_v34 = vadd.f32 %v3929_v59, %v3912_v25 }
 0x679   :  { %v4694_v45 = vpop.eup %4693 }
 0x67a   :  { %v3934_v14 = vsub.f32 %v3907_v40, %v3932_v34  ;;  %v3931_v2 = vmul.f32 0.6931472, %v4694_v45 }
 0x67c   :  { %3936 = vst.msk [vmem:[%s7141_s7] sm:$0xff] %vm3909_vm3, %v3934_v14  ;;  %v3933_v19 = vadd.f32 %v3931_v2, %v3915_v0 }
 0x67e   :  { %v3935_v7 = vsub.f32 %v3908_v31, %v3933_v19 }
 0x680   :  { %3937 = vst.msk [vmem:[%s7141_s7 + $0x8] sm:$0xff] %vm3909_vm3, %v3935_v7 }

</bundles_post_ra>
